<compile_context>
chip_gen: v7x
topology: tpu7x:2x2x1
jax: 0.10.0
libtpu: 0.0.40
codegen_flags: <defaults>
</compile_context>

<pallas_src>
import functools
import math

import jax
import jax.numpy as jnp
from jax import lax
from jax.experimental import pallas as pl
from jax.experimental.pallas import tpu as pltpu  # noqa: F401  (TPU backend)

# Keep host-side weight fusion, the reference, and in-kernel matmuls at full
# f32 accuracy so the fused kernel tracks the unfused reference tightly.
jax.config.update("jax_default_matmul_precision", "highest")

HIDDEN_SIZE = 256
NUM_HEADS = 4
HEAD_DIM = HIDDEN_SIZE // NUM_HEADS  # 64
LN_EPS = 1e-6


def _layer_norm(x, gamma, beta, eps=LN_EPS):
    mean = jnp.mean(x, axis=-1, keepdims=True)
    var = jnp.mean((x - mean) * (x - mean), axis=-1, keepdims=True)
    return (x - mean) * lax.rsqrt(var + eps) * gamma + beta


def _cross_attn_kernel(q_ref, k_ref, v_ref, w256_ref, wout_ref, out_ref,
                       *, B, Lq, Lk, Dq, Dk):
    dot = lambda a, b: jnp.dot(a, b, preferred_element_type=jnp.float32)

    # ---- packed 256-wide params: fused in-projections + biases ------------
    o_k = Dq
    o_v = Dq + Dk
    o_b = Dq + 2 * Dk
    w_q = w256_ref[0:Dq, :]                     # (Dq, 256)  (q-scale folded in)
    w_k = w256_ref[o_k:o_k + Dk, :]             # (Dk, 256)
    w_v = w256_ref[o_v:o_v + Dk, :]             # (Dk, 256)
    b_q = w256_ref[o_b + 0:o_b + 1, :]          # (1, 256)
    b_k = w256_ref[o_b + 1:o_b + 2, :]
    b_v = w256_ref[o_b + 2:o_b + 3, :]

    # ---- packed Dq-wide params: fused out-proj∘fc, fc_1, biases, LN -------
    o_fc1 = HIDDEN_SIZE
    o_s = HIDDEN_SIZE + Dq
    w_of = wout_ref[0:HIDDEN_SIZE, :]           # (256, Dq) = w_mo @ w_fc
    w_fc1 = wout_ref[o_fc1:o_fc1 + Dq, :]       # (Dq, Dq)
    b_of = wout_ref[o_s + 0:o_s + 1, :]         # (1, Dq)
    b_fc1 = wout_ref[o_s + 1:o_s + 2, :]
    ln_g = wout_ref[o_s + 2:o_s + 3, :]
    ln_b = wout_ref[o_s + 3:o_s + 4, :]
    ln1_g = wout_ref[o_s + 4:o_s + 5, :]
    ln1_b = wout_ref[o_s + 5:o_s + 6, :]

    # ---- fused projections over the batch-folded row dimension ------------
    q2d = q_ref[...]                            # (B*Lq, Dq)
    qh = dot(q2d, w_q) + b_q                    # (B*Lq, 256), already scaled
    kh = dot(k_ref[...], w_k) + b_k             # (B*Lk, 256)
    vh = dot(v_ref[...], w_v) + b_v             # (B*Lk, 256)

    # ---- attention: static unroll over (small) batch and heads ------------
    for b in range(B):
        q_in_b = q2d[b * Lq:(b + 1) * Lq, :]    # (Lq, Dq)
        qh_b = qh[b * Lq:(b + 1) * Lq, :]
        kh_b = kh[b * Lk:(b + 1) * Lk, :]
        vh_b = vh[b * Lk:(b + 1) * Lk, :]

        # skip = fc(out_proj(ctx)) + query_i, with out_proj∘fc fused to w_of;
        # per-head partial products are accumulated directly (no concat).
        skip = q_in_b + b_of                    # (Lq, Dq)
        for h in range(NUM_HEADS):
            cs = slice(h * HEAD_DIM, (h + 1) * HEAD_DIM)
            scores = lax.dot_general(           # q @ k^T without explicit .T
                qh_b[:, cs], kh_b[:, cs],
                (((1,), (1,)), ((), ())),
                preferred_element_type=jnp.float32)        # (Lq, Lk)
            m = jnp.max(scores, axis=-1, keepdims=True)
            e = jnp.exp(scores - m)
            inv_l = pl.reciprocal(jnp.sum(e, axis=-1, keepdims=True),
                                  approx=True)
            attn = e * inv_l                                # softmax
            ctx_h = dot(attn, vh_b[:, cs])                  # (Lq, 64)
            skip = skip + dot(ctx_h, w_of[cs, :])           # (Lq, Dq)

        skip = jnp.maximum(skip, 0.0)
        skip = _layer_norm(skip, ln_g, ln_b)

        new = dot(skip, w_fc1) + b_fc1 + skip
        new = jnp.maximum(new, 0.0)
        out_b = _layer_norm(new, ln1_g, ln1_b)

        out_ref[b * Lq:(b + 1) * Lq, :] = out_b.astype(out_ref.dtype)


def pack_params(p):
    """Host-side exact fusion + packing of all module params into 2 arrays."""
    scale = 1.0 / math.sqrt(HEAD_DIM)
    # fc_q/fc_k/fc_v folded into MHA in-projections (q-scaling folded too).
    w_q = (p["w_fcq"] @ p["w_mq"]) * scale
    b_q = (p["b_fcq"] @ p["w_mq"] + p["b_mq"]) * scale
    w_k = p["w_fck"] @ p["w_mk"]
    b_k = p["b_fck"] @ p["w_mk"] + p["b_mk"]
    w_v = p["w_fcv"] @ p["w_mv"]
    b_v = p["b_fcv"] @ p["w_mv"] + p["b_mv"]
    # MHA out-projection folded into fc.
    w_of = p["w_mo"] @ p["w_fc"]
    b_of = p["b_mo"] @ p["w_fc"] + p["b_fc"]

    packed256 = jnp.concatenate([w_q, w_k, w_v, b_q, b_k, b_v], axis=0)
    packed_out = jnp.concatenate(
        [w_of, p["w_fc1"], b_of, p["b_fc1"],
         p["ln_g"], p["ln_b"], p["ln1_g"], p["ln1_b"]], axis=0)
    return packed256, packed_out


def cross_attention_forward(q_in, k_in, v_in, params):
    B, Lq, Dq = q_in.shape
    _, Lk, Dk = k_in.shape
    packed256, packed_out = pack_params(params)

    kernel = functools.partial(_cross_attn_kernel,
                               B=B, Lq=Lq, Lk=Lk, Dq=Dq, Dk=Dk)
    # Single pallas_call, no grid: the whole (tiny) problem fits in VMEM and
    # there are only 5 input DMAs (3 activations + 2 packed weight arrays).
    out2d = pl.pallas_call(
        kernel,
        out_shape=jax.ShapeDtypeStruct((B * Lq, Dq), q_in.dtype),
    )(q_in.reshape(B * Lq, Dq),
      k_in.reshape(B * Lk, Dk),
      v_in.reshape(B * Lk, Dk),
      packed256, packed_out)
    return out2d.reshape(B, Lq, Dq)


def reference_forward(q_in, k_in, v_in, p):
    """Pure-JAX reference mirroring the PyTorch module (eval mode), UNFUSED."""
    B, Lq, Dq = q_in.shape
    q = q_in @ p["w_fcq"] + p["b_fcq"]
    k = k_in @ p["w_fck"] + p["b_fck"]
    v = v_in @ p["w_fcv"] + p["b_fcv"]

    qh = q @ p["w_mq"] + p["b_mq"]
    kh = k @ p["w_mk"] + p["b_mk"]
    vh = v @ p["w_mv"] + p["b_mv"]

    def split_heads(x):
        B_, L, _ = x.shape
        return x.reshape(B_, L, NUM_HEADS, HEAD_DIM)

    qh, kh, vh = split_heads(qh), split_heads(kh), split_heads(vh)
    scores = jnp.einsum("bqhd,bkhd->bhqk", qh, kh) / math.sqrt(HEAD_DIM)
    attn = jax.nn.softmax(scores, axis=-1)
    ctx = jnp.einsum("bhqk,bkhd->bqhd", attn, vh).reshape(B, Lq, HIDDEN_SIZE)
    cross = ctx @ p["w_mo"] + p["b_mo"]

    def layer_norm(x, g, b):
        mean = jnp.mean(x, axis=-1, keepdims=True)
        var = jnp.mean((x - mean) ** 2, axis=-1, keepdims=True)
        return (x - mean) / jnp.sqrt(var + LN_EPS) * g + b

    skip = cross @ p["w_fc"] + p["b_fc"] + q_in
    skip = jax.nn.relu(skip)
    skip = layer_norm(skip, p["ln_g"], p["ln_b"])
    new = skip @ p["w_fc1"] + p["b_fc1"] + skip
    new = jax.nn.relu(new)
    return layer_norm(new, p["ln1_g"], p["ln1_b"])


def init_params(key, hidden_dim_q, hidden_dim_k):
    """Deterministic, PyTorch-Linear-style uniform init."""
    def linear(k, fan_in, fan_out):
        kw, kb = jax.random.split(k)
        bound = 1.0 / math.sqrt(fan_in)
        w = jax.random.uniform(kw, (fan_in, fan_out), jnp.float32, -bound, bound)
        b = jax.random.uniform(kb, (1, fan_out), jnp.float32, -bound, bound)
        return w, b

    ks = jax.random.split(key, 12)
    p = {}
    p["w_fcq"], p["b_fcq"] = linear(ks[0], hidden_dim_q, HIDDEN_SIZE)
    p["w_fck"], p["b_fck"] = linear(ks[1], hidden_dim_k, HIDDEN_SIZE)
    p["w_fcv"], p["b_fcv"] = linear(ks[2], hidden_dim_k, HIDDEN_SIZE)
    # nn.MultiheadAttention in_proj (split into q/k/v) and out_proj
    p["w_mq"], p["b_mq"] = linear(ks[3], HIDDEN_SIZE, HIDDEN_SIZE)
    p["w_mk"], p["b_mk"] = linear(ks[4], HIDDEN_SIZE, HIDDEN_SIZE)
    p["w_mv"], p["b_mv"] = linear(ks[5], HIDDEN_SIZE, HIDDEN_SIZE)
    p["w_mo"], p["b_mo"] = linear(ks[6], HIDDEN_SIZE, HIDDEN_SIZE)
    p["w_fc"], p["b_fc"] = linear(ks[7], HIDDEN_SIZE, hidden_dim_q)
    p["w_fc1"], p["b_fc1"] = linear(ks[8], hidden_dim_q, hidden_dim_q)
    # LayerNorms: perturbed affine params so the test exercises them
    p["ln_g"] = 1.0 + 0.05 * jax.random.normal(ks[9], (1, hidden_dim_q), jnp.float32)
    p["ln_b"] = 0.05 * jax.random.normal(ks[10], (1, hidden_dim_q), jnp.float32)
    p["ln1_g"] = 1.0 + 0.05 * jax.random.normal(ks[11], (1, hidden_dim_q), jnp.float32)
    p["ln1_b"] = jnp.zeros((1, hidden_dim_q), jnp.float32)
    return p


if __name__ == "__main__":
    # Small shapes consistent with the module's forward.
    B, Lq, Lk = 2, 8, 16
    hidden_dim_q, hidden_dim_k = 32, 48

    key = jax.random.PRNGKey(0)
    k_param, k_q, k_k, k_v = jax.random.split(key, 4)

    params = init_params(k_param, hidden_dim_q, hidden_dim_k)
    query_i = jax.random.normal(k_q, (B, Lq, hidden_dim_q), jnp.float32)
    key_i = jax.random.normal(k_k, (B, Lk, hidden_dim_k), jnp.float32)
    value_i = jax.random.normal(k_v, (B, Lk, hidden_dim_k), jnp.float32)

    out = cross_attention_forward(query_i, key_i, value_i, params)
    out = jax.block_until_ready(out)

    ref = reference_forward(query_i, key_i, value_i, params)
    assert out.shape == (B, Lq, hidden_dim_q)
    assert jnp.allclose(out, ref, atol=2e-3, rtol=2e-3), (
        float(jnp.max(jnp.abs(out - ref))))

    # TODO(synk): dropout (module p=0.5 and MHA attn-dropout) intentionally
    # omitted — eval-mode (identity) semantics are implemented.
    print("KERNEL_OK")
</pallas_src>

<mosaic_0001>
module attributes {stable_mosaic.version = 11 : i64} {
  func.func @_cross_attn_kernel(%arg0: memref<16x32xf32, #tpu.memory_space<vmem>>, %arg1: memref<32x48xf32, #tpu.memory_space<vmem>>, %arg2: memref<32x48xf32, #tpu.memory_space<vmem>>, %arg3: memref<131x256xf32, #tpu.memory_space<vmem>>, %arg4: memref<294x32xf32, #tpu.memory_space<vmem>>, %arg5: memref<16x32xf32, #tpu.memory_space<vmem>>) attributes {dimension_semantics = [], scalar_prefetch = 0 : i64, scratch_operands = 0 : i64, tpu.core_type = #tpu.core_type<tc>} {
    %c0 = arith.constant 0 : index
    %c0_0 = arith.constant 0 : index
    %0 = vector.load %arg3[%c0, %c0_0] : memref<131x256xf32, #tpu.memory_space<vmem>>, vector<32x256xf32>
    %c32 = arith.constant 32 : index
    %c0_1 = arith.constant 0 : index
    %1 = vector.load %arg3[%c32, %c0_1] : memref<131x256xf32, #tpu.memory_space<vmem>>, vector<48x256xf32>
    %c80 = arith.constant 80 : index
    %c0_2 = arith.constant 0 : index
    %2 = vector.load %arg3[%c80, %c0_2] : memref<131x256xf32, #tpu.memory_space<vmem>>, vector<48x256xf32>
    %c128 = arith.constant 128 : index
    %c0_3 = arith.constant 0 : index
    %3 = vector.load %arg3[%c128, %c0_3] : memref<131x256xf32, #tpu.memory_space<vmem>>, vector<1x256xf32>
    %c129 = arith.constant 129 : index
    %c0_4 = arith.constant 0 : index
    %4 = vector.load %arg3[%c129, %c0_4] : memref<131x256xf32, #tpu.memory_space<vmem>>, vector<1x256xf32>
    %c130 = arith.constant 130 : index
    %c0_5 = arith.constant 0 : index
    %5 = vector.load %arg3[%c130, %c0_5] : memref<131x256xf32, #tpu.memory_space<vmem>>, vector<1x256xf32>
    %c0_6 = arith.constant 0 : index
    %c0_7 = arith.constant 0 : index
    %6 = vector.load %arg4[%c0_6, %c0_7] : memref<294x32xf32, #tpu.memory_space<vmem>>, vector<256x32xf32>
    %c256 = arith.constant 256 : index
    %c0_8 = arith.constant 0 : index
    %7 = vector.load %arg4[%c256, %c0_8] : memref<294x32xf32, #tpu.memory_space<vmem>>, vector<32x32xf32>
    %c288 = arith.constant 288 : index
    %c0_9 = arith.constant 0 : index
    %8 = vector.load %arg4[%c288, %c0_9] : memref<294x32xf32, #tpu.memory_space<vmem>>, vector<1x32xf32>
    %c289 = arith.constant 289 : index
    %c0_10 = arith.constant 0 : index
    %9 = vector.load %arg4[%c289, %c0_10] : memref<294x32xf32, #tpu.memory_space<vmem>>, vector<1x32xf32>
    %c290 = arith.constant 290 : index
    %c0_11 = arith.constant 0 : index
    %10 = vector.load %arg4[%c290, %c0_11] : memref<294x32xf32, #tpu.memory_space<vmem>>, vector<1x32xf32>
    %c291 = arith.constant 291 : index
    %c0_12 = arith.constant 0 : index
    %11 = vector.load %arg4[%c291, %c0_12] : memref<294x32xf32, #tpu.memory_space<vmem>>, vector<1x32xf32>
    %c292 = arith.constant 292 : index
    %c0_13 = arith.constant 0 : index
    %12 = vector.load %arg4[%c292, %c0_13] : memref<294x32xf32, #tpu.memory_space<vmem>>, vector<1x32xf32>
    %c293 = arith.constant 293 : index
    %c0_14 = arith.constant 0 : index
    %13 = vector.load %arg4[%c293, %c0_14] : memref<294x32xf32, #tpu.memory_space<vmem>>, vector<1x32xf32>
    %c0_15 = arith.constant 0 : index
    %c0_16 = arith.constant 0 : index
    %14 = vector.load %arg0[%c0_15, %c0_16] : memref<16x32xf32, #tpu.memory_space<vmem>>, vector<16x32xf32>
    %cst = arith.constant dense<0.000000e+00> : vector<16x256xf32>
    %15 = tpu.matmul %14, %0, %cst {dimension_numbers = #tpu.dot_dimension_numbers<[1], [0], [0], [1], [0, 0, 1, 1], [], []>, precision = #tpu.contract_precision<fp32>} : vector<16x32xf32>, vector<32x256xf32>, vector<16x256xf32> -> vector<16x256xf32>
    %16 = vector.broadcast %3 : vector<1x256xf32> to vector<16x256xf32>
    %17 = arith.addf %15, %16 : vector<16x256xf32>
    %c0_17 = arith.constant 0 : index
    %c0_18 = arith.constant 0 : index
    %18 = vector.load %arg1[%c0_17, %c0_18] : memref<32x48xf32, #tpu.memory_space<vmem>>, vector<32x48xf32>
    %cst_19 = arith.constant dense<0.000000e+00> : vector<32x256xf32>
    %19 = tpu.matmul %18, %1, %cst_19 {dimension_numbers = #tpu.dot_dimension_numbers<[1], [0], [0], [1], [0, 0, 1, 1], [], []>, precision = #tpu.contract_precision<fp32>} : vector<32x48xf32>, vector<48x256xf32>, vector<32x256xf32> -> vector<32x256xf32>
    %20 = vector.broadcast %4 : vector<1x256xf32> to vector<32x256xf32>
    %21 = arith.addf %19, %20 : vector<32x256xf32>
    %c0_20 = arith.constant 0 : index
    %c0_21 = arith.constant 0 : index
    %22 = vector.load %arg2[%c0_20, %c0_21] : memref<32x48xf32, #tpu.memory_space<vmem>>, vector<32x48xf32>
    %cst_22 = arith.constant dense<0.000000e+00> : vector<32x256xf32>
    %23 = tpu.matmul %22, %2, %cst_22 {dimension_numbers = #tpu.dot_dimension_numbers<[1], [0], [0], [1], [0, 0, 1, 1], [], []>, precision = #tpu.contract_precision<fp32>} : vector<32x48xf32>, vector<48x256xf32>, vector<32x256xf32> -> vector<32x256xf32>
    %24 = vector.broadcast %5 : vector<1x256xf32> to vector<32x256xf32>
    %25 = arith.addf %23, %24 : vector<32x256xf32>
    %26 = vector.extract_strided_slice %14 {offsets = [0, 0], sizes = [8, 32], strides = [1, 1]} : vector<16x32xf32> to vector<8x32xf32>
    %27 = vector.extract_strided_slice %17 {offsets = [0, 0], sizes = [8, 256], strides = [1, 1]} : vector<16x256xf32> to vector<8x256xf32>
    %28 = vector.extract_strided_slice %21 {offsets = [0, 0], sizes = [16, 256], strides = [1, 1]} : vector<32x256xf32> to vector<16x256xf32>
    %29 = vector.extract_strided_slice %25 {offsets = [0, 0], sizes = [16, 256], strides = [1, 1]} : vector<32x256xf32> to vector<16x256xf32>
    %30 = vector.broadcast %8 : vector<1x32xf32> to vector<8x32xf32>
    %31 = arith.addf %26, %30 : vector<8x32xf32>
    %32 = vector.extract_strided_slice %27 {offsets = [0, 0], sizes = [8, 64], strides = [1, 1]} : vector<8x256xf32> to vector<8x64xf32>
    %33 = vector.extract_strided_slice %28 {offsets = [0, 0], sizes = [16, 64], strides = [1, 1]} : vector<16x256xf32> to vector<16x64xf32>
    %cst_23 = arith.constant dense<0.000000e+00> : vector<8x16xf32>
    %34 = tpu.matmul %32, %33, %cst_23 {dimension_numbers = #tpu.dot_dimension_numbers<[1], [1], [0], [0], [0, 0, 1, 0], [], []>, precision = #tpu.contract_precision<fp32>} : vector<8x64xf32>, vector<16x64xf32>, vector<8x16xf32> -> vector<8x16xf32>
    %cst_24 = arith.constant dense<0xFF800000> : vector<8xf32>
    %35 = vector.multi_reduction <maximumf>, %34, %cst_24 [1] : vector<8x16xf32> to vector<8xf32>
    %36 = vector.shape_cast %35 : vector<8xf32> to vector<8x1xf32>
    %37 = vector.broadcast %36 : vector<8x1xf32> to vector<8x16xf32>
    %38 = arith.subf %34, %37 : vector<8x16xf32>
    %39 = math.exp %38 : vector<8x16xf32>
    %cst_25 = arith.constant dense<0.000000e+00> : vector<8xf32>
    %40 = vector.multi_reduction <add>, %39, %cst_25 [1] : vector<8x16xf32> to vector<8xf32>
    %41 = vector.shape_cast %40 : vector<8xf32> to vector<8x1xf32>
    %42 = tpu.reciprocal %41 {approx = true} : vector<8x1xf32> -> vector<8x1xf32>
    %43 = vector.broadcast %42 : vector<8x1xf32> to vector<8x16xf32>
    %44 = arith.mulf %39, %43 : vector<8x16xf32>
    %45 = vector.extract_strided_slice %29 {offsets = [0, 0], sizes = [16, 64], strides = [1, 1]} : vector<16x256xf32> to vector<16x64xf32>
    %cst_26 = arith.constant dense<0.000000e+00> : vector<8x64xf32>
    %46 = tpu.matmul %44, %45, %cst_26 {dimension_numbers = #tpu.dot_dimension_numbers<[1], [0], [0], [1], [0, 0, 1, 1], [], []>, precision = #tpu.contract_precision<fp32>} : vector<8x16xf32>, vector<16x64xf32>, vector<8x64xf32> -> vector<8x64xf32>
    %47 = vector.extract_strided_slice %6 {offsets = [0, 0], sizes = [64, 32], strides = [1, 1]} : vector<256x32xf32> to vector<64x32xf32>
    %cst_27 = arith.constant dense<0.000000e+00> : vector<8x32xf32>
    %48 = tpu.matmul %46, %47, %cst_27 {dimension_numbers = #tpu.dot_dimension_numbers<[1], [0], [0], [1], [0, 0, 1, 1], [], []>, precision = #tpu.contract_precision<fp32>} : vector<8x64xf32>, vector<64x32xf32>, vector<8x32xf32> -> vector<8x32xf32>
    %49 = arith.addf %31, %48 : vector<8x32xf32>
    %50 = vector.extract_strided_slice %27 {offsets = [0, 64], sizes = [8, 64], strides = [1, 1]} : vector<8x256xf32> to vector<8x64xf32>
    %51 = vector.extract_strided_slice %28 {offsets = [0, 64], sizes = [16, 64], strides = [1, 1]} : vector<16x256xf32> to vector<16x64xf32>
    %cst_28 = arith.constant dense<0.000000e+00> : vector<8x16xf32>
    %52 = tpu.matmul %50, %51, %cst_28 {dimension_numbers = #tpu.dot_dimension_numbers<[1], [1], [0], [0], [0, 0, 1, 0], [], []>, precision = #tpu.contract_precision<fp32>} : vector<8x64xf32>, vector<16x64xf32>, vector<8x16xf32> -> vector<8x16xf32>
    %cst_29 = arith.constant dense<0xFF800000> : vector<8xf32>
    %53 = vector.multi_reduction <maximumf>, %52, %cst_29 [1] : vector<8x16xf32> to vector<8xf32>
    %54 = vector.shape_cast %53 : vector<8xf32> to vector<8x1xf32>
    %55 = vector.broadcast %54 : vector<8x1xf32> to vector<8x16xf32>
    %56 = arith.subf %52, %55 : vector<8x16xf32>
    %57 = math.exp %56 : vector<8x16xf32>
    %cst_30 = arith.constant dense<0.000000e+00> : vector<8xf32>
    %58 = vector.multi_reduction <add>, %57, %cst_30 [1] : vector<8x16xf32> to vector<8xf32>
    %59 = vector.shape_cast %58 : vector<8xf32> to vector<8x1xf32>
    %60 = tpu.reciprocal %59 {approx = true} : vector<8x1xf32> -> vector<8x1xf32>
    %61 = vector.broadcast %60 : vector<8x1xf32> to vector<8x16xf32>
    %62 = arith.mulf %57, %61 : vector<8x16xf32>
    %63 = vector.extract_strided_slice %29 {offsets = [0, 64], sizes = [16, 64], strides = [1, 1]} : vector<16x256xf32> to vector<16x64xf32>
    %cst_31 = arith.constant dense<0.000000e+00> : vector<8x64xf32>
    %64 = tpu.matmul %62, %63, %cst_31 {dimension_numbers = #tpu.dot_dimension_numbers<[1], [0], [0], [1], [0, 0, 1, 1], [], []>, precision = #tpu.contract_precision<fp32>} : vector<8x16xf32>, vector<16x64xf32>, vector<8x64xf32> -> vector<8x64xf32>
    %65 = vector.extract_strided_slice %6 {offsets = [64, 0], sizes = [64, 32], strides = [1, 1]} : vector<256x32xf32> to vector<64x32xf32>
    %cst_32 = arith.constant dense<0.000000e+00> : vector<8x32xf32>
    %66 = tpu.matmul %64, %65, %cst_32 {dimension_numbers = #tpu.dot_dimension_numbers<[1], [0], [0], [1], [0, 0, 1, 1], [], []>, precision = #tpu.contract_precision<fp32>} : vector<8x64xf32>, vector<64x32xf32>, vector<8x32xf32> -> vector<8x32xf32>
    %67 = arith.addf %49, %66 : vector<8x32xf32>
    %68 = vector.extract_strided_slice %27 {offsets = [0, 128], sizes = [8, 64], strides = [1, 1]} : vector<8x256xf32> to vector<8x64xf32>
    %69 = vector.extract_strided_slice %28 {offsets = [0, 128], sizes = [16, 64], strides = [1, 1]} : vector<16x256xf32> to vector<16x64xf32>
    %cst_33 = arith.constant dense<0.000000e+00> : vector<8x16xf32>
    %70 = tpu.matmul %68, %69, %cst_33 {dimension_numbers = #tpu.dot_dimension_numbers<[1], [1], [0], [0], [0, 0, 1, 0], [], []>, precision = #tpu.contract_precision<fp32>} : vector<8x64xf32>, vector<16x64xf32>, vector<8x16xf32> -> vector<8x16xf32>
    %cst_34 = arith.constant dense<0xFF800000> : vector<8xf32>
    %71 = vector.multi_reduction <maximumf>, %70, %cst_34 [1] : vector<8x16xf32> to vector<8xf32>
    %72 = vector.shape_cast %71 : vector<8xf32> to vector<8x1xf32>
    %73 = vector.broadcast %72 : vector<8x1xf32> to vector<8x16xf32>
    %74 = arith.subf %70, %73 : vector<8x16xf32>
    %75 = math.exp %74 : vector<8x16xf32>
    %cst_35 = arith.constant dense<0.000000e+00> : vector<8xf32>
    %76 = vector.multi_reduction <add>, %75, %cst_35 [1] : vector<8x16xf32> to vector<8xf32>
    %77 = vector.shape_cast %76 : vector<8xf32> to vector<8x1xf32>
    %78 = tpu.reciprocal %77 {approx = true} : vector<8x1xf32> -> vector<8x1xf32>
    %79 = vector.broadcast %78 : vector<8x1xf32> to vector<8x16xf32>
    %80 = arith.mulf %75, %79 : vector<8x16xf32>
    %81 = vector.extract_strided_slice %29 {offsets = [0, 128], sizes = [16, 64], strides = [1, 1]} : vector<16x256xf32> to vector<16x64xf32>
    %cst_36 = arith.constant dense<0.000000e+00> : vector<8x64xf32>
    %82 = tpu.matmul %80, %81, %cst_36 {dimension_numbers = #tpu.dot_dimension_numbers<[1], [0], [0], [1], [0, 0, 1, 1], [], []>, precision = #tpu.contract_precision<fp32>} : vector<8x16xf32>, vector<16x64xf32>, vector<8x64xf32> -> vector<8x64xf32>
    %83 = vector.extract_strided_slice %6 {offsets = [128, 0], sizes = [64, 32], strides = [1, 1]} : vector<256x32xf32> to vector<64x32xf32>
    %cst_37 = arith.constant dense<0.000000e+00> : vector<8x32xf32>
    %84 = tpu.matmul %82, %83, %cst_37 {dimension_numbers = #tpu.dot_dimension_numbers<[1], [0], [0], [1], [0, 0, 1, 1], [], []>, precision = #tpu.contract_precision<fp32>} : vector<8x64xf32>, vector<64x32xf32>, vector<8x32xf32> -> vector<8x32xf32>
    %85 = arith.addf %67, %84 : vector<8x32xf32>
    %86 = vector.extract_strided_slice %27 {offsets = [0, 192], sizes = [8, 64], strides = [1, 1]} : vector<8x256xf32> to vector<8x64xf32>
    %87 = vector.extract_strided_slice %28 {offsets = [0, 192], sizes = [16, 64], strides = [1, 1]} : vector<16x256xf32> to vector<16x64xf32>
    %cst_38 = arith.constant dense<0.000000e+00> : vector<8x16xf32>
    %88 = tpu.matmul %86, %87, %cst_38 {dimension_numbers = #tpu.dot_dimension_numbers<[1], [1], [0], [0], [0, 0, 1, 0], [], []>, precision = #tpu.contract_precision<fp32>} : vector<8x64xf32>, vector<16x64xf32>, vector<8x16xf32> -> vector<8x16xf32>
    %cst_39 = arith.constant dense<0xFF800000> : vector<8xf32>
    %89 = vector.multi_reduction <maximumf>, %88, %cst_39 [1] : vector<8x16xf32> to vector<8xf32>
    %90 = vector.shape_cast %89 : vector<8xf32> to vector<8x1xf32>
    %91 = vector.broadcast %90 : vector<8x1xf32> to vector<8x16xf32>
    %92 = arith.subf %88, %91 : vector<8x16xf32>
    %93 = math.exp %92 : vector<8x16xf32>
    %cst_40 = arith.constant dense<0.000000e+00> : vector<8xf32>
    %94 = vector.multi_reduction <add>, %93, %cst_40 [1] : vector<8x16xf32> to vector<8xf32>
    %95 = vector.shape_cast %94 : vector<8xf32> to vector<8x1xf32>
    %96 = tpu.reciprocal %95 {approx = true} : vector<8x1xf32> -> vector<8x1xf32>
    %97 = vector.broadcast %96 : vector<8x1xf32> to vector<8x16xf32>
    %98 = arith.mulf %93, %97 : vector<8x16xf32>
    %99 = vector.extract_strided_slice %29 {offsets = [0, 192], sizes = [16, 64], strides = [1, 1]} : vector<16x256xf32> to vector<16x64xf32>
    %cst_41 = arith.constant dense<0.000000e+00> : vector<8x64xf32>
    %100 = tpu.matmul %98, %99, %cst_41 {dimension_numbers = #tpu.dot_dimension_numbers<[1], [0], [0], [1], [0, 0, 1, 1], [], []>, precision = #tpu.contract_precision<fp32>} : vector<8x16xf32>, vector<16x64xf32>, vector<8x64xf32> -> vector<8x64xf32>
    %101 = vector.extract_strided_slice %6 {offsets = [192, 0], sizes = [64, 32], strides = [1, 1]} : vector<256x32xf32> to vector<64x32xf32>
    %cst_42 = arith.constant dense<0.000000e+00> : vector<8x32xf32>
    %102 = tpu.matmul %100, %101, %cst_42 {dimension_numbers = #tpu.dot_dimension_numbers<[1], [0], [0], [1], [0, 0, 1, 1], [], []>, precision = #tpu.contract_precision<fp32>} : vector<8x64xf32>, vector<64x32xf32>, vector<8x32xf32> -> vector<8x32xf32>
    %103 = arith.addf %85, %102 : vector<8x32xf32>
    %cst_43 = arith.constant 0.000000e+00 : f32
    %104 = vector.broadcast %cst_43 : f32 to vector<8x32xf32>
    %105 = arith.maximumf %103, %104 : vector<8x32xf32>
    %cst_44 = arith.constant dense<0.000000e+00> : vector<8xf32>
    %106 = vector.multi_reduction <add>, %105, %cst_44 [1] : vector<8x32xf32> to vector<8xf32>
    %107 = vector.shape_cast %106 : vector<8xf32> to vector<8x1xf32>
    %cst_45 = arith.constant 3.200000e+01 : f32
    %108 = vector.broadcast %cst_45 : f32 to vector<8x1xf32>
    %109 = arith.divf %107, %108 : vector<8x1xf32>
    %110 = vector.broadcast %109 : vector<8x1xf32> to vector<8x32xf32>
    %111 = arith.subf %105, %110 : vector<8x32xf32>
    %112 = vector.broadcast %109 : vector<8x1xf32> to vector<8x32xf32>
    %113 = arith.subf %105, %112 : vector<8x32xf32>
    %114 = arith.mulf %111, %113 : vector<8x32xf32>
    %cst_46 = arith.constant dense<0.000000e+00> : vector<8xf32>
    %115 = vector.multi_reduction <add>, %114, %cst_46 [1] : vector<8x32xf32> to vector<8xf32>
    %116 = vector.shape_cast %115 : vector<8xf32> to vector<8x1xf32>
    %cst_47 = arith.constant 3.200000e+01 : f32
    %117 = vector.broadcast %cst_47 : f32 to vector<8x1xf32>
    %118 = arith.divf %116, %117 : vector<8x1xf32>
    %119 = vector.broadcast %109 : vector<8x1xf32> to vector<8x32xf32>
    %120 = arith.subf %105, %119 : vector<8x32xf32>
    %cst_48 = arith.constant 9.99999997E-7 : f32
    %121 = vector.broadcast %cst_48 : f32 to vector<8x1xf32>
    %122 = arith.addf %118, %121 : vector<8x1xf32>
    %123 = math.rsqrt %122 : vector<8x1xf32>
    %124 = vector.broadcast %123 : vector<8x1xf32> to vector<8x32xf32>
    %125 = arith.mulf %120, %124 : vector<8x32xf32>
    %126 = vector.broadcast %10 : vector<1x32xf32> to vector<8x32xf32>
    %127 = arith.mulf %125, %126 : vector<8x32xf32>
    %128 = vector.broadcast %11 : vector<1x32xf32> to vector<8x32xf32>
    %129 = arith.addf %127, %128 : vector<8x32xf32>
    %cst_49 = arith.constant dense<0.000000e+00> : vector<8x32xf32>
    %130 = tpu.matmul %129, %7, %cst_49 {dimension_numbers = #tpu.dot_dimension_numbers<[1], [0], [0], [1], [0, 0, 1, 1], [], []>, precision = #tpu.contract_precision<fp32>} : vector<8x32xf32>, vector<32x32xf32>, vector<8x32xf32> -> vector<8x32xf32>
    %131 = vector.broadcast %9 : vector<1x32xf32> to vector<8x32xf32>
    %132 = arith.addf %130, %131 : vector<8x32xf32>
    %133 = arith.addf %132, %129 : vector<8x32xf32>
    %cst_50 = arith.constant 0.000000e+00 : f32
    %134 = vector.broadcast %cst_50 : f32 to vector<8x32xf32>
    %135 = arith.maximumf %133, %134 : vector<8x32xf32>
    %cst_51 = arith.constant dense<0.000000e+00> : vector<8xf32>
    %136 = vector.multi_reduction <add>, %135, %cst_51 [1] : vector<8x32xf32> to vector<8xf32>
    %137 = vector.shape_cast %136 : vector<8xf32> to vector<8x1xf32>
    %cst_52 = arith.constant 3.200000e+01 : f32
    %138 = vector.broadcast %cst_52 : f32 to vector<8x1xf32>
    %139 = arith.divf %137, %138 : vector<8x1xf32>
    %140 = vector.broadcast %139 : vector<8x1xf32> to vector<8x32xf32>
    %141 = arith.subf %135, %140 : vector<8x32xf32>
    %142 = vector.broadcast %139 : vector<8x1xf32> to vector<8x32xf32>
    %143 = arith.subf %135, %142 : vector<8x32xf32>
    %144 = arith.mulf %141, %143 : vector<8x32xf32>
    %cst_53 = arith.constant dense<0.000000e+00> : vector<8xf32>
    %145 = vector.multi_reduction <add>, %144, %cst_53 [1] : vector<8x32xf32> to vector<8xf32>
    %146 = vector.shape_cast %145 : vector<8xf32> to vector<8x1xf32>
    %cst_54 = arith.constant 3.200000e+01 : f32
    %147 = vector.broadcast %cst_54 : f32 to vector<8x1xf32>
    %148 = arith.divf %146, %147 : vector<8x1xf32>
    %149 = vector.broadcast %139 : vector<8x1xf32> to vector<8x32xf32>
    %150 = arith.subf %135, %149 : vector<8x32xf32>
    %cst_55 = arith.constant 9.99999997E-7 : f32
    %151 = vector.broadcast %cst_55 : f32 to vector<8x1xf32>
    %152 = arith.addf %148, %151 : vector<8x1xf32>
    %153 = math.rsqrt %152 : vector<8x1xf32>
    %154 = vector.broadcast %153 : vector<8x1xf32> to vector<8x32xf32>
    %155 = arith.mulf %150, %154 : vector<8x32xf32>
    %156 = vector.broadcast %12 : vector<1x32xf32> to vector<8x32xf32>
    %157 = arith.mulf %155, %156 : vector<8x32xf32>
    %158 = vector.broadcast %13 : vector<1x32xf32> to vector<8x32xf32>
    %159 = arith.addf %157, %158 : vector<8x32xf32>
    %c0_56 = arith.constant 0 : index
    %c0_57 = arith.constant 0 : index
    %160 = vector.load %arg5[%c0_56, %c0_57] : memref<16x32xf32, #tpu.memory_space<vmem>>, vector<8x32xf32>
    tpu.vector_store %arg5[%c0_56, %c0_57], %159 {strides = array<i32>} : memref<16x32xf32, #tpu.memory_space<vmem>>, vector<8x32xf32>,
    %161 = vector.extract_strided_slice %14 {offsets = [8, 0], sizes = [8, 32], strides = [1, 1]} : vector<16x32xf32> to vector<8x32xf32>
    %162 = vector.extract_strided_slice %17 {offsets = [8, 0], sizes = [8, 256], strides = [1, 1]} : vector<16x256xf32> to vector<8x256xf32>
    %163 = vector.extract_strided_slice %21 {offsets = [16, 0], sizes = [16, 256], strides = [1, 1]} : vector<32x256xf32> to vector<16x256xf32>
    %164 = vector.extract_strided_slice %25 {offsets = [16, 0], sizes = [16, 256], strides = [1, 1]} : vector<32x256xf32> to vector<16x256xf32>
    %165 = vector.broadcast %8 : vector<1x32xf32> to vector<8x32xf32>
    %166 = arith.addf %161, %165 : vector<8x32xf32>
    %167 = vector.extract_strided_slice %162 {offsets = [0, 0], sizes = [8, 64], strides = [1, 1]} : vector<8x256xf32> to vector<8x64xf32>
    %168 = vector.extract_strided_slice %163 {offsets = [0, 0], sizes = [16, 64], strides = [1, 1]} : vector<16x256xf32> to vector<16x64xf32>
    %cst_58 = arith.constant dense<0.000000e+00> : vector<8x16xf32>
    %169 = tpu.matmul %167, %168, %cst_58 {dimension_numbers = #tpu.dot_dimension_numbers<[1], [1], [0], [0], [0, 0, 1, 0], [], []>, precision = #tpu.contract_precision<fp32>} : vector<8x64xf32>, vector<16x64xf32>, vector<8x16xf32> -> vector<8x16xf32>
    %cst_59 = arith.constant dense<0xFF800000> : vector<8xf32>
    %170 = vector.multi_reduction <maximumf>, %169, %cst_59 [1] : vector<8x16xf32> to vector<8xf32>
    %171 = vector.shape_cast %170 : vector<8xf32> to vector<8x1xf32>
    %172 = vector.broadcast %171 : vector<8x1xf32> to vector<8x16xf32>
    %173 = arith.subf %169, %172 : vector<8x16xf32>
    %174 = math.exp %173 : vector<8x16xf32>
    %cst_60 = arith.constant dense<0.000000e+00> : vector<8xf32>
    %175 = vector.multi_reduction <add>, %174, %cst_60 [1] : vector<8x16xf32> to vector<8xf32>
    %176 = vector.shape_cast %175 : vector<8xf32> to vector<8x1xf32>
    %177 = tpu.reciprocal %176 {approx = true} : vector<8x1xf32> -> vector<8x1xf32>
    %178 = vector.broadcast %177 : vector<8x1xf32> to vector<8x16xf32>
    %179 = arith.mulf %174, %178 : vector<8x16xf32>
    %180 = vector.extract_strided_slice %164 {offsets = [0, 0], sizes = [16, 64], strides = [1, 1]} : vector<16x256xf32> to vector<16x64xf32>
    %cst_61 = arith.constant dense<0.000000e+00> : vector<8x64xf32>
    %181 = tpu.matmul %179, %180, %cst_61 {dimension_numbers = #tpu.dot_dimension_numbers<[1], [0], [0], [1], [0, 0, 1, 1], [], []>, precision = #tpu.contract_precision<fp32>} : vector<8x16xf32>, vector<16x64xf32>, vector<8x64xf32> -> vector<8x64xf32>
    %182 = vector.extract_strided_slice %6 {offsets = [0, 0], sizes = [64, 32], strides = [1, 1]} : vector<256x32xf32> to vector<64x32xf32>
    %cst_62 = arith.constant dense<0.000000e+00> : vector<8x32xf32>
    %183 = tpu.matmul %181, %182, %cst_62 {dimension_numbers = #tpu.dot_dimension_numbers<[1], [0], [0], [1], [0, 0, 1, 1], [], []>, precision = #tpu.contract_precision<fp32>} : vector<8x64xf32>, vector<64x32xf32>, vector<8x32xf32> -> vector<8x32xf32>
    %184 = arith.addf %166, %183 : vector<8x32xf32>
    %185 = vector.extract_strided_slice %162 {offsets = [0, 64], sizes = [8, 64], strides = [1, 1]} : vector<8x256xf32> to vector<8x64xf32>
    %186 = vector.extract_strided_slice %163 {offsets = [0, 64], sizes = [16, 64], strides = [1, 1]} : vector<16x256xf32> to vector<16x64xf32>
    %cst_63 = arith.constant dense<0.000000e+00> : vector<8x16xf32>
    %187 = tpu.matmul %185, %186, %cst_63 {dimension_numbers = #tpu.dot_dimension_numbers<[1], [1], [0], [0], [0, 0, 1, 0], [], []>, precision = #tpu.contract_precision<fp32>} : vector<8x64xf32>, vector<16x64xf32>, vector<8x16xf32> -> vector<8x16xf32>
    %cst_64 = arith.constant dense<0xFF800000> : vector<8xf32>
    %188 = vector.multi_reduction <maximumf>, %187, %cst_64 [1] : vector<8x16xf32> to vector<8xf32>
    %189 = vector.shape_cast %188 : vector<8xf32> to vector<8x1xf32>
    %190 = vector.broadcast %189 : vector<8x1xf32> to vector<8x16xf32>
    %191 = arith.subf %187, %190 : vector<8x16xf32>
    %192 = math.exp %191 : vector<8x16xf32>
    %cst_65 = arith.constant dense<0.000000e+00> : vector<8xf32>
    %193 = vector.multi_reduction <add>, %192, %cst_65 [1] : vector<8x16xf32> to vector<8xf32>
    %194 = vector.shape_cast %193 : vector<8xf32> to vector<8x1xf32>
    %195 = tpu.reciprocal %194 {approx = true} : vector<8x1xf32> -> vector<8x1xf32>
    %196 = vector.broadcast %195 : vector<8x1xf32> to vector<8x16xf32>
    %197 = arith.mulf %192, %196 : vector<8x16xf32>
    %198 = vector.extract_strided_slice %164 {offsets = [0, 64], sizes = [16, 64], strides = [1, 1]} : vector<16x256xf32> to vector<16x64xf32>
    %cst_66 = arith.constant dense<0.000000e+00> : vector<8x64xf32>
    %199 = tpu.matmul %197, %198, %cst_66 {dimension_numbers = #tpu.dot_dimension_numbers<[1], [0], [0], [1], [0, 0, 1, 1], [], []>, precision = #tpu.contract_precision<fp32>} : vector<8x16xf32>, vector<16x64xf32>, vector<8x64xf32> -> vector<8x64xf32>
    %200 = vector.extract_strided_slice %6 {offsets = [64, 0], sizes = [64, 32], strides = [1, 1]} : vector<256x32xf32> to vector<64x32xf32>
    %cst_67 = arith.constant dense<0.000000e+00> : vector<8x32xf32>
    %201 = tpu.matmul %199, %200, %cst_67 {dimension_numbers = #tpu.dot_dimension_numbers<[1], [0], [0], [1], [0, 0, 1, 1], [], []>, precision = #tpu.contract_precision<fp32>} : vector<8x64xf32>, vector<64x32xf32>, vector<8x32xf32> -> vector<8x32xf32>
    %202 = arith.addf %184, %201 : vector<8x32xf32>
    %203 = vector.extract_strided_slice %162 {offsets = [0, 128], sizes = [8, 64], strides = [1, 1]} : vector<8x256xf32> to vector<8x64xf32>
    %204 = vector.extract_strided_slice %163 {offsets = [0, 128], sizes = [16, 64], strides = [1, 1]} : vector<16x256xf32> to vector<16x64xf32>
    %cst_68 = arith.constant dense<0.000000e+00> : vector<8x16xf32>
    %205 = tpu.matmul %203, %204, %cst_68 {dimension_numbers = #tpu.dot_dimension_numbers<[1], [1], [0], [0], [0, 0, 1, 0], [], []>, precision = #tpu.contract_precision<fp32>} : vector<8x64xf32>, vector<16x64xf32>, vector<8x16xf32> -> vector<8x16xf32>
    %cst_69 = arith.constant dense<0xFF800000> : vector<8xf32>
    %206 = vector.multi_reduction <maximumf>, %205, %cst_69 [1] : vector<8x16xf32> to vector<8xf32>
    %207 = vector.shape_cast %206 : vector<8xf32> to vector<8x1xf32>
    %208 = vector.broadcast %207 : vector<8x1xf32> to vector<8x16xf32>
    %209 = arith.subf %205, %208 : vector<8x16xf32>
    %210 = math.exp %209 : vector<8x16xf32>
    %cst_70 = arith.constant dense<0.000000e+00> : vector<8xf32>
    %211 = vector.multi_reduction <add>, %210, %cst_70 [1] : vector<8x16xf32> to vector<8xf32>
    %212 = vector.shape_cast %211 : vector<8xf32> to vector<8x1xf32>
    %213 = tpu.reciprocal %212 {approx = true} : vector<8x1xf32> -> vector<8x1xf32>
    %214 = vector.broadcast %213 : vector<8x1xf32> to vector<8x16xf32>
    %215 = arith.mulf %210, %214 : vector<8x16xf32>
    %216 = vector.extract_strided_slice %164 {offsets = [0, 128], sizes = [16, 64], strides = [1, 1]} : vector<16x256xf32> to vector<16x64xf32>
    %cst_71 = arith.constant dense<0.000000e+00> : vector<8x64xf32>
    %217 = tpu.matmul %215, %216, %cst_71 {dimension_numbers = #tpu.dot_dimension_numbers<[1], [0], [0], [1], [0, 0, 1, 1], [], []>, precision = #tpu.contract_precision<fp32>} : vector<8x16xf32>, vector<16x64xf32>, vector<8x64xf32> -> vector<8x64xf32>
    %218 = vector.extract_strided_slice %6 {offsets = [128, 0], sizes = [64, 32], strides = [1, 1]} : vector<256x32xf32> to vector<64x32xf32>
    %cst_72 = arith.constant dense<0.000000e+00> : vector<8x32xf32>
    %219 = tpu.matmul %217, %218, %cst_72 {dimension_numbers = #tpu.dot_dimension_numbers<[1], [0], [0], [1], [0, 0, 1, 1], [], []>, precision = #tpu.contract_precision<fp32>} : vector<8x64xf32>, vector<64x32xf32>, vector<8x32xf32> -> vector<8x32xf32>
    %220 = arith.addf %202, %219 : vector<8x32xf32>
    %221 = vector.extract_strided_slice %162 {offsets = [0, 192], sizes = [8, 64], strides = [1, 1]} : vector<8x256xf32> to vector<8x64xf32>
    %222 = vector.extract_strided_slice %163 {offsets = [0, 192], sizes = [16, 64], strides = [1, 1]} : vector<16x256xf32> to vector<16x64xf32>
    %cst_73 = arith.constant dense<0.000000e+00> : vector<8x16xf32>
    %223 = tpu.matmul %221, %222, %cst_73 {dimension_numbers = #tpu.dot_dimension_numbers<[1], [1], [0], [0], [0, 0, 1, 0], [], []>, precision = #tpu.contract_precision<fp32>} : vector<8x64xf32>, vector<16x64xf32>, vector<8x16xf32> -> vector<8x16xf32>
    %cst_74 = arith.constant dense<0xFF800000> : vector<8xf32>
    %224 = vector.multi_reduction <maximumf>, %223, %cst_74 [1] : vector<8x16xf32> to vector<8xf32>
    %225 = vector.shape_cast %224 : vector<8xf32> to vector<8x1xf32>
    %226 = vector.broadcast %225 : vector<8x1xf32> to vector<8x16xf32>
    %227 = arith.subf %223, %226 : vector<8x16xf32>
    %228 = math.exp %227 : vector<8x16xf32>
    %cst_75 = arith.constant dense<0.000000e+00> : vector<8xf32>
    %229 = vector.multi_reduction <add>, %228, %cst_75 [1] : vector<8x16xf32> to vector<8xf32>
    %230 = vector.shape_cast %229 : vector<8xf32> to vector<8x1xf32>
    %231 = tpu.reciprocal %230 {approx = true} : vector<8x1xf32> -> vector<8x1xf32>
    %232 = vector.broadcast %231 : vector<8x1xf32> to vector<8x16xf32>
    %233 = arith.mulf %228, %232 : vector<8x16xf32>
    %234 = vector.extract_strided_slice %164 {offsets = [0, 192], sizes = [16, 64], strides = [1, 1]} : vector<16x256xf32> to vector<16x64xf32>
    %cst_76 = arith.constant dense<0.000000e+00> : vector<8x64xf32>
    %235 = tpu.matmul %233, %234, %cst_76 {dimension_numbers = #tpu.dot_dimension_numbers<[1], [0], [0], [1], [0, 0, 1, 1], [], []>, precision = #tpu.contract_precision<fp32>} : vector<8x16xf32>, vector<16x64xf32>, vector<8x64xf32> -> vector<8x64xf32>
    %236 = vector.extract_strided_slice %6 {offsets = [192, 0], sizes = [64, 32], strides = [1, 1]} : vector<256x32xf32> to vector<64x32xf32>
    %cst_77 = arith.constant dense<0.000000e+00> : vector<8x32xf32>
    %237 = tpu.matmul %235, %236, %cst_77 {dimension_numbers = #tpu.dot_dimension_numbers<[1], [0], [0], [1], [0, 0, 1, 1], [], []>, precision = #tpu.contract_precision<fp32>} : vector<8x64xf32>, vector<64x32xf32>, vector<8x32xf32> -> vector<8x32xf32>
    %238 = arith.addf %220, %237 : vector<8x32xf32>
    %cst_78 = arith.constant 0.000000e+00 : f32
    %239 = vector.broadcast %cst_78 : f32 to vector<8x32xf32>
    %240 = arith.maximumf %238, %239 : vector<8x32xf32>
    %cst_79 = arith.constant dense<0.000000e+00> : vector<8xf32>
    %241 = vector.multi_reduction <add>, %240, %cst_79 [1] : vector<8x32xf32> to vector<8xf32>
    %242 = vector.shape_cast %241 : vector<8xf32> to vector<8x1xf32>
    %cst_80 = arith.constant 3.200000e+01 : f32
    %243 = vector.broadcast %cst_80 : f32 to vector<8x1xf32>
    %244 = arith.divf %242, %243 : vector<8x1xf32>
    %245 = vector.broadcast %244 : vector<8x1xf32> to vector<8x32xf32>
    %246 = arith.subf %240, %245 : vector<8x32xf32>
    %247 = vector.broadcast %244 : vector<8x1xf32> to vector<8x32xf32>
    %248 = arith.subf %240, %247 : vector<8x32xf32>
    %249 = arith.mulf %246, %248 : vector<8x32xf32>
    %cst_81 = arith.constant dense<0.000000e+00> : vector<8xf32>
    %250 = vector.multi_reduction <add>, %249, %cst_81 [1] : vector<8x32xf32> to vector<8xf32>
    %251 = vector.shape_cast %250 : vector<8xf32> to vector<8x1xf32>
    %cst_82 = arith.constant 3.200000e+01 : f32
    %252 = vector.broadcast %cst_82 : f32 to vector<8x1xf32>
    %253 = arith.divf %251, %252 : vector<8x1xf32>
    %254 = vector.broadcast %244 : vector<8x1xf32> to vector<8x32xf32>
    %255 = arith.subf %240, %254 : vector<8x32xf32>
    %cst_83 = arith.constant 9.99999997E-7 : f32
    %256 = vector.broadcast %cst_83 : f32 to vector<8x1xf32>
    %257 = arith.addf %253, %256 : vector<8x1xf32>
    %258 = math.rsqrt %257 : vector<8x1xf32>
    %259 = vector.broadcast %258 : vector<8x1xf32> to vector<8x32xf32>
    %260 = arith.mulf %255, %259 : vector<8x32xf32>
    %261 = vector.broadcast %10 : vector<1x32xf32> to vector<8x32xf32>
    %262 = arith.mulf %260, %261 : vector<8x32xf32>
    %263 = vector.broadcast %11 : vector<1x32xf32> to vector<8x32xf32>
    %264 = arith.addf %262, %263 : vector<8x32xf32>
    %cst_84 = arith.constant dense<0.000000e+00> : vector<8x32xf32>
    %265 = tpu.matmul %264, %7, %cst_84 {dimension_numbers = #tpu.dot_dimension_numbers<[1], [0], [0], [1], [0, 0, 1, 1], [], []>, precision = #tpu.contract_precision<fp32>} : vector<8x32xf32>, vector<32x32xf32>, vector<8x32xf32> -> vector<8x32xf32>
    %266 = vector.broadcast %9 : vector<1x32xf32> to vector<8x32xf32>
    %267 = arith.addf %265, %266 : vector<8x32xf32>
    %268 = arith.addf %267, %264 : vector<8x32xf32>
    %cst_85 = arith.constant 0.000000e+00 : f32
    %269 = vector.broadcast %cst_85 : f32 to vector<8x32xf32>
    %270 = arith.maximumf %268, %269 : vector<8x32xf32>
    %cst_86 = arith.constant dense<0.000000e+00> : vector<8xf32>
    %271 = vector.multi_reduction <add>, %270, %cst_86 [1] : vector<8x32xf32> to vector<8xf32>
    %272 = vector.shape_cast %271 : vector<8xf32> to vector<8x1xf32>
    %cst_87 = arith.constant 3.200000e+01 : f32
    %273 = vector.broadcast %cst_87 : f32 to vector<8x1xf32>
    %274 = arith.divf %272, %273 : vector<8x1xf32>
    %275 = vector.broadcast %274 : vector<8x1xf32> to vector<8x32xf32>
    %276 = arith.subf %270, %275 : vector<8x32xf32>
    %277 = vector.broadcast %274 : vector<8x1xf32> to vector<8x32xf32>
    %278 = arith.subf %270, %277 : vector<8x32xf32>
    %279 = arith.mulf %276, %278 : vector<8x32xf32>
    %cst_88 = arith.constant dense<0.000000e+00> : vector<8xf32>
    %280 = vector.multi_reduction <add>, %279, %cst_88 [1] : vector<8x32xf32> to vector<8xf32>
    %281 = vector.shape_cast %280 : vector<8xf32> to vector<8x1xf32>
    %cst_89 = arith.constant 3.200000e+01 : f32
    %282 = vector.broadcast %cst_89 : f32 to vector<8x1xf32>
    %283 = arith.divf %281, %282 : vector<8x1xf32>
    %284 = vector.broadcast %274 : vector<8x1xf32> to vector<8x32xf32>
    %285 = arith.subf %270, %284 : vector<8x32xf32>
    %cst_90 = arith.constant 9.99999997E-7 : f32
    %286 = vector.broadcast %cst_90 : f32 to vector<8x1xf32>
    %287 = arith.addf %283, %286 : vector<8x1xf32>
    %288 = math.rsqrt %287 : vector<8x1xf32>
    %289 = vector.broadcast %288 : vector<8x1xf32> to vector<8x32xf32>
    %290 = arith.mulf %285, %289 : vector<8x32xf32>
    %291 = vector.broadcast %12 : vector<1x32xf32> to vector<8x32xf32>
    %292 = arith.mulf %290, %291 : vector<8x32xf32>
    %293 = vector.broadcast %13 : vector<1x32xf32> to vector<8x32xf32>
    %294 = arith.addf %292, %293 : vector<8x32xf32>
    %c8 = arith.constant 8 : index
    %c0_91 = arith.constant 0 : index
    %295 = vector.load %arg5[%c8, %c0_91] : memref<16x32xf32, #tpu.memory_space<vmem>>, vector<8x32xf32>
    tpu.vector_store %arg5[%c8, %c0_91], %294 {strides = array<i32>} : memref<16x32xf32, #tpu.memory_space<vmem>>, vector<8x32xf32>,
    return
  }
}

</mosaic_0001>

<bundles_post_ra>
// kernel: tpu_custom_call.1
= control target key start
LH: loop header
LB: loop body
LE: loop exit
PB: predicated region body
PF: predicated region fallthrough
CT: control target
= control target key end

     0   :  { %vm114_vm0 = vcmask 261120   ;;  %v21735_v9 = vmov 0.0   ;;  %s21703_s0 = inlined_call_operand.vmem [shape: f32[16,32], index: 0, kind: input, shape index: {}]   ;;  %s21704_s1 = inlined_call_operand.vmem [shape: f32[32,48], index: 1, kind: input, shape index: {}]   ;;  %s21705_s2 = inlined_call_operand.vmem [shape: f32[32,48], index: 2, kind: input, shape index: {}]   ;;  %s21706_s3 = inlined_call_operand.vmem [shape: f32[131,256], index: 3, kind: input, shape index: {}]   ;;  %s21707_s4 = inlined_call_operand.vmem [shape: f32[294,32], index: 4, kind: input, shape index: {}]   ;;  %s21708_s5 = inlined_call_operand.hbm [shape: f32[16,32], index: 5, kind: output, shape index: {}]  }
   0x1   :  { %v22_v0 = vld [vmem:[%s21706_s3 + $0x8] sm:$0xff]  ;;  %v24_v1 = vld [vmem:[%s21706_s3 + $0x18] sm:$0xff]  ;;  %v21_v2 = vld [vmem:[%s21706_s3] sm:$0xff]  ;;  %193 = vmatprep.mubr.f32.mxu0 %v21735_v9  ;;  %1212 = vmatprep.mubr.f32.mxu1 %v21735_v9 }
   0x2   :  { %v121_v3 = vand.u32 4294901760, %v22_v0  ;;  %v125_v4 = vand.u32 4294901760, %v24_v1  ;;  %v23_v5 = vld [vmem:[%s21706_s3 + $0x10] sm:$0xff]  ;;  %v123_v6 = vand.u32 4294901760, %v21_v2  ;;  %v26_v7 = vld [vmem:[%s21706_s3 + $0x28] sm:$0xff]  ;;  %v28_v8 = vld [vmem:[%s21706_s3 + $0x38] sm:$0xff] }
   0x3   :  { %v127_v10 = vand.u32 4294901760, %v23_v5  ;;  %v129_v11 = vand.u32 4294901760, %v26_v7  ;;  %v133_v12 = vand.u32 4294901760, %v28_v8  ;;  %v25_v13 = vld [vmem:[%s21706_s3 + $0x20] sm:$0xff]  ;;  %v27_v14 = vld [vmem:[%s21706_s3 + $0x30] sm:$0xff]  ;;  %v102_v32 = vld [vmem:[%s21703_s0 + $0x8] sm:$0xff] }
   0x4   :  { %v101_v15 = vld [vmem:[%s21703_s0] sm:$0xff]  ;;  %v19390_v16 = vpack.c.bf16 %v125_v4, %v121_v3  ;;  %v19392_v17 = vsub.f32 %v22_v0, %v121_v3  ;;  %v19394_v18 = vsub.f32 %v24_v1, %v125_v4  ;;  %v19396_v19 = vsub.f32 %v21_v2, %v123_v6 }
   0x5   :  { %v19398_v20 = vpack.c.bf16 %v127_v10, %v123_v6  ;;  %v19400_v21 = vsub.f32 %v23_v5, %v127_v10  ;;  %v19402_v22 = vpack.c.bf16 %v133_v12, %v129_v11  ;;  %v19404_v23 = vsub.f32 %v26_v7, %v129_v11 }
   0x6   :  { %17747 = vmatprep.subr.bf16.mxu0 %v19390_v16  ;;  %v19407_v24 = vsub.f32 %v28_v8, %v133_v12  ;;  %v131_v25 = vand.u32 4294901760, %v25_v13  ;;  %v135_v26 = vand.u32 4294901760, %v27_v14  ;;  %v116_v27 = vsel %vm114_vm0, %v101_v15, 0 }
   0x7   :  { %17749 = vmatpush1.bf16.msra.mxu0 %v19398_v20  ;;  %v19411_v28 = vand.u32 4294901760, %v116_v27  ;;  %v218_v29 = vand.u32 4294901760, %v19392_v17  ;;  %v230_v30 = vand.u32 4294901760, %v19394_v18  ;;  %v224_v31 = vand.u32 4294901760, %v19396_v19 }
   0x8   :  { %17751 = vmatprep.subr.bf16.mxu0 %v19402_v22  ;;  %v19420_v33 = vpack.c.bf16 %v135_v26, %v131_v25  ;;  %v19422_v34 = vsub.f32 %v25_v13, %v131_v25  ;;  %v19424_v35 = vsub.f32 %v27_v14, %v135_v26  ;;  %v236_v36 = vand.u32 4294901760, %v19400_v21 }
   0x9   :  { %v19428_v37 = vsub.f32 %v116_v27, %v19411_v28  ;;  %v219_v38 = vsub.f32 %v19392_v17, %v218_v29  ;;  %v231_v39 = vsub.f32 %v19394_v18, %v230_v30  ;;  %v225_v40 = vsub.f32 %v19396_v19, %v224_v31 }
   0xa   :  { %v237_v41 = vsub.f32 %v19400_v21, %v236_v36  ;;  %v119_v42 = vsel %vm114_vm0, %v102_v32, 0  ;;  %v242_v43 = vand.u32 4294901760, %v19404_v23  ;;  %v254_v44 = vand.u32 4294901760, %v19407_v24 }
   0xb   :  { %17753 = vmatpush1.bf16.msra.mxu0 %v19420_v33  ;;  %v196_v45 = vand.u32 4294901760, %v19428_v37  ;;  %v220_v46 = vand.u32 4294901760, %v219_v38  ;;  %v232_v47 = vand.u32 4294901760, %v231_v39  ;;  %v226_v48 = vand.u32 4294901760, %v225_v40 }
   0xc   :  { %10 = vsyncpa [#allocation3], 0  ;;  %v238_v49 = vand.u32 4294901760, %v237_v41  ;;  %v19447_v50 = vand.u32 4294901760, %v119_v42  ;;  %v243_v51 = vsub.f32 %v19404_v23, %v242_v43  ;;  %v255_v52 = vsub.f32 %v19407_v24, %v254_v44  ;;  %v30_v57 = vld [vmem:[%s21706_s3 + $0x48] sm:$0xff]  ;;  %v32_v62 = vld [vmem:[%s21706_s3 + $0x58] sm:$0xff] }
   0xd   :  { %v197_v53 = vsub.f32 %v19428_v37, %v196_v45  ;;  %v17754_v54 = vpack.c.bf16 %v232_v47, %v220_v46  ;;  %v248_v55 = vand.u32 4294901760, %v19422_v34  ;;  %v260_v56 = vand.u32 4294901760, %v19424_v35  ;;  %v29_v63 = vld [vmem:[%s21706_s3 + $0x40] sm:$0xff]  ;;  %v31_v3 = vld [vmem:[%s21706_s3 + $0x50] sm:$0xff]  ;;  %v34_v12 = vld [vmem:[%s21706_s3 + $0x68] sm:$0xff]  ;;  %s19327_s23 = smov 64  }
   0xe   :  { %v17756_v58 = vpack.c.bf16 %v238_v49, %v226_v48  ;;  %v19464_v59 = vsub.f32 %v119_v42, %v19447_v50  ;;  %v244_v60 = vand.u32 4294901760, %v243_v51  ;;  %v256_v61 = vand.u32 4294901760, %v255_v52  ;;  %v36_v13 = vld [vmem:[%s21706_s3 + $0x78] sm:$0xff]  ;;  %v33_v25 = vld [vmem:[%s21706_s3 + $0x60] sm:$0xff]  ;;  %v35_v26 = vld [vmem:[%s21706_s3 + $0x70] sm:$0xff] }
   0xf   :  { %v198_v0 = vand.u32 4294901760, %v197_v53  ;;  %17755 = vmatprep.subr.bf16.mxu0 %v17754_v54  ;;  %v249_v1 = vsub.f32 %v19422_v34, %v248_v55  ;;  %v261_v2 = vsub.f32 %v19424_v35, %v260_v56  ;;  %v741_v6 = vand.u32 4294901760, %v30_v57  ;;  %v38_v27 = vld [vmem:[%s21706_s3 + $0x88] sm:$0xff]  ;;  %v40_v40 = vld [vmem:[%s21706_s3 + $0x98] sm:$0xff]  ;;  %v37_v41 = vld [vmem:[%s21706_s3 + $0x80] sm:$0xff] }
  0x10   :  { %v21709_v4 = vand.u32 4294901760, %v19464_v59  ;;  %v17758_v5 = vpack.c.bf16 %v256_v61, %v244_v60  ;;  %v745_v10 = vand.u32 4294901760, %v32_v62  ;;  %v743_v11 = vand.u32 4294901760, %v29_v63  ;;  %v19514_v42 = vld [vmem:[%s21706_s3 + $0x90] sm:$0xff]  ;;  %v713_v51 = vld [vmem:[%s21704_s1] sm:$0xff] }
  0x11   :  { %199 = vmatmul.mubr.f32.vlgmr.msra.gmra.mrb[0].mxu0 %v198_v0  ;;  %v250_v7 = vand.u32 4294901760, %v249_v1  ;;  %v262_v8 = vand.u32 4294901760, %v261_v2  ;;  %v747_v15 = vand.u32 4294901760, %v31_v3  ;;  %v17762_v38 = vpack.c.bf16 %v19394_v18, %v19392_v17 }
  0x12   :  { %17757 = vmatpush1.bf16.msra.mxu0 %v17756_v58  ;;  %204 = vmatprep.mubr.f32.mxu0 %v21735_v9  ;;  %v208_v14 = vsub.f32 %v19464_v59, %v21709_v4  ;;  %v19503_v39 = vpack.c.bf16 %v745_v10, %v741_v6  ;;  %vm728_vm1 = vcmask 392192   ;;  %v17764_v47 = vpack.c.bf16 %v19400_v21, %v19396_v19 }
  0x13   :  { %17759 = vmatprep.subr.bf16.mxu0 %v17758_v5  ;;  %v17760_v32 = vpack.c.bf16 %v262_v8, %v250_v7  ;;  %v19518_v48 = vsub.f32 %v30_v57, %v741_v6  ;;  %v19520_v49 = vpack.c.bf16 %v747_v15, %v743_v11  ;;  %v749_v52 = vand.u32 4294901760, %v34_v12 }
  0x14   :  { %v209_v46 = vand.u32 4294901760, %v208_v14  ;;  %17831 = vmatprep.subr.bf16.mxu1 %v19503_v39  ;;  %v753_v53 = vand.u32 4294901760, %v36_v13  ;;  %v751_v54 = vand.u32 4294901760, %v33_v25  ;;  %v755_v58 = vand.u32 4294901760, %v35_v26 }
  0x15   :  { %17833 = vmatpush1.bf16.msra.mxu1 %v19520_v49  ;;  %v757_v60 = vand.u32 4294901760, %v38_v27  ;;  %v761_v61 = vand.u32 4294901760, %v40_v40  ;;  %v759_v0 = vand.u32 4294901760, %v37_v41  ;;  %v763_v57 = vand.u32 4294901760, %v19514_v42 }
  0x16   :  { %210 = vmatmul.mubr.f32.gmra.mrb[2].mxu0 %v209_v46  ;;  %v19529_v1 = vsub.f32 %v32_v62, %v745_v10  ;;  %v19531_v2 = vsub.f32 %v29_v63, %v743_v11  ;;  %v19533_v5 = vpack.c.bf16 %v753_v53, %v749_v52  ;;  %v730_v6 = vsel %vm728_vm1, %v713_v51, 0  ;;  %v714_v62 = vld [vmem:[%s21704_s1 + $0x8] sm:$0xff] }
  0x17   :  { %17761 = vmatpush1.bf16.msra.mxu0 %v17760_v32  ;;  %320 = vmatprep.mubr.f32.mxu0 %v21735_v9  ;;  %v19536_v7 = vsub.f32 %v31_v3, %v747_v15  ;;  %v17766_v8 = vpack.c.bf16 %v19407_v24, %v19404_v23  ;;  %v19540_v14 = vpack.c.bf16 %v755_v58, %v751_v54  ;;  %v21799_v23 = vand.u32 4294901760, %v19464_v59 }
  0x18   :  { %17763 = vmatprep.subr.bf16.mxu0 %v17762_v38  ;;  %v19542_v46 = vpack.c.bf16 %v761_v61, %v757_v60  ;;  %v17768_v63 = vpack.c.bf16 %v19424_v35, %v19422_v34  ;;  %v19549_v10 = vsub.f32 %v34_v12, %v749_v52  ;;  %v19551_v11 = vsub.f32 %v36_v13, %v753_v53  ;;  %v715_v12 = vld [vmem:[%s21704_s1 + $0x10] sm:$0xff] }
  0x19   :  { %17835 = vmatprep.subr.bf16.mxu1 %v19533_v5  ;;  %v19555_v3 = vsub.f32 %v33_v25, %v751_v54  ;;  %v19557_v15 = vsub.f32 %v35_v26, %v755_v58  ;;  %v19560_v32 = vpack.c.bf16 %v763_v57, %v759_v0  ;;  %v19562_v38 = vand.u32 4294901760, %v730_v6  ;;  %v716_v58 = vld [vmem:[%s21704_s1 + $0x18] sm:$0xff] }
  0x1a   :  { %322 = vmatmul.mubr.f32.vlgmr.msra.gmra.mrb[0].mxu0 %v19411_v28  ;;  %17837 = vmatpush1.bf16.msra.mxu1 %v19540_v14  ;;  %v733_v13 = vsel %vm728_vm1, %v714_v62, 0  ;;  %v21716_v25 = vand.u32 4294901760, %v19518_v48  ;;  %v21710_v26 = vand.u32 4294901760, %v19529_v1  ;;  %v21712_v51 = vand.u32 4294901760, %v19531_v2 }
  0x1b   :  { %17765 = vmatpush1.bf16.msra.mxu0 %v17764_v47  ;;  %327 = vmatprep.mubr.f32.mxu0 %v21735_v9  ;;  %v19572_v52 = vsub.f32 %v38_v27, %v757_v60  ;;  %v19576_v53 = vsub.f32 %v730_v6, %v19562_v38  ;;  %v19578_v54 = vand.u32 4294901760, %v733_v13  ;;  %v21711_v47 = vand.u32 4294901760, %v19536_v7 }
  0x1c   :  { %17767 = vmatprep.subr.bf16.mxu0 %v17766_v8  ;;  %17839 = vmatprep.subr.bf16.mxu1 %v19542_v46  ;;  %v19584_v62 = vsub.f32 %v40_v40, %v761_v61  ;;  %v17842_v27 = vpack.c.bf16 %v21710_v26, %v21716_v25  ;;  %v736_v60 = vsel %vm728_vm1, %v715_v12, 0  ;;  %v21715_v6 = vand.u32 4294901760, %v19549_v10 }
  0x1d   :  { %v19593_v8 = vsub.f32 %v37_v41, %v759_v0  ;;  %v21713_v4 = vand.u32 4294901760, %v19576_v53  ;;  %v19598_v40 = vsub.f32 %v733_v13, %v19578_v54  ;;  %v19600_v61 = vand.u32 4294901760, %v736_v60 }
  0x1e   :  { %329 = vmatmul.mubr.f32.gmra.mrb[2].mxu0 %v19447_v50  ;;  %17841 = vmatpush1.bf16.msra.mxu1 %v19560_v32  ;;  %v19604_v12 = vsub.f32 %v19514_v42, %v763_v57  ;;  %v17844_v41 = vpack.c.bf16 %v21711_v47, %v21712_v51  ;;  %v21714_v0 = vand.u32 4294901760, %v19551_v11  ;;  %v739_v26 = vsel %vm728_vm1, %v716_v58, 0 }
  0x1f   :  { %17769 = vmatpush1.bf16.msra.mxu0 %v17768_v63  ;;  %415 = vmatprep.mubr.f32.mxu0 %v21735_v9  ;;  %v831_v13 = vand.u32 4294901760, %v19598_v40  ;;  %v19615_v63 = vsub.f32 %v736_v60, %v19600_v61  ;;  %v894_v42 = vand.u32 4294901760, %v19555_v3  ;;  %v906_v57 = vand.u32 4294901760, %v19557_v15 }
  0x20   :  { %17771 = vmatprep.subr.bf16.mxu0 %v19390_v16  ;;  %17843 = vmatprep.subr.bf16.mxu1 %v17842_v27  ;;  %v17846_v58 = vpack.c.bf16 %v21714_v0, %v21715_v6  ;;  %v19625_v47 = vand.u32 4294901760, %v739_v26  ;;  %v912_v51 = vand.u32 4294901760, %v19572_v52  ;;  %v924_v27 = vand.u32 4294901760, %v19584_v62 }
  0x21   :  { %1216 = vmatmul.mubr.f32.vlgmr.msra.gmra.mrb[0].mxu1 %v21713_v4  ;;  %v17778_v60 = vpack.c.bf16 %v230_v30, %v218_v29  ;;  %v17848_v4 = vpack.c.bf16 %v906_v57, %v894_v42  ;;  %v918_v0 = vand.u32 4294901760, %v19593_v8  ;;  %v930_v6 = vand.u32 4294901760, %v19604_v12 }
  0x22   :  { %418 = vmatmul.mubr.f32.vlgmr.msra.gmra.mrb[0].mxu0 %v19428_v37  ;;  %1221 = vmatprep.mubr.f32.mxu1 %v21735_v9  ;;  %v842_v25 = vand.u32 4294901760, %v19615_v63  ;;  %v19648_v17 = vsub.f32 %v739_v26, %v19625_v47  ;;  %v17850_v18 = vpack.c.bf16 %v924_v27, %v912_v51  ;;  %v17780_v29 = vpack.c.bf16 %v236_v36, %v224_v31 }
  0x23   :  { %17773 = vmatpush1.bf16.msra.mxu0 %v19398_v20  ;;  %423 = vmatprep.mubr.f32.mxu0 %v21735_v9  ;;  %v17782_v30 = vpack.c.bf16 %v254_v44, %v242_v43  ;;  %v17852_v26 = vpack.c.bf16 %v930_v6, %v918_v0  ;;  %v17784_v21 = vpack.c.bf16 %v260_v56, %v248_v55  ;;  %v21802_v31 = vand.u32 4294901760, %v19531_v2 }
  0x24   :  { %17775 = vmatprep.subr.bf16.mxu0 %v19402_v22  ;;  %17845 = vmatpush1.bf16.msra.mxu1 %v17844_v41  ;;  %v853_v19 = vand.u32 4294901760, %v19648_v17  ;;  %v21803_v34 = vand.u32 4294901760, %v19536_v7  ;;  %v21805_v44 = vand.u32 4294901760, %v19551_v11  ;;  %v21806_v55 = vand.u32 4294901760, %v19576_v53 }
  0x25   :  { %1225 = vmatmul.mubr.f32.gmra.mrb[2].mxu1 %v831_v13  ;;  %17847 = vmatprep.subr.bf16.mxu1 %v17846_v58  ;;  %v913_v58 = vsub.f32 %v19572_v52, %v912_v51  ;;  %v919_v51 = vsub.f32 %v19593_v8, %v918_v0  ;;  %vm19326_vm2 = vmmov 0   ;;  %vm2257_vm3 = vcmask 523264  }
  0x26   :  { %426 = vmatmul.mubr.f32.gmra.mrb[2].mxu0 %v19464_v59  ;;  %1230 = vmatprep.mubr.f32.mxu1 %v21735_v9  ;;  %v883_v35 = vsub.f32 %v19536_v7, %v21803_v34  ;;  %v821_v56 = vsub.f32 %v19576_v53, %v21806_v55  ;;  %vm2726_vm4 = vcmask 130048  }
  0x27   :  { %17777 = vmatpush1.bf16.msra.mxu0 %v19420_v33  ;;  %504 = vmatprep.mubr.f32.mxu0 %v21735_v9 }
  0x28   :  { %17779 = vmatprep.subr.bf16.mxu0 %v17778_v60  ;;  %17849 = vmatpush1.bf16.msra.mxu1 %v17848_v4  ;;  %v884_v4 = vand.u32 4294901760, %v883_v35  ;;  %v822_v60 = vand.u32 4294901760, %v821_v56 }
  0x29   :  { %1234 = vmatmul.mubr.f32.gmra.mrb[4].mxu1 %v842_v25  ;;  %17851 = vmatprep.subr.bf16.mxu1 %v17850_v18 }
  0x2a   :  { %508 = vmatmul.mubr.f32.vlgmr.msra.gmra.mrb[0].mxu0 %v196_v45  ;;  %1239 = vmatprep.mubr.f32.mxu1 %v21735_v9  ;;  %v901_v45 = vsub.f32 %v19551_v11, %v21805_v44 }
  0x2b   :  { %17781 = vmatpush1.bf16.msra.mxu0 %v17780_v29  ;;  %513 = vmatprep.mubr.f32.mxu0 %v21735_v9 }
  0x2c   :  { %17783 = vmatprep.subr.bf16.mxu0 %v17782_v30  ;;  %17853 = vmatpush1.bf16.msra.mxu1 %v17852_v26  ;;  %v902_v41 = vand.u32 4294901760, %v901_v45  ;;  %v914_v30 = vand.u32 4294901760, %v913_v58 }
  0x2d   :  { %1243 = vmatmul.mubr.f32.gmra.mrb[6].mxu1 %v853_v19  ;;  %17855 = vmatprep.subr.bf16.mxu1 %v19503_v39 }
  0x2e   :  { %517 = vmatmul.mubr.f32.gmra.mrb[2].mxu0 %v21799_v23  ;;  %1349 = vmatprep.mubr.f32.mxu1 %v21735_v9 }
  0x2f   :  { %17785 = vmatpush1.bf16.msra.mxu0 %v17784_v21  ;;  %611 = vmatprep.mubr.f32.mxu0 %v21735_v9  ;;  %v920_v21 = vand.u32 4294901760, %v919_v51 }
  0x30   :  { %17787 = vmatprep.subr.bf16.mxu0 %v19390_v16  ;;  %v21800_v16 = vand.u32 4294901760, %v19518_v48 }
  0x31   :  { %1351 = vmatmul.mubr.f32.vlgmr.msra.gmra.mrb[0].mxu1 %v19562_v38 }
  0x32   :  { %613 = vmatmul.mubr.f32.vlgmr.msra.gmra.mrb[0].mxu0 %v19411_v28  ;;  %1356 = vmatprep.mubr.f32.mxu1 %v21735_v9 }
  0x33   :  { %17789 = vmatpush1.bf16.msra.mxu0 %v19398_v20  ;;  %618 = vmatprep.mubr.f32.mxu0 %v21735_v9  ;;  %v865_v20 = vsub.f32 %v19518_v48, %v21800_v16 }
  0x34   :  { %17791 = vmatprep.subr.bf16.mxu0 %v19402_v22  ;;  %17857 = vmatpush1.bf16.msra.mxu1 %v19520_v49  ;;  %v21801_v22 = vand.u32 4294901760, %v19529_v1 }
  0x35   :  { %1358 = vmatmul.mubr.f32.gmra.mrb[2].mxu1 %v19578_v54  ;;  %17859 = vmatprep.subr.bf16.mxu1 %v19533_v5  ;;  %v866_v36 = vand.u32 4294901760, %v865_v20  ;;  %v854_v20 = vsub.f32 %v19648_v17, %v853_v19  ;;  %v17820_v19 = vpack.c.bf16 %v19536_v7, %v19531_v2  ;;  %v21740_v7 = vmov 0.0|0.0  }
  0x36   :  { %620 = vmatmul.mubr.f32.gmra.mrb[2].mxu0 %v19447_v50  ;;  %1363 = vmatprep.mubr.f32.mxu1 %v21735_v9  ;;  %v877_v24 = vsub.f32 %v19529_v1, %v21801_v22  ;;  %v17818_v22 = vpack.c.bf16 %v19529_v1, %v19518_v48  ;;  %v17824_v48 = vpack.c.bf16 %v19557_v15, %v19555_v3 }
  0x37   :  { %17793 = vmatpush1.bf16.msra.mxu0 %v19420_v33  ;;  %698 = vmatprep.mubr.f32.mxu0 %v21735_v9  ;;  %v871_v33 = vsub.f32 %v19531_v2, %v21802_v31  ;;  %v17822_v31 = vpack.c.bf16 %v19551_v11, %v19549_v10  ;;  %v17826_v1 = vpack.c.bf16 %v19584_v62, %v19572_v52 }
  0x38   :  { %17795 = vmatprep.subr.bf16.mxu0 %v19503_v39  ;;  %17861 = vmatpush1.bf16.msra.mxu1 %v19540_v14  ;;  %v878_v37 = vand.u32 4294901760, %v877_v24  ;;  %v855_v24 = vand.u32 4294901760, %v854_v20  ;;  %v17828_v2 = vpack.c.bf16 %v19604_v12, %v19593_v8 }
  0x39   :  { %1365 = vmatmul.mubr.f32.gmra.mrb[4].mxu1 %v19600_v61  ;;  %17863 = vmatprep.subr.bf16.mxu1 %v19542_v46  ;;  %v872_v59 = vand.u32 4294901760, %v871_v33 }
  0x3a   :  { %700 = vmatmul.mubr.f32.vlgmr.msra.gmra.mrb[0].mxu0 %v19411_v28  ;;  %1370 = vmatprep.mubr.f32.mxu1 %v21735_v9  ;;  %v21804_v28 = vand.u32 4294901760, %v19549_v10  ;;  %v17806_v39 = vpack.c.bf16 %v878_v37, %v866_v36 }
  0x3b   :  { %17797 = vmatpush1.bf16.msra.mxu0 %v19520_v49  ;;  %705 = vmatprep.mubr.f32.mxu0 %v21735_v9  ;;  %v895_v49 = vsub.f32 %v19555_v3, %v894_v42  ;;  %v832_v42 = vsub.f32 %v19598_v40, %v831_v13 }
  0x3c   :  { %17799 = vmatprep.subr.bf16.mxu0 %v19533_v5  ;;  %17865 = vmatpush1.bf16.msra.mxu1 %v19560_v32  ;;  %v889_v43 = vsub.f32 %v19549_v10, %v21804_v28  ;;  %v907_v5 = vsub.f32 %v19557_v15, %v906_v57  ;;  %v104_v10 = vlaneseq  ;;  %v15241_v15 = vld [vmem:[%s21706_s3 + $0x100] ss:$8 sm:$0x3]  ;;  %v15242_v28 = vld [vmem:[%s21706_s3 + $0x101] ss:$8 sm:$0x3] }
  0x3d   :  { %1372 = vmatmul.mubr.f32.gmra.mrb[6].mxu1 %v19625_v47  ;;  %v896_v57 = vand.u32 4294901760, %v895_v49  ;;  %v833_v13 = vand.u32 4294901760, %v832_v42  ;;  %17938 = vmatprep.subr.bf16.mxu1 %v21740_v7  ;;  %v42_v42 = vld [vmem:[%s21706_s3 + $0xa8] sm:$0xff] }
  0x3e   :  { %707 = vmatmul.mubr.f32.gmra.mrb[2].mxu0 %v19447_v50  ;;  %1454 = vmatprep.mubr.f32.mxu1 %v21735_v9  ;;  %v890_v50 = vand.u32 4294901760, %v889_v43  ;;  %v908_v18 = vand.u32 4294901760, %v907_v5  ;;  %v105_v11 = vshrl.u32 %v104_v10, 7 }
  0x3f   :  { %17801 = vmatpush1.bf16.msra.mxu0 %v19540_v14  ;;  %817 = vmatprep.mubr.f32.mxu0 %v21735_v9  ;;  %v925_v14 = vsub.f32 %v19584_v62, %v924_v27  ;;  %v931_v27 = vsub.f32 %v19604_v12, %v930_v6 }
  0x40   :  { %17803 = vmatprep.subr.bf16.mxu0 %v19542_v46  ;;  %v17808_v46 = vpack.c.bf16 %v884_v4, %v872_v59  ;;  %v17810_v29 = vpack.c.bf16 %v902_v41, %v890_v50  ;;  %v17812_v0 = vpack.c.bf16 %v908_v18, %v896_v57  ;;  %v19809_v3 = vsub.s32 0, %v105_v11  ;;  %v41_v57 = vld [vmem:[%s21706_s3 + $0xa0] sm:$0xff] }
  0x41   :  { %1456 = vmatmul.mubr.f32.vlgmr.msra.gmra.mrb[0].mxu1 %v19562_v38  ;;  %v926_v26 = vand.u32 4294901760, %v925_v14  ;;  %v932_v6 = vand.u32 4294901760, %v931_v27  ;;  %v19814_v52 = vsub.s32 1, %v105_v11  ;;  %v1510_v27 = vand.u32 4294901760, %v42_v42 }
  0x42   :  { %1461 = vmatprep.mubr.f32.mxu1 %v21735_v9  ;;  %v721_v44 = vrot.slane %v15242_v28, %v19809_v3 }
  0x43   :  { %17805 = vmatpush1.bf16.msra.mxu0 %v19560_v32  ;;  %v843_v32 = vsub.f32 %v19615_v63, %v842_v25  ;;  %v17814_v23 = vpack.c.bf16 %v926_v26, %v914_v30  ;;  %v17816_v25 = vpack.c.bf16 %v932_v6, %v920_v21  ;;  %v725_v45 = vrot.slane %v15242_v28, %v19814_v52 }
  0x44   :  { %17807 = vmatprep.subr.bf16.mxu0 %v17806_v39  ;;  %v1512_v6 = vand.u32 4294901760, %v41_v57 }
  0x45   :  { %1463 = vmatmul.mubr.f32.gmra.mrb[2].mxu1 %v19578_v54  ;;  %v844_v16 = vand.u32 4294901760, %v843_v32 }
  0x46   :  { %823 = vmatmul.mubr.f32.vlgmr.msra.gmra.mrb[4].mxu0 %v822_v60  ;;  %1468 = vmatprep.mubr.f32.mxu1 %v21735_v9 }
  0x47   :  { %828 = vmatprep.mubr.f32.mxu0 %v21735_v9  ;;  %17809 = vmatpush1.bf16.msra.mxu0 %v17808_v46  ;;  %v44_v46 = vld [vmem:[%s21706_s3 + $0xb8] sm:$0xff] }
  0x48   :  { %17811 = vmatprep.subr.bf16.mxu0 %v17810_v29  ;;  %v43_v29 = vld [vmem:[%s21706_s3 + $0xb0] sm:$0xff] }
  0x49   :  { %1470 = vmatmul.mubr.f32.gmra.mrb[4].mxu1 %v19600_v61 }
  0x4a   :  { %834 = vmatmul.mubr.f32.gmra.mrb[6].mxu0 %v833_v13  ;;  %1475 = vmatprep.mubr.f32.mxu1 %v21735_v9  ;;  %v1514_v13 = vand.u32 4294901760, %v44_v46 }
  0x4b   :  { %839 = vmatprep.mubr.f32.mxu0 %v21735_v9  ;;  %17813 = vmatpush1.bf16.msra.mxu0 %v17812_v0 }
  0x4c   :  { %17815 = vmatprep.subr.bf16.mxu0 %v17814_v23 }
  0x4d   :  { %1477 = vmatmul.mubr.f32.gmra.mrb[6].mxu1 %v19625_v47 }
  0x4e   :  { %845 = vmatmul.mubr.f32.gmra.mrb[8].mxu0 %v844_v16  ;;  %16034 = vmatprep.mubr.msk.f32.mxu1 %vm19326_vm2, %v21735_v9 }
  0x4f   :  { %850 = vmatprep.mubr.f32.mxu0 %v21735_v9  ;;  %17817 = vmatpush1.bf16.msra.mxu0 %v17816_v25  ;;  %v19863_v25 = vpack.c.bf16 %v1514_v13, %v1510_v27 }
  0x50   :  { %17819 = vmatprep.subr.bf16.mxu0 %v17818_v22  ;;  %v1516_v22 = vand.u32 4294901760, %v43_v29 }
  0x52   :  { %856 = vmatmul.mubr.f32.gmra.mrb[10].mxu0 %v855_v24 }
  0x53   :  { %986 = vmatprep.mubr.f32.mxu0 %v21735_v9 }
  0x56   :  { %988 = vmatmul.mubr.f32.vlgmr.msra.gmra.mrb[4].mxu0 %v19562_v38 }
  0x57   :  { %993 = vmatprep.mubr.f32.mxu0 %v21735_v9  ;;  %17821 = vmatpush1.bf16.msra.mxu0 %v17820_v19 }
  0x58   :  { %17823 = vmatprep.subr.bf16.mxu0 %v17822_v31 }
  0x5a   :  { %995 = vmatmul.mubr.f32.gmra.mrb[6].mxu0 %v19578_v54  ;;  %v107_v54 = vrot.slane %v15241_v15, %v19809_v3 }
  0x5b   :  { %1000 = vmatprep.mubr.f32.mxu0 %v21735_v9  ;;  %17825 = vmatpush1.bf16.msra.mxu0 %v17824_v48 }
  0x5c   :  { %17827 = vmatprep.subr.bf16.mxu0 %v17826_v1 }
  0x5e   :  { %1002 = vmatmul.mubr.f32.gmra.mrb[8].mxu0 %v19600_v61 }
  0x5f   :  { %1007 = vmatprep.mubr.f32.mxu0 %v21735_v9  ;;  %17829 = vmatpush1.bf16.msra.mxu0 %v17828_v2 }
  0x60   :  { %17867 = vmatprep.subr.bf16.mxu0 %v19863_v25 }
  0x62   :  { %1009 = vmatmul.mubr.f32.gmra.mrb[10].mxu0 %v19625_v47  ;;  %v19820_v47 = vrot.slane %v15241_v15, %v19814_v52 }
  0x63   :  { %1103 = vmatprep.mubr.f32.mxu0 %v21735_v9 }
  0x66   :  { %1106 = vmatmul.mubr.f32.vlgmr.msra.gmra.mrb[4].mxu0 %v19576_v53 }
  0x67   :  { %1111 = vmatprep.mubr.f32.mxu0 %v21735_v9 }
  0x6a   :  { %1114 = vmatmul.mubr.f32.gmra.mrb[6].mxu0 %v19598_v40 }
  0x6b   :  { %1119 = vmatprep.mubr.f32.mxu0 %v21735_v9 }
  0x6e   :  { %1122 = vmatmul.mubr.f32.gmra.mrb[8].mxu0 %v19615_v63 }
  0x6f   :  { %1127 = vmatprep.mubr.f32.mxu0 %v21735_v9 }
  0x72   :  { %1130 = vmatmul.mubr.f32.gmra.mrb[10].mxu0 %v19648_v17 }
  0x73   :  { %1586 = vmatprep.mubr.f32.mxu0 %v21735_v9 }
 0x10d   :  { %v701_v38 = vpop.f32.mrb[0].mxu0 }
 0x10e   :  { %v19816_v53 = vpop.f32.mrb[1].mxu0  ;;  %v19830_v43 = vadd.f32 %v701_v38, %v107_v54 }
 0x110   :  { %v2259_v55 = vsel %vm2257_vm3, %v19830_v43, 0 }
 0x111   :  { %v708_v62 = vpop.f32.mrb[2].mxu0  ;;  %v19836_v49 = vand.u32 4294901760, %v2259_v55 }
 0x112   :  { %v19822_v8 = vadd.f32 %v708_v62, %v107_v54  ;;  %v710_v40 = vpop.f32.mrb[3].mxu0  ;;  %v19876_v62 = vpack.c.bf16 %v1516_v22, %v1512_v6 }
 0x113   :  { %v19825_v61 = vadd.f32 %v710_v40, %v19820_v47  ;;  %v19855_v30 = vsub.f32 %v2259_v55, %v19836_v49 }
 0x114   :  { %v1457_v12 = vpop.f32.mrb[0].mxu1  ;;  %17869 = vmatpush1.bf16.msra.mxu0 %v19876_v62 }
 0x115   :  { %v1459_v63 = vpop.f32.mrb[1].mxu1  ;;  %v2336_v48 = vand.u32 4294901760, %v19855_v30 }
 0x118   :  { %v1464_v17 = vpop.f32.mrb[2].mxu1 }
 0x119   :  { %v1466_v33 = vpop.f32.mrb[3].mxu1 }
 0x11c   :  { %v1471_v34 = vpop.f32.mrb[4].mxu1 }
 0x11d   :  { %v1473_v35 = vpop.f32.mrb[5].mxu1 }
 0x120   :  { %v1478_v36 = vpop.f32.mrb[6].mxu1 }
 0x121   :  { %v1480_v37 = vpop.f32.mrb[7].mxu1 }
 0x139   :  { %v1107_v56 = vpop.f32.mrb[4].mxu0 }
 0x13a   :  { %v18878_v59 = vadd.f32 %v1107_v56, %v721_v44  ;;  %v1109_v4 = vpop.f32.mrb[5].mxu0 }
 0x13b   :  { %v18880_v39 = vadd.f32 %v1109_v4, %v725_v45  ;;  %v50_v4 = vld [vmem:[%s21706_s3 + $0xe8] sm:$0xff] }
 0x13c   :  { %v18879_v5 = vadd.f32 %v18878_v59, %v1457_v12  ;;  %v47_v59 = vld [vmem:[%s21706_s3 + $0xd0] sm:$0xff] }
 0x13d   :  { %v19838_v50 = vadd.f32 %v18880_v39, %v1459_v63  ;;  %v1115_v41 = vpop.f32.mrb[6].mxu0 }
 0x13e   :  { %v18882_v58 = vadd.f32 %v1115_v41, %v721_v44  ;;  %3743 = vrot.lane.b32.xlu1 %v18879_v5, %s19327_s23  ;;  %v2262_v14 = vsel %vm2257_vm3, %v18879_v5, 0  ;;  %v1117_v60 = vpop.f32.mrb[7].mxu0  ;;  %v19910_v5 = vsub.f32 %v42_v42, %v1510_v27  ;;  %v49_v42 = vld [vmem:[%s21706_s3 + $0xe0] sm:$0xff] }
 0x13f   :  { %v2268_v18 = vand.u32 4294901760, %v2262_v14  ;;  %v18884_v51 = vadd.f32 %v1117_v60, %v725_v45  ;;  %v1483_v27 = vld [vmem:[%s21705_s2] sm:$0xff] }
 0x140   :  { %v18883_v26 = vadd.f32 %v18882_v58, %v1464_v17  ;;  %v2337_v17 = vsub.f32 %v19855_v30, %v2336_v48 }
 0x141   :  { %v19857_v32 = vsub.f32 %v2262_v14, %v2268_v18  ;;  %v19859_v0 = vadd.f32 %v18884_v51, %v1466_v33  ;;  %v1123_v21 = vpop.f32.mrb[8].mxu0  ;;  %v19912_v14 = vsub.f32 %v44_v46, %v1514_v13  ;;  %v52_v51 = vld [vmem:[%s21706_s3 + $0xf8] sm:$0xff]  ;;  %v51_v46 = vld [vmem:[%s21706_s3 + $0xf0] sm:$0xff] }
 0x142   :  { %v2265_v23 = vsel %vm2257_vm3, %v18883_v26, 0  ;;  %v18886_v16 = vadd.f32 %v1123_v21, %v721_v44  ;;  %3745 = vrot.lane.b32.xlu1 %v18883_v26, %s19327_s23  ;;  %v1125_v20 = vpop.f32.mrb[9].mxu0  ;;  %v2338_v39 = vand.u32 4294901760, %v2337_v17  ;;  %v19917_v26 = vsub.f32 %v41_v57, %v1512_v6  ;;  %v1484_v6 = vld [vmem:[%s21705_s2 + $0x8] sm:$0xff] }
 0x143   :  { %v2271_v24 = vand.u32 4294901760, %v2265_v23  ;;  %v2347_v19 = vand.u32 4294901760, %v19857_v32  ;;  %v18888_v31 = vadd.f32 %v1125_v20, %v725_v45  ;;  %v19919_v21 = vsub.f32 %v43_v29, %v1516_v22 }
 0x144   :  { %v19867_v1 = vadd.f32 %v18886_v16, %v1471_v34  ;;  %v1526_v16 = vand.u32 4294901760, %v50_v4  ;;  %v1502_v17 = vsel %vm728_vm1, %v1484_v6, 0 }
 0x145   :  { %v19870_v2 = vsub.f32 %v2265_v23, %v2271_v24  ;;  %v19872_v10 = vpack.c.bf16 %v2271_v24, %v2268_v18  ;;  %v19874_v11 = vadd.f32 %v18888_v31, %v1473_v35  ;;  %v1131_v15 = vpop.f32.mrb[10].mxu0  ;;  %v2348_v12 = vsub.f32 %v19857_v32, %v2347_v19 }
 0x146   :  { %v18890_v38 = vadd.f32 %v1131_v15, %v721_v44  ;;  %v1133_v54 = vpop.f32.mrb[11].mxu0  ;;  %v46_v44 = vld [vmem:[%s21706_s3 + $0xc8] sm:$0xff]  ;;  %v1524_v23 = vand.u32 4294901760, %v47_v59  ;;  %v19949_v31 = vsub.f32 %v50_v4, %v1526_v16  ;;  %v1528_v15 = vand.u32 4294901760, %v49_v42 }
 0x147   :  { %v2354_v40 = vand.u32 4294901760, %v19870_v2  ;;  %v18892_v63 = vadd.f32 %v1133_v54, %v725_v45  ;;  %17940 = vmatpush3.bf16.xpose.msra.mxu1 %v19872_v10  ;;  %v17945_v28 = vpack.c.bf16 %v19870_v2, %v19857_v32  ;;  %v2349_v55 = vand.u32 4294901760, %v2348_v12 }
 0x148   :  { %v19884_v33 = vadd.f32 %v18890_v38, %v1478_v36  ;;  %17941 = vmatprep.subr.bf16.mxu1 %v21740_v7  ;;  %v48_v36 = vld [vmem:[%s21706_s3 + $0xd8] sm:$0xff]  ;;  %v1518_v41 = vand.u32 4294901760, %v46_v44  ;;  %v19946_v24 = vsub.f32 %v47_v59, %v1524_v23  ;;  %v1532_v38 = vand.u32 4294901760, %v51_v46 }
 0x149   :  { %v19888_v34 = vadd.f32 %v18892_v63, %v1480_v37  ;;  %v2355_v35 = vsub.f32 %v19870_v2, %v2354_v40  ;;  %v19896_v45 = vpack.c.bf16 %v2354_v40, %v2347_v19  ;;  %v45_v37 = vld [vmem:[%s21706_s3 + $0xc0] sm:$0xff]  ;;  %v1522_v60 = vand.u32 4294901760, %v48_v36 }
 0x14a   :  { %v1520_v18 = vand.u32 4294901760, %v45_v37  ;;  %v19934_v29 = vsub.f32 %v46_v44, %v1518_v41  ;;  %v1530_v19 = vand.u32 4294901760, %v52_v51  ;;  %v1499_v54 = vsel %vm728_vm1, %v1483_v27, 0 }
 0x14b   :  { %v2356_v56 = vand.u32 4294901760, %v2355_v35  ;;  %v19932_v57 = vpack.c.bf16 %v1522_v60, %v1518_v41  ;;  %v19936_v13 = vsub.f32 %v48_v36, %v1522_v60  ;;  %v19957_v63 = vand.u32 4294901760, %v1499_v54  ;;  %v1485_v35 = vld [vmem:[%s21705_s2 + $0x10] sm:$0xff] }
 0x14c   :  { %v19942_v20 = vpack.c.bf16 %v1524_v23, %v1520_v18  ;;  %v19944_v22 = vsub.f32 %v45_v37, %v1520_v18  ;;  %v19953_v40 = vpack.c.bf16 %v1530_v19, %v1526_v16  ;;  %v19955_v12 = vsub.f32 %v52_v51, %v1530_v19 }
 0x14d   :  { %v17942_v58 = vpack.c.bf16 %v2356_v56, %v2349_v55  ;;  %17871 = vmatprep.subr.bf16.mxu0 %v19932_v57  ;;  %v19963_v44 = vpack.c.bf16 %v1532_v38, %v1528_v15  ;;  %v19965_v36 = vsub.f32 %v49_v42, %v1528_v15  ;;  %v19967_v37 = vsub.f32 %v51_v46, %v1532_v38 }
 0x14e   :  { %16035 = vmatmul.mubr.f32.vlgmr.msra.gmra.mrb[8].mxu1 %v2338_v39  ;;  %17873 = vmatpush1.bf16.msra.mxu0 %v19942_v20  ;;  %v19969_v55 = vand.u32 4294901760, %v1502_v17  ;;  %v19973_v56 = vsub.f32 %v1499_v54, %v19957_v63  ;;  %v21728_v59 = vand.u32 4294901760, %v19910_v5  ;;  %v21721_v4 = vand.u32 4294901760, %v19912_v14 }
 0x14f   :  { %17943 = vmatpush3.bf16.xpose.msra.mxu1 %v17942_v58  ;;  %16041 = vmatprep.mubr.msk.f32.mxu1 %vm19326_vm2, %v21735_v9  ;;  %v21719_v39 = vand.u32 4294901760, %v19917_v26  ;;  %v21718_v58 = vand.u32 4294901760, %v19919_v21  ;;  %v1505_v60 = vsel %vm728_vm1, %v1485_v35, 0  ;;  %v21717_v18 = vand.u32 4294901760, %v19934_v29 }
 0x150   :  { %17944 = vmatprep.subr.bf16.mxu1 %v21740_v7  ;;  %17875 = vmatprep.subr.bf16.mxu0 %v19953_v40  ;;  %v19979_v41 = vsub.f32 %v1502_v17, %v19969_v55  ;;  %v21720_v51 = vand.u32 4294901760, %v19973_v56  ;;  %v1634_v23 = vsub.f32 %v19910_v5, %v21728_v59  ;;  %v1646_v16 = vsub.f32 %v19912_v14, %v21721_v4 }
 0x151   :  { %v1640_v42 = vsub.f32 %v19917_v26, %v21719_v39  ;;  %v1652_v27 = vsub.f32 %v19919_v21, %v21718_v58  ;;  %v20005_v6 = vand.u32 4294901760, %v1505_v60  ;;  %v1658_v19 = vsub.f32 %v19934_v29, %v21717_v18  ;;  %v1486_v18 = vld [vmem:[%s21705_s2 + $0x18] sm:$0xff] }
 0x152   :  { %17877 = vmatpush1.bf16.msra.mxu0 %v19963_v44  ;;  %v21723_v46 = vand.u32 4294901760, %v19979_v41  ;;  %v1590_v32 = vsub.f32 %v19973_v56, %v21720_v51  ;;  %v1635_v2 = vand.u32 4294901760, %v1634_v23  ;;  %v21727_v51 = vand.u32 4294901760, %v19936_v13 }
 0x153   :  { %v1641_v15 = vand.u32 4294901760, %v1640_v42  ;;  %v1653_v54 = vand.u32 4294901760, %v1652_v27  ;;  %v20018_v17 = vsub.f32 %v1505_v60, %v20005_v6  ;;  %v1659_v35 = vand.u32 4294901760, %v1658_v19 }
 0x154   :  { %v1601_v38 = vsub.f32 %v19979_v41, %v21723_v46  ;;  %v1591_v58 = vand.u32 4294901760, %v1590_v32  ;;  %v21726_v23 = vand.u32 4294901760, %v19944_v22  ;;  %v21724_v27 = vand.u32 4294901760, %v19946_v24 }
 0x155   :  { %v17880_v42 = vpack.c.bf16 %v1653_v54, %v1641_v15  ;;  %v21722_v4 = vand.u32 4294901760, %v20018_v17  ;;  %v1670_v60 = vsub.f32 %v19936_v13, %v21727_v51  ;;  %v1508_v32 = vsel %vm728_vm1, %v1486_v18, 0 }
 0x156   :  { %16042 = vmatmul.mubr.f32.vlgmr.msra.gmra.mrb[8].mxu1 %v19836_v49  ;;  %1592 = vmatmul.mubr.f32.vlgmr.msra.gmra.mrb[12].mxu0 %v1591_v58  ;;  %v1664_v19 = vsub.f32 %v19944_v22, %v21726_v23  ;;  %v1693_v15 = vand.u32 4294901760, %v19955_v12  ;;  %v1699_v51 = vand.u32 4294901760, %v19967_v37 }
 0x157   :  { %17946 = vmatpush3.bf16.xpose.msra.mxu1 %v17945_v28  ;;  %16048 = vmatprep.mubr.msk.f32.mxu1 %vm19326_vm2, %v21735_v9  ;;  %v1647_v28 = vand.u32 4294901760, %v1646_v16  ;;  %v1602_v16 = vand.u32 4294901760, %v1601_v38  ;;  %v1612_v58 = vsub.f32 %v20018_v17, %v21722_v4  ;;  %v1671_v18 = vand.u32 4294901760, %v1670_v60 }
 0x158   :  { %17947 = vmatprep.subr.bf16.mxu1 %v21740_v7  ;;  %1597 = vmatprep.mubr.f32.mxu0 %v21735_v9  ;;  %v1665_v38 = vand.u32 4294901760, %v1664_v19  ;;  %v1694_v60 = vsub.f32 %v19955_v12, %v1693_v15 }
 0x159   :  { %v17878_v39 = vpack.c.bf16 %v1647_v28, %v1635_v2  ;;  %v21725_v2 = vand.u32 4294901760, %v19949_v31  ;;  %v20042_v28 = vand.u32 4294901760, %v1508_v32  ;;  %v1613_v4 = vand.u32 4294901760, %v1612_v58 }
 0x15a   :  { %1603 = vmatmul.mubr.f32.gmra.mrb[14].mxu0 %v1602_v16  ;;  %v17882_v19 = vpack.c.bf16 %v1671_v18, %v1659_v35  ;;  %v1700_v16 = vsub.f32 %v19967_v37, %v1699_v51 }
 0x15b   :  { %17879 = vmatprep.subr.bf16.mxu0 %v17878_v39  ;;  %v1676_v39 = vsub.f32 %v19946_v24, %v21724_v27  ;;  %v1682_v54 = vsub.f32 %v19949_v31, %v21725_v2  ;;  %v20054_v27 = vsub.f32 %v1508_v32, %v20042_v28  ;;  %1608 = vmatprep.mubr.f32.mxu0 %v21735_v9 }
 0x15c   :  { %17881 = vmatpush1.bf16.msra.mxu0 %v17880_v42  ;;  %v1687_v42 = vand.u32 4294901760, %v19965_v36 }
 0x15d   :  { %v1677_v46 = vand.u32 4294901760, %v1676_v39  ;;  %v1683_v2 = vand.u32 4294901760, %v1682_v54  ;;  %v1622_v32 = vand.u32 4294901760, %v20054_v27  ;;  %v1695_v39 = vand.u32 4294901760, %v1694_v60  ;;  %17883 = vmatprep.subr.bf16.mxu0 %v17882_v19 }
 0x15e   :  { %16049 = vmatmul.mubr.f32.vlgmr.msra.gmra.mrb[8].mxu1 %v19855_v30  ;;  %v1688_v23 = vsub.f32 %v19965_v36, %v1687_v42  ;;  %1614 = vmatmul.mubr.f32.gmra.mrb[16].mxu0 %v1613_v4  ;;  %v1701_v54 = vand.u32 4294901760, %v1700_v16  ;;  %v17892_v4 = vpack.c.bf16 %v19919_v21, %v19917_v26  ;;  %v17894_v30 = vpack.c.bf16 %v19936_v13, %v19934_v29 }
 0x15f   :  { %17949 = vmatpush3.bf16.xpose.msra.mxu1 %v19872_v10  ;;  %16055 = vmatprep.mubr.msk.f32.mxu1 %vm19326_vm2, %v21735_v9  ;;  %v17884_v58 = vpack.c.bf16 %v1677_v46, %v1665_v38  ;;  %v1623_v35 = vsub.f32 %v20054_v27, %v1622_v32  ;;  %v17886_v18 = vpack.c.bf16 %v1695_v39, %v1683_v2  ;;  %v21809_v60 = vand.u32 4294901760, %v19917_v26 }
 0x160   :  { %17950 = vmatprep.subr.bf16.mxu1 %v21740_v7  ;;  %v1689_v59 = vand.u32 4294901760, %v1688_v23  ;;  %1619 = vmatprep.mubr.f32.mxu0 %v21735_v9  ;;  %v17890_v38 = vpack.c.bf16 %v19912_v14, %v19910_v5  ;;  %v21810_v19 = vand.u32 4294901760, %v19919_v21  ;;  %v21813_v16 = vand.u32 4294901760, %v19973_v56 }
 0x161   :  { %17885 = vmatpush1.bf16.msra.mxu0 %v17884_v58  ;;  %v1624_v46 = vand.u32 4294901760, %v1623_v35  ;;  %v21814_v35 = vand.u32 4294901760, %v19944_v22  ;;  %v21816_v26 = vand.u32 4294901760, %v19949_v31 }
 0x162   :  { %17887 = vmatprep.subr.bf16.mxu0 %v17886_v18  ;;  %v17888_v23 = vpack.c.bf16 %v1701_v54, %v1689_v59  ;;  %v17900_v59 = vpack.c.bf16 %v19967_v37, %v19965_v36  ;;  %v17916_v58 = vpack.c.bf16 %v21810_v19, %v21809_v60  ;;  %v21815_v18 = vand.u32 4294901760, %v19946_v24 }
 0x163   :  { %1625 = vmatmul.mubr.f32.gmra.mrb[18].mxu0 %v1624_v46  ;;  %v17922_v21 = vpack.c.bf16 %v1693_v15, %v21816_v26 }
 0x164   :  { %1755 = vmatprep.mubr.f32.mxu0 %v21735_v9  ;;  %v17920_v54 = vpack.c.bf16 %v21815_v18, %v21814_v35 }
 0x165   :  { %17889 = vmatpush1.bf16.msra.mxu0 %v17888_v23 }
 0x166   :  { %16056 = vmatmul.mubr.f32.vlgmr.msra.gmra.mrb[8].mxu1 %v2336_v48  ;;  %17891 = vmatprep.subr.bf16.mxu0 %v17890_v38  ;;  %v17896_v48 = vpack.c.bf16 %v19946_v24, %v19944_v22  ;;  %v21818_v22 = vand.u32 4294901760, %v20018_v17 }
 0x167   :  { %17952 = vmatpush3.bf16.xpose.msra.mxu1 %v19896_v45  ;;  %16062 = vmatprep.mubr.msk.f32.mxu1 %vm19326_vm2, %v21735_v9  ;;  %v17898_v45 = vpack.c.bf16 %v19955_v12, %v19949_v31 }
 0x168   :  { %17953 = vmatprep.subr.bf16.mxu1 %v21740_v7  ;;  %1757 = vmatmul.mubr.f32.vlgmr.msra.gmra.mrb[12].mxu0 %v19957_v63 }
 0x169   :  { %1762 = vmatprep.mubr.f32.mxu0 %v21735_v9  ;;  %17893 = vmatpush1.bf16.msra.mxu0 %v17892_v4 }
 0x16a   :  { %17895 = vmatprep.subr.bf16.mxu0 %v17894_v30 }
 0x16c   :  { %1764 = vmatmul.mubr.f32.gmra.mrb[14].mxu0 %v19969_v55 }
 0x16d   :  { %1769 = vmatprep.mubr.f32.mxu0 %v21735_v9  ;;  %17897 = vmatpush1.bf16.msra.mxu0 %v17896_v48 }
 0x16e   :  { %16063 = vmatmul.mubr.f32.vlgmr.msra.gmra.mrb[8].mxu1 %v19836_v49  ;;  %17899 = vmatprep.subr.bf16.mxu0 %v17898_v45 }
 0x16f   :  { %17955 = vmatpush3.bf16.xpose.msra.mxu1 %v19872_v10  ;;  %16069 = vmatprep.mubr.msk.f32.mxu1 %vm19326_vm2, %v21735_v9  ;;  %v21808_v10 = vand.u32 4294901760, %v19912_v14  ;;  %v21812_v14 = vand.u32 4294901760, %v19936_v13  ;;  %v17924_v13 = vpack.c.bf16 %v1699_v51, %v1687_v42 }
 0x170   :  { %17956 = vmatprep.subr.bf16.mxu1 %v21740_v7  ;;  %1771 = vmatmul.mubr.f32.gmra.mrb[16].mxu0 %v20005_v6 }
 0x171   :  { %1776 = vmatprep.mubr.f32.mxu0 %v21735_v9  ;;  %17901 = vmatpush1.bf16.msra.mxu0 %v17900_v59 }
 0x172   :  { %17903 = vmatprep.subr.bf16.mxu0 %v19863_v25 }
 0x174   :  { %1778 = vmatmul.mubr.f32.gmra.mrb[18].mxu0 %v20042_v28 }
 0x175   :  { %1872 = vmatprep.mubr.f32.mxu0 %v21735_v9 }
 0x176   :  { %16070 = vmatmul.mubr.f32.vlgmr.msra.gmra.mrb[8].mxu1 %v19836_v49  ;;  %v21807_v49 = vand.u32 4294901760, %v19910_v5  ;;  %v21811_v5 = vand.u32 4294901760, %v19934_v29  ;;  %v21817_v29 = vand.u32 4294901760, %v19979_v41 }
 0x177   :  { %16076 = vmatprep.mubr.msk.f32.mxu1 %vm19326_vm2, %v21735_v9 }
 0x178   :  { %1875 = vmatmul.mubr.f32.vlgmr.msra.gmra.mrb[12].mxu0 %v19973_v56  ;;  %v17914_v2 = vpack.c.bf16 %v21808_v10, %v21807_v49  ;;  %v17918_v39 = vpack.c.bf16 %v21812_v14, %v21811_v5 }
 0x179   :  { %1880 = vmatprep.mubr.f32.mxu0 %v21735_v9  ;;  %17905 = vmatpush1.bf16.msra.mxu0 %v19876_v62 }
 0x17a   :  { %17907 = vmatprep.subr.bf16.mxu0 %v19932_v57 }
 0x17c   :  { %1883 = vmatmul.mubr.f32.gmra.mrb[14].mxu0 %v19979_v41 }
 0x17d   :  { %1888 = vmatprep.mubr.f32.mxu0 %v21735_v9  ;;  %17909 = vmatpush1.bf16.msra.mxu0 %v19942_v20 }
 0x17e   :  { %17911 = vmatprep.subr.bf16.mxu0 %v19953_v40 }
 0x180   :  { %1891 = vmatmul.mubr.f32.gmra.mrb[16].mxu0 %v20018_v17 }
 0x181   :  { %1896 = vmatprep.mubr.f32.mxu0 %v21735_v9  ;;  %17913 = vmatpush1.bf16.msra.mxu0 %v19963_v44 }
 0x182   :  { %17915 = vmatprep.subr.bf16.mxu0 %v17914_v2 }
 0x184   :  { %1899 = vmatmul.mubr.f32.gmra.mrb[18].mxu0 %v20054_v27 }
 0x185   :  { %1981 = vmatprep.mubr.f32.mxu0 %v21735_v9 }
 0x188   :  { %1985 = vmatmul.mubr.f32.vlgmr.msra.gmra.mrb[12].mxu0 %v21813_v16 }
 0x189   :  { %1990 = vmatprep.mubr.f32.mxu0 %v21735_v9  ;;  %17917 = vmatpush1.bf16.msra.mxu0 %v17916_v58 }
 0x18a   :  { %17919 = vmatprep.subr.bf16.mxu0 %v17918_v39 }
 0x18c   :  { %1994 = vmatmul.mubr.f32.gmra.mrb[14].mxu0 %v21817_v29 }
 0x18d   :  { %1999 = vmatprep.mubr.f32.mxu0 %v21735_v9  ;;  %17921 = vmatpush1.bf16.msra.mxu0 %v17920_v54 }
 0x18e   :  { %17923 = vmatprep.subr.bf16.mxu0 %v17922_v21 }
 0x190   :  { %2003 = vmatmul.mubr.f32.gmra.mrb[16].mxu0 %v21818_v22 }
 0x191   :  { %2008 = vmatprep.mubr.f32.mxu0 %v21735_v9  ;;  %17925 = vmatpush1.bf16.msra.mxu0 %v17924_v13 }
 0x192   :  { %17927 = vmatprep.subr.bf16.mxu0 %v19863_v25 }
 0x194   :  { %2012 = vmatmul.mubr.f32.gmra.mrb[18].mxu0 %v1622_v32 }
 0x195   :  { %2118 = vmatprep.mubr.f32.mxu0 %v21735_v9 }
 0x198   :  { %2120 = vmatmul.mubr.f32.vlgmr.msra.gmra.mrb[12].mxu0 %v19957_v63 }
 0x199   :  { %2125 = vmatprep.mubr.f32.mxu0 %v21735_v9  ;;  %17929 = vmatpush1.bf16.msra.mxu0 %v19876_v62 }
 0x19a   :  { %17931 = vmatprep.subr.bf16.mxu0 %v19932_v57 }
 0x19c   :  { %2127 = vmatmul.mubr.f32.gmra.mrb[14].mxu0 %v19969_v55 }
 0x19d   :  { %2132 = vmatprep.mubr.f32.mxu0 %v21735_v9  ;;  %17933 = vmatpush1.bf16.msra.mxu0 %v19942_v20  ;;  %v15243_v20 = vld [vmem:[%s21706_s3 + $0x102] ss:$8 sm:$0x3] }
 0x19e   :  { %17935 = vmatprep.subr.bf16.mxu0 %v19953_v40  ;;  %v1491_v31 = vrot.slane %v15243_v20, %v19809_v3  ;;  %v1495_v40 = vrot.slane %v15243_v20, %v19814_v52 }
 0x1a0   :  { %2134 = vmatmul.mubr.f32.gmra.mrb[16].mxu0 %v20005_v6 }
 0x1a1   :  { %2139 = vmatprep.mubr.f32.mxu0 %v21735_v9  ;;  %17937 = vmatpush1.bf16.msra.mxu0 %v19963_v44 }
 0x1a2   :  { %17974 = vmatprep.subr.bf16.mxu0 %v21740_v7 }
 0x1a4   :  { %2141 = vmatmul.mubr.f32.gmra.mrb[18].mxu0 %v20042_v28 }
 0x1a5   :  { %2223 = vmatprep.mubr.f32.mxu0 %v21735_v9 }
 0x1a8   :  { %2225 = vmatmul.mubr.f32.vlgmr.msra.gmra.mrb[12].mxu0 %v19957_v63 }
 0x1a9   :  { %2230 = vmatprep.mubr.f32.mxu0 %v21735_v9 }
 0x1ac   :  { %2232 = vmatmul.mubr.f32.gmra.mrb[14].mxu0 %v19969_v55 }
 0x1ad   :  { %2237 = vmatprep.mubr.f32.mxu0 %v21735_v9 }
 0x1b0   :  { %2239 = vmatmul.mubr.f32.gmra.mrb[16].mxu0 %v20005_v6 }
 0x1b1   :  { %2244 = vmatprep.mubr.f32.mxu0 %v21735_v9 }
 0x1b4   :  { %2246 = vmatmul.mubr.f32.gmra.mrb[18].mxu0 %v20042_v28 }
 0x1b5   :  { %16130 = vmatprep.mubr.msk.f32.mxu0 %vm19326_vm2, %v21735_v9 }
 0x249   :  { %v20182_v25 = vpop.f32.mrb[8].mxu1 }
 0x24a   :  { %v16071_v62 = vpop.f32.mrb[9].mxu1  ;;  %v2727_v57 = vsel %vm2726_vm4, %v20182_v25, -inf }
 0x24b   :  { %2728 = vmax.xlane.f32.xlu0 %v2727_v57 }
 0x27b   :  { %v2226_v24 = vpop.f32.mrb[12].mxu0 }
 0x27c   :  { %v2228_v12 = vpop.f32.mrb[13].mxu0  ;;  %v20191_v63 = vadd.f32 %v2226_v24, %v1491_v31 }
 0x27d   :  { %v20193_v44 = vadd.f32 %v2228_v12, %v1495_v40 }
 0x27e   :  { %v2742_v41 = vand.u32 4294901760, %v20191_v63 }
 0x27f   :  { %v2233_v36 = vpop.f32.mrb[14].mxu0  ;;  %v21734_v60 = vand.u32 4294901760, %v20193_v44 }
 0x280   :  { %v20195_v37 = vadd.f32 %v2233_v36, %v1491_v31  ;;  %v2235_v55 = vpop.f32.mrb[15].mxu0  ;;  %v20214_v46 = vsub.f32 %v20191_v63, %v2742_v41 }
 0x281   :  { %v20197_v56 = vadd.f32 %v2235_v55, %v1495_v40  ;;  %v20234_v58 = vsub.f32 %v20193_v44, %v21734_v60 }
 0x282   :  { %v2745_v51 = vand.u32 4294901760, %v20195_v37  ;;  %v2821_v38 = vand.u32 4294901760, %v20214_v46 }
 0x283   :  { %v2240_v6 = vpop.f32.mrb[16].mxu0  ;;  %v21733_v19 = vand.u32 4294901760, %v20197_v56  ;;  %v5796_v16 = vand.u32 4294901760, %v20234_v58 }
 0x284   :  { %v20201_v17 = vpack.c.bf16 %v2745_v51, %v2742_v41  ;;  %v2242_v3 = vpop.f32.mrb[17].mxu0  ;;  %v20203_v52 = vadd.f32 %v2240_v6, %v1491_v31  ;;  %v20217_v23 = vsub.f32 %v20195_v37, %v2745_v51  ;;  %v2822_v30 = vsub.f32 %v20214_v46, %v2821_v38 }
 0x285   :  { %v20205_v27 = vadd.f32 %v2242_v3, %v1495_v40  ;;  %v20239_v5 = vsub.f32 %v20197_v56, %v21733_v19  ;;  %v5797_v29 = vsub.f32 %v20234_v58, %v5796_v16 }
 0x286   :  { %17958 = vmatpush3.bf16.msra.mxu1 %v20201_v17  ;;  %v2828_v4 = vand.u32 4294901760, %v20217_v23  ;;  %v17963_v45 = vpack.c.bf16 %v20217_v23, %v20214_v46  ;;  %v2823_v59 = vand.u32 4294901760, %v2822_v30  ;;  %v21730_v14 = vand.u32 4294901760, %v20203_v52 }
 0x287   :  { %v2247_v28 = vpop.f32.mrb[18].mxu0  ;;  %17959 = vmatprep.subr.bf16.mxu1 %v21740_v7  ;;  %v21732_v39 = vand.u32 4294901760, %v20205_v27  ;;  %v5803_v35 = vand.u32 4294901760, %v20239_v5  ;;  %v5798_v12 = vand.u32 4294901760, %v5797_v29 }
 0x288   :  { %v20209_v15 = vadd.f32 %v2247_v28, %v1491_v31  ;;  %v2249_v42 = vpop.f32.mrb[19].mxu0  ;;  %v2829_v48 = vsub.f32 %v20217_v23, %v2828_v4  ;;  %v20225_v10 = vpack.c.bf16 %v2828_v4, %v2821_v38  ;;  %v20250_v26 = vsub.f32 %v20203_v52, %v21730_v14 }
 0x289   :  { %v20211_v32 = vadd.f32 %v2249_v42, %v1495_v40  ;;  %v20255_v21 = vsub.f32 %v20205_v27, %v21732_v39  ;;  %v5804_v13 = vsub.f32 %v20239_v5, %v5803_v35  ;;  %v20274_v55 = vpack.c.bf16 %v5803_v35, %v5796_v16 }
 0x28a   :  { %v2830_v49 = vand.u32 4294901760, %v2829_v48  ;;  %v21729_v54 = vand.u32 4294901760, %v20209_v15  ;;  %21819 = vst [vmem:[#allocation5_spill] sm:$0xff] %v20250_v26  ;;  %v9315_v20 = vand.u32 4294901760, %v20250_v26 }
 0x28b   :  { %v21731_v18 = vand.u32 4294901760, %v20211_v32  ;;  %21820 = vst [vmem:[#allocation6_spill] sm:$0xff] %v20255_v21  ;;  %v12290_v24 = vand.u32 4294901760, %v20255_v21  ;;  %v5805_v36 = vand.u32 4294901760, %v5804_v13 }
 0x28c   :  { %v20227_v2 = vpack.c.bf16 %v2830_v49, %v2823_v59  ;;  %v20267_v62 = vsub.f32 %v20209_v15, %v21729_v54  ;;  %v9316_v28 = vsub.f32 %v20250_v26, %v9315_v20 }
 0x28d   :  { %v20262_v22 = vsub.f32 %v20211_v32, %v21731_v18  ;;  %v20278_v6 = vpack.c.bf16 %v5805_v36, %v5798_v12  ;;  %v12291_v42 = vsub.f32 %v20255_v21, %v12290_v24 }
 0x28e   :  { %21821 = vst [vmem:[#allocation7_spill] sm:$0xff] %v20267_v62  ;;  %v9322_v51 = vand.u32 4294901760, %v20267_v62  ;;  %v9317_v16 = vand.u32 4294901760, %v9316_v28 }
 0x28f   :  { %v12297_v40 = vand.u32 4294901760, %v20262_v22  ;;  %v12292_v48 = vand.u32 4294901760, %v12291_v42 }
 0x290   :  { %v9323_v4 = vsub.f32 %v20267_v62, %v9322_v51  ;;  %v20290_v29 = vpack.c.bf16 %v9322_v51, %v9315_v20  ;;  %v20307_v20 = vld [vmem:[%s21707_s4 + $0x8] sm:$0xff] }
 0x291   :  { %v12298_v38 = vsub.f32 %v20262_v22, %v12297_v40  ;;  %v20288_v49 = vpack.c.bf16 %v12297_v40, %v12290_v24  ;;  %v20302_v24 = vld [vmem:[%s21707_s4] sm:$0xff] }
 0x292   :  { %v9324_v35 = vand.u32 4294901760, %v9323_v4  ;;  %21823 = vst [vmem:[#allocation9_spill] sm:$0xff] %v20290_v29  ;;  %v21738_v40 = vand.u32 4294901760, %v20302_v24 }
 0x293   :  { %v12299_v59 = vand.u32 4294901760, %v12298_v38  ;;  %21822 = vst [vmem:[#allocation8_spill] sm:$0xff] %v20288_v49 }
 0x295   :  { %v20292_v13 = vpack.c.bf16 %v12299_v59, %v12292_v48 }
 0x2d8   :  { %v2729_v31 = vpop.xlane.xlu0 %2728 }
 0x2d9   :  { %v2730_v41 = vsub.f32 %v20182_v25, %v2729_v31  ;;  %v20294_v31 = vpack.c.bf16 %v9324_v35, %v9317_v16  ;;  %v3744_v35 = vpop.permute.xlu1 %3743 }
 0x2da   :  { %v3749_v23 = vsel %vm2257_vm3, %v3744_v35, 0 }
 0x2db   :  { %v2731_v3 = vmul.f32 1.442695, %v2730_v41  ;;  %21824 = vst [vmem:[#allocation10_spill] sm:$0xff] %v20294_v31  ;;  %v21737_v41 = vand.u32 4294901760, %v20307_v20 }
 0x2dd   :  { %19254 = vpow2.f32 %v2731_v3  ;;  %v20315_v51 = vpack.c.bf16 %v21737_v41, %v21738_v40 }
 0x2df   :  { %21825 = vst [vmem:[#allocation11_spill] sm:$0xff] %v20315_v51  ;;  %17976 = vmatpush3.bf16.msra.mxu0 %v20315_v51 }
 0x2e0   :  { %17977 = vmatprep.subr.bf16.mxu0 %v21740_v7 }
 0x2e7   :  { %v19255_v12 = vpop.eup %19254 }
 0x2e8   :  { %v2733_v36 = vsel %vm2726_vm4, %v19255_v12, 0.0 }
 0x2e9   :  { %2734 = vadd.xlane.f32.xlu0 %v2733_v36 }
 0x2ff   :  { %3741 = vrot.lane.b32.xlu0 %v19830_v43, %s19327_s23 }
 0x376   :  { %v2735_v43 = vpop.xlane.xlu0 %2734 }
 0x377   :  { %19256 = vrcp.f32 %v2735_v43  ;;  %v3754_v43 = vand.u32 4294901760, %v3749_v23 }
 0x37a   :  { %v3742_v46 = vpop.permute.xlu0 %3741 }
 0x37b   :  { %v3747_v36 = vsel %vm2257_vm3, %v3742_v46, 0 }
 0x381   :  { %v19257_v3 = vpop.eup %19256 }
 0x382   :  { %v2737_v28 = vmul.f32 %v19257_v3, %v19255_v12  ;;  %v3820_v3 = vand.u32 4294901760, %v3747_v36 }
 0x384   :  { %v2739_v42 = vsel %vm2726_vm4, %v2737_v28, 0 }
 0x385   :  { %v2808_v38 = vand.u32 4294901760, %v2739_v42 }
 0x387   :  { %v2809_v4 = vsub.f32 %v2739_v42, %v2808_v38  ;;  %v3821_v42 = vsub.f32 %v3747_v36, %v3820_v3  ;;  %v62_v36 = vld [vmem:[%s21707_s4 + $0x18] sm:$0xff] }
 0x389   :  { %v2810_v48 = vand.u32 4294901760, %v2809_v4 }
 0x38b   :  { %v2811_v59 = vsub.f32 %v2809_v4, %v2810_v48 }
 0x38d   :  { %v2812_v16 = vand.u32 4294901760, %v2811_v59  ;;  %v3822_v59 = vand.u32 4294901760, %v3821_v42 }
 0x38f   :  { %16077 = vmatmul.mubr.f32.vlgmr.msra.gmra.mrb[10].mxu1 %v2812_v16 }
 0x390   :  { %17961 = vmatpush3.bf16.msra.mxu1 %v20227_v2  ;;  %16083 = vmatprep.mubr.msk.f32.mxu1 %vm19326_vm2, %v21735_v9  ;;  %v3746_v2 = vpop.permute.xlu1 %3745 }
 0x391   :  { %17962 = vmatprep.subr.bf16.mxu1 %v21740_v7  ;;  %v3751_v12 = vsel %vm2257_vm3, %v3746_v2, 0 }
 0x397   :  { %16084 = vmatmul.mubr.f32.vlgmr.msra.gmra.mrb[10].mxu1 %v2808_v38 }
 0x398   :  { %17964 = vmatpush3.bf16.msra.mxu1 %v17963_v45  ;;  %16090 = vmatprep.mubr.msk.f32.mxu1 %vm19326_vm2, %v21735_v9  ;;  %v3757_v45 = vand.u32 4294901760, %v3751_v12 }
 0x399   :  { %17965 = vmatprep.subr.bf16.mxu1 %v21740_v7 }
 0x39a   :  { %v3839_v28 = vsub.f32 %v3751_v12, %v3757_v45  ;;  %v18047_v16 = vpack.c.bf16 %v3757_v45, %v3754_v43  ;;  %v3823_v12 = vsub.f32 %v3821_v42, %v3822_v59  ;;  %v61_v45 = vld [vmem:[%s21707_s4 + $0x10] sm:$0xff] }
 0x39f   :  { %16091 = vmatmul.mubr.f32.vlgmr.msra.gmra.mrb[10].mxu1 %v2809_v4  ;;  %v3840_v4 = vand.u32 4294901760, %v3839_v28 }
 0x3a0   :  { %17967 = vmatpush3.bf16.msra.mxu1 %v20201_v17  ;;  %16097 = vmatprep.mubr.msk.f32.mxu1 %vm19326_vm2, %v21735_v9 }
 0x3a1   :  { %17968 = vmatprep.subr.bf16.mxu1 %v21740_v7  ;;  %v3841_v35 = vsub.f32 %v3839_v28, %v3840_v4 }
 0x3a7   :  { %16098 = vmatmul.mubr.f32.vlgmr.msra.gmra.mrb[10].mxu1 %v2810_v48 }
 0x3a8   :  { %17970 = vmatpush3.bf16.msra.mxu1 %v20225_v10  ;;  %16104 = vmatprep.mubr.msk.f32.mxu1 %vm19326_vm2, %v21735_v9  ;;  %v3832_v10 = vsub.f32 %v3749_v23, %v3754_v43  ;;  %v3824_v23 = vand.u32 4294901760, %v3823_v12  ;;  %v3210_v43 = vand.u32 4294901760, %v61_v45 }
 0x3a9   :  { %17971 = vmatprep.subr.bf16.mxu1 %v21740_v7 }
 0x3aa   :  { %v3833_v48 = vand.u32 4294901760, %v3832_v10 }
 0x3ac   :  { %v3834_v2 = vsub.f32 %v3832_v10, %v3833_v48 }
 0x3ae   :  { %v3835_v46 = vand.u32 4294901760, %v3834_v2 }
 0x3af   :  { %16105 = vmatmul.mubr.f32.vlgmr.msra.gmra.mrb[10].mxu1 %v2808_v38 }
 0x3b0   :  { %17973 = vmatpush3.bf16.msra.mxu1 %v20201_v17  ;;  %16111 = vmatprep.mubr.msk.f32.mxu1 %vm19326_vm2, %v21735_v9  ;;  %v3842_v17 = vand.u32 4294901760, %v3841_v35  ;;  %v66_v35 = vld [vmem:[%s21707_s4 + $0x38] sm:$0xff] }
 0x3b1   :  { %18046 = vmatprep.subr.bf16.mxu1 %v21740_v7  ;;  %v3225_v12 = vand.u32 4294901760, %v66_v35 }
 0x3b2   :  { %v18050_v25 = vpack.c.bf16 %v3842_v17, %v3835_v46  ;;  %v3302_v46 = vsub.f32 %v61_v45, %v3210_v43 }
 0x3b3   :  { %v3337_v29 = vsub.f32 %v66_v35, %v3225_v12 }
 0x3b5   :  { %v3338_v26 = vand.u32 4294901760, %v3337_v29 }
 0x3b7   :  { %16112 = vmatmul.mubr.f32.vlgmr.msra.gmra.mrb[10].mxu1 %v2808_v38  ;;  %v18053_v38 = vpack.c.bf16 %v3839_v28, %v3832_v10  ;;  %v3213_v28 = vand.u32 4294901760, %v62_v36 }
 0x3b8   :  { %16232 = vmatprep.mubr.msk.f32.mxu1 %vm19326_vm2, %v21735_v9 }
 0x3b9   :  { %18048 = vmatpush3.bf16.xpose.msra.mxu1 %v18047_v16  ;;  %v20371_v10 = vpack.c.bf16 %v3213_v28, %v3210_v43 }
 0x3ba   :  { %18049 = vmatprep.subr.bf16.mxu1 %v21740_v7 }
 0x3bb   :  { %21826 = vst [vmem:[#allocation12_spill] sm:$0xff] %v20371_v10  ;;  %17979 = vmatpush3.bf16.msra.mxu0 %v20371_v10 }
 0x3bc   :  { %17980 = vmatprep.subr.bf16.mxu0 %v21740_v7 }
 0x3c0   :  { %16233 = vmatmul.mubr.f32.vlgmr.msra.gmra.mrb[12].mxu1 %v3824_v23  ;;  %v3309_v23 = vsub.f32 %v62_v36, %v3213_v28 }
 0x3c1   :  { %18051 = vmatpush3.bf16.xpose.msra.mxu1 %v18050_v25  ;;  %16239 = vmatprep.mubr.msk.f32.mxu1 %vm19326_vm2, %v21735_v9  ;;  %v18059_v25 = vpack.c.bf16 %v3840_v4, %v3833_v48 }
 0x3c2   :  { %18052 = vmatprep.subr.bf16.mxu1 %v21740_v7 }
 0x3c8   :  { %16240 = vmatmul.mubr.f32.vlgmr.msra.gmra.mrb[12].mxu1 %v3820_v3 }
 0x3c9   :  { %18054 = vmatpush3.bf16.xpose.msra.mxu1 %v18053_v38  ;;  %16246 = vmatprep.mubr.msk.f32.mxu1 %vm19326_vm2, %v21735_v9  ;;  %v3303_v38 = vand.u32 4294901760, %v3302_v46 }
 0x3ca   :  { %18055 = vmatprep.subr.bf16.mxu1 %v21740_v7 }
 0x3cb   :  { %v3304_v30 = vsub.f32 %v3302_v46, %v3303_v38 }
 0x3cd   :  { %v3305_v39 = vand.u32 4294901760, %v3304_v30 }
 0x3d0   :  { %16247 = vmatmul.mubr.f32.vlgmr.msra.gmra.mrb[12].mxu1 %v3821_v42  ;;  %v63_v42 = vld [vmem:[%s21707_s4 + $0x20] sm:$0xff] }
 0x3d1   :  { %18057 = vmatpush3.bf16.xpose.msra.mxu1 %v18047_v16  ;;  %16253 = vmatprep.mubr.msk.f32.mxu1 %vm19326_vm2, %v21735_v9  ;;  %v3216_v4 = vand.u32 4294901760, %v63_v42 }
 0x3d2   :  { %18058 = vmatprep.subr.bf16.mxu1 %v21740_v7 }
 0x3d3   :  { %v3316_v54 = vsub.f32 %v63_v42, %v3216_v4  ;;  %v3339_v42 = vsub.f32 %v3337_v29, %v3338_v26 }
 0x3d5   :  { %v3317_v57 = vand.u32 4294901760, %v3316_v54 }
 0x3d8   :  { %16254 = vmatmul.mubr.f32.vlgmr.msra.gmra.mrb[12].mxu1 %v3822_v59 }
 0x3d9   :  { %18060 = vmatpush3.bf16.xpose.msra.mxu1 %v18059_v25  ;;  %16260 = vmatprep.mubr.msk.f32.mxu1 %vm19326_vm2, %v21735_v9  ;;  %v3310_v25 = vand.u32 4294901760, %v3309_v23 }
 0x3da   :  { %18061 = vmatprep.subr.bf16.mxu1 %v21740_v7 }
 0x3db   :  { %v3311_v18 = vsub.f32 %v3309_v23, %v3310_v25 }
 0x3dd   :  { %v3312_v60 = vand.u32 4294901760, %v3311_v18 }
 0x3df   :  { %v20395_v45 = vpack.c.bf16 %v3312_v60, %v3305_v39  ;;  %v20407_v60 = vpack.c.bf16 %v3310_v25, %v3303_v38 }
 0x3e0   :  { %16261 = vmatmul.mubr.f32.vlgmr.msra.gmra.mrb[12].mxu1 %v3820_v3 }
 0x3e1   :  { %18063 = vmatpush3.bf16.xpose.msra.mxu1 %v18047_v16  ;;  %16267 = vmatprep.mubr.msk.f32.mxu1 %vm19326_vm2, %v21735_v9  ;;  %v65_v16 = vld [vmem:[%s21707_s4 + $0x30] sm:$0xff]  ;;  %21829 = vst [vmem:[#allocation15_spill] sm:$0xff] %v20395_v45  ;;  %21835 = vst [vmem:[#allocation21_spill] sm:$0xff] %v20407_v60 }
 0x3e2   :  { %18067 = vmatprep.subr.bf16.mxu1 %v21740_v7  ;;  %v3222_v2 = vand.u32 4294901760, %v65_v16 }
 0x3e4   :  { %v20391_v17 = vpack.c.bf16 %v3225_v12, %v3222_v2  ;;  %v3330_v40 = vsub.f32 %v65_v16, %v3222_v2 }
 0x3e6   :  { %21828 = vst [vmem:[#allocation14_spill] sm:$0xff] %v20391_v17  ;;  %v3331_v28 = vand.u32 4294901760, %v3330_v40  ;;  %v20405_v16 = vpack.c.bf16 %v3337_v29, %v3330_v40 }
 0x3e8   :  { %16268 = vmatmul.mubr.f32.vlgmr.msra.gmra.mrb[12].mxu1 %v3820_v3  ;;  %v64_v3 = vld [vmem:[%s21707_s4 + $0x28] sm:$0xff]  ;;  %v3332_v62 = vsub.f32 %v3330_v40, %v3331_v28  ;;  %21834 = vst [vmem:[#allocation20_spill] sm:$0xff] %v20405_v16  ;;  %v20411_v39 = vpack.c.bf16 %v3338_v26, %v3331_v28  ;;  %v21842_v28 = vmov 0.0|0.0  }
 0x3e9   :  { %16281 = vmatprep.mubr.msk.f32.mxu1 %vm19326_vm2, %v21735_v9  ;;  %v3219_v48 = vand.u32 4294901760, %v64_v3  ;;  %v3318_v9 = vsub.f32 %v3316_v54, %v3317_v57 }
 0x3ea   :  { %21837 = vst [vmem:[#allocation23_spill] sm:$0xff] %v20411_v39 }
 0x3eb   :  { %v20381_v59 = vpack.c.bf16 %v3219_v48, %v3216_v4  ;;  %v3323_v14 = vsub.f32 %v64_v3, %v3219_v48  ;;  %v3319_v36 = vand.u32 4294901760, %v3318_v9  ;;  %v3333_v3 = vand.u32 4294901760, %v3332_v62 }
 0x3ec   :  { %v3340_v4 = vand.u32 4294901760, %v3339_v42  ;;  %v20401_v48 = vpack.c.bf16 %v3309_v23, %v3302_v46  ;;  %v21839_v62 = vand.u32 4294901760, %v20307_v20 }
 0x3ed   :  { %21827 = vst [vmem:[#allocation13_spill] sm:$0xff] %v20381_v59  ;;  %17982 = vmatpush3.bf16.msra.mxu0 %v20381_v59  ;;  %v3324_v19 = vand.u32 4294901760, %v3323_v14  ;;  %v20403_v18 = vpack.c.bf16 %v3323_v14, %v3316_v54 }
 0x3ee   :  { %17983 = vmatprep.subr.bf16.mxu0 %v21740_v7  ;;  %v20399_v30 = vpack.c.bf16 %v3340_v4, %v3333_v3  ;;  %21832 = vst [vmem:[#allocation18_spill] sm:$0xff] %v20401_v48  ;;  %v3295_v2 = vsub.f32 %v20307_v20, %v21839_v62  ;;  %v21841_v20 = vmov 0.0  }
 0x3ef   :  { %v3325_v41 = vsub.f32 %v3323_v14, %v3324_v19  ;;  %21833 = vst [vmem:[#allocation19_spill] sm:$0xff] %v20403_v18  ;;  %v20409_v9 = vpack.c.bf16 %v3324_v19, %v3317_v57 }
 0x3f0   :  { %21831 = vst [vmem:[#allocation17_spill] sm:$0xff] %v20399_v30  ;;  %v3296_v46 = vand.u32 4294901760, %v3295_v2 }
 0x3f1   :  { %17985 = vmatpush3.bf16.msra.mxu0 %v20391_v17  ;;  %v3326_v43 = vand.u32 4294901760, %v3325_v41  ;;  %21836 = vst [vmem:[#allocation22_spill] sm:$0xff] %v20409_v9  ;;  %v21838_v41 = vand.u32 4294901760, %v20302_v24 }
 0x3f2   :  { %17986 = vmatprep.subr.bf16.mxu0 %v21740_v7  ;;  %v3297_v23 = vsub.f32 %v3295_v2, %v3296_v46 }
 0x3f3   :  { %v20397_v7 = vpack.c.bf16 %v3326_v43, %v3319_v36  ;;  %v3288_v35 = vsub.f32 %v20302_v24, %v21838_v41 }
 0x3f4   :  { %v3298_v38 = vand.u32 4294901760, %v3297_v23 }
 0x3f5   :  { %21830 = vst [vmem:[#allocation16_spill] sm:$0xff] %v20397_v7  ;;  %v3289_v12 = vand.u32 4294901760, %v3288_v35  ;;  %v20434_v42 = vpack.c.bf16 %v3295_v2, %v3288_v35 }
 0x3f7   :  { %v3290_v40 = vsub.f32 %v3288_v35, %v3289_v12  ;;  %21843 = vst [vmem:[#allocation25_spill] sm:$0xff] %v20434_v42  ;;  %v20458_v35 = vpack.c.bf16 %v3296_v46, %v3289_v12 }
 0x3f9   :  { %v3291_v57 = vand.u32 4294901760, %v3290_v40  ;;  %21844 = vst [vmem:[#allocation26_spill] sm:$0xff] %v20458_v35 }
 0x3fb   :  { %v20423_v36 = vpack.c.bf16 %v3298_v38, %v3291_v57 }
 0x3fd   :  { %21840 = vst [vmem:[#allocation24_spill] sm:$0xff] %v20423_v36 }
 0x48a   :  { %v3196_v14 = vpop.f32.mrb[10].mxu1 }
 0x48b   :  { %v3201_v54 = vsel %vm2257_vm3, %v3196_v14, 0  ;;  %v16113_v29 = vpop.f32.mrb[11].mxu1 }
 0x48c   :  { %v20420_v19 = vand.u32 4294901760, %v3201_v54 }
 0x48e   :  { %v3277_v26 = vsub.f32 %v3201_v54, %v20420_v19 }
 0x490   :  { %v3278_v25 = vand.u32 4294901760, %v3277_v26 }
 0x492   :  { %v3279_v24 = vsub.f32 %v3277_v26, %v3278_v25 }
 0x494   :  { %v3280_v43 = vand.u32 4294901760, %v3279_v24 }
 0x496   :  { %16131 = vmatmul.mubr.f32.vlgmr.msra.gmra.mrb[20].mxu0 %v3280_v43 }
 0x497   :  { %17988 = vmatpush3.bf16.msra.mxu0 %v20423_v36  ;;  %16149 = vmatprep.mubr.msk.f32.mxu0 %vm19326_vm2, %v21841_v20 }
 0x498   :  { %17989 = vmatprep.subr.bf16.mxu0 %v21842_v28 }
 0x49b   :  { %17991 = vmatpush3.bf16.msra.mxu0 %v20395_v45 }
 0x49c   :  { %17992 = vmatprep.subr.bf16.mxu0 %v21842_v28 }
 0x49f   :  { %17994 = vmatpush3.bf16.msra.mxu0 %v20397_v7 }
 0x4a0   :  { %17995 = vmatprep.subr.bf16.mxu0 %v21842_v28 }
 0x4a3   :  { %17997 = vmatpush3.bf16.msra.mxu0 %v20399_v30 }
 0x4a4   :  { %17998 = vmatprep.subr.bf16.mxu0 %v21842_v28 }
 0x4a6   :  { %16150 = vmatmul.mubr.f32.vlgmr.msra.gmra.mrb[20].mxu0 %v20420_v19 }
 0x4a7   :  { %18000 = vmatpush3.bf16.msra.mxu0 %v20434_v42  ;;  %16168 = vmatprep.mubr.msk.f32.mxu0 %vm19326_vm2, %v21841_v20 }
 0x4a8   :  { %18001 = vmatprep.subr.bf16.mxu0 %v21842_v28 }
 0x4ab   :  { %18003 = vmatpush3.bf16.msra.mxu0 %v20401_v48 }
 0x4ac   :  { %18004 = vmatprep.subr.bf16.mxu0 %v21842_v28 }
 0x4af   :  { %18006 = vmatpush3.bf16.msra.mxu0 %v20403_v18 }
 0x4b0   :  { %18007 = vmatprep.subr.bf16.mxu0 %v21842_v28 }
 0x4b3   :  { %18009 = vmatpush3.bf16.msra.mxu0 %v20405_v16 }
 0x4b4   :  { %18010 = vmatprep.subr.bf16.mxu0 %v21842_v28 }
 0x4b6   :  { %16169 = vmatmul.mubr.f32.vlgmr.msra.gmra.mrb[20].mxu0 %v3277_v26 }
 0x4b7   :  { %18012 = vmatpush3.bf16.msra.mxu0 %v20315_v51  ;;  %16187 = vmatprep.mubr.msk.f32.mxu0 %vm19326_vm2, %v21841_v20 }
 0x4b8   :  { %18013 = vmatprep.subr.bf16.mxu0 %v21842_v28 }
 0x4bb   :  { %18015 = vmatpush3.bf16.msra.mxu0 %v20371_v10  ;;  %v4208_v3 = vpop.f32.mrb[12].mxu1 }
 0x4bc   :  { %v16269_v4 = vpop.f32.mrb[13].mxu1  ;;  %v4212_v41 = vsel %vm2726_vm4, %v4208_v3, -inf  ;;  %18016 = vmatprep.subr.bf16.mxu0 %v21842_v28 }
 0x4bd   :  { %4213 = vmax.xlane.f32.xlu1 %v4212_v41 }
 0x4bf   :  { %18018 = vmatpush3.bf16.msra.mxu0 %v20381_v59 }
 0x4c0   :  { %18019 = vmatprep.subr.bf16.mxu0 %v21842_v28 }
 0x4c3   :  { %18021 = vmatpush3.bf16.msra.mxu0 %v20391_v17 }
 0x4c4   :  { %18022 = vmatprep.subr.bf16.mxu0 %v21842_v28 }
 0x4c6   :  { %16188 = vmatmul.mubr.f32.vlgmr.msra.gmra.mrb[20].mxu0 %v3278_v25 }
 0x4c7   :  { %18024 = vmatpush3.bf16.msra.mxu0 %v20458_v35  ;;  %16206 = vmatprep.mubr.msk.f32.mxu0 %vm19326_vm2, %v21841_v20 }
 0x4c8   :  { %18025 = vmatprep.subr.bf16.mxu0 %v21842_v28 }
 0x4cb   :  { %18027 = vmatpush3.bf16.msra.mxu0 %v20407_v60 }
 0x4cc   :  { %18028 = vmatprep.subr.bf16.mxu0 %v21842_v28 }
 0x4ce   :  { %4225 = vrot.lane.b32.xlu1 %v20191_v63, %s19327_s23 }
 0x4cf   :  { %18030 = vmatpush3.bf16.msra.mxu0 %v20409_v9 }
 0x4d0   :  { %18031 = vmatprep.subr.bf16.mxu0 %v21842_v28 }
 0x4d3   :  { %18033 = vmatpush3.bf16.msra.mxu0 %v20411_v39 }
 0x4d4   :  { %18034 = vmatprep.subr.bf16.mxu0 %v21842_v28 }
 0x4d6   :  { %16207 = vmatmul.mubr.f32.vlgmr.msra.gmra.mrb[20].mxu0 %v20420_v19 }
 0x4d7   :  { %18036 = vmatpush3.bf16.msra.mxu0 %v20315_v51  ;;  %16225 = vmatprep.mubr.msk.f32.mxu0 %vm19326_vm2, %v21841_v20 }
 0x4d8   :  { %18037 = vmatprep.subr.bf16.mxu0 %v21842_v28 }
 0x4db   :  { %18039 = vmatpush3.bf16.msra.mxu0 %v20371_v10 }
 0x4dc   :  { %18040 = vmatprep.subr.bf16.mxu0 %v21842_v28 }
 0x4df   :  { %18042 = vmatpush3.bf16.msra.mxu0 %v20381_v59 }
 0x4e0   :  { %18043 = vmatprep.subr.bf16.mxu0 %v21842_v28 }
 0x4e3   :  { %18045 = vmatpush3.bf16.msra.mxu0 %v20391_v17 }
 0x4e4   :  { %18064 = vmatprep.subr.bf16.mxu0 %v21842_v28 }
 0x4e6   :  { %16226 = vmatmul.mubr.f32.vlgmr.msra.gmra.mrb[20].mxu0 %v20420_v19 }
 0x4e7   :  { %16274 = vmatprep.mubr.msk.f32.mxu0 %vm19326_vm2, %v21841_v20 }
 0x54a   :  { %v4214_v63 = vpop.xlane.xlu1 %4213 }
 0x54b   :  { %v4215_v62 = vsub.f32 %v4208_v3, %v4214_v63 }
 0x54d   :  { %v4216_v2 = vmul.f32 1.442695, %v4215_v62 }
 0x54e   :  { %v4226_v14 = vpop.permute.xlu1 %4225 }
 0x54f   :  { %19258 = vpow2.f32 %v4216_v2  ;;  %v4235_v54 = vand.u32 4294901760, %v4226_v14 }
 0x551   :  { %v4313_v40 = vsub.f32 %v4226_v14, %v4235_v54 }
 0x553   :  { %v4314_v19 = vand.u32 4294901760, %v4313_v40 }
 0x555   :  { %v4315_v25 = vsub.f32 %v4313_v40, %v4314_v19 }
 0x557   :  { %v4316_v41 = vand.u32 4294901760, %v4315_v25 }
 0x559   :  { %v19259_v12 = vpop.eup %19258 }
 0x55a   :  { %v4218_v46 = vsel %vm2726_vm4, %v19259_v12, 0.0 }
 0x55b   :  { %4219 = vadd.xlane.f32.xlu0 %v4218_v46 }
 0x571   :  { %4227 = vrot.lane.b32.xlu0 %v20195_v37, %s19327_s23 }
 0x5e8   :  { %v4220_v29 = vpop.xlane.xlu0 %4219 }
 0x5e9   :  { %19260 = vrcp.f32 %v4220_v29 }
 0x5ec   :  { %v4228_v23 = vpop.permute.xlu0 %4227 }
 0x5ed   :  { %v4238_v26 = vand.u32 4294901760, %v4228_v23 }
 0x5ef   :  { %v18065_v57 = vpack.c.bf16 %v4238_v26, %v4235_v54  ;;  %v4320_v38 = vsub.f32 %v4228_v23, %v4238_v26  ;;  %v20503_v23 = vadd.f32 %v19816_v53, %v19820_v47  ;;  %v5241_v26 = vsel %vm2257_vm3, %v19859_v0, 0 }
 0x5f0   :  { %v5247_v25 = vand.u32 4294901760, %v5241_v26 }
 0x5f1   :  { %v4321_v24 = vand.u32 4294901760, %v4320_v38  ;;  %18066 = vmatpush3.bf16.msra.mxu0 %v18065_v57  ;;  %v18071_v14 = vpack.c.bf16 %v4320_v38, %v4313_v40 }
 0x5f2   :  { %18082 = vmatprep.subr.bf16.mxu0 %v21842_v28  ;;  %v5329_v47 = vsub.f32 %v5241_v26, %v5247_v25  ;;  %v21845_v26 = vand.u32 4294901760, %v20193_v44 }
 0x5f3   :  { %v19261_v43 = vpop.eup %19260  ;;  %v4322_v3 = vsub.f32 %v4320_v38, %v4321_v24  ;;  %v18077_v40 = vpack.c.bf16 %v4321_v24, %v4314_v19  ;;  %v5238_v38 = vsel %vm2257_vm3, %v19838_v50, 0  ;;  %v5235_v19 = vsel %vm2257_vm3, %v20503_v23, 0 }
 0x5f4   :  { %v4222_v4 = vmul.f32 %v19261_v43, %v19259_v12  ;;  %v5244_v24 = vand.u32 4294901760, %v5238_v38  ;;  %v5310_v53 = vand.u32 4294901760, %v5235_v19 }
 0x5f5   :  { %v4323_v37 = vand.u32 4294901760, %v4322_v3 }
 0x5f6   :  { %v4232_v63 = vsel %vm2726_vm4, %v4222_v4, 0  ;;  %v5322_v43 = vsub.f32 %v5238_v38, %v5244_v24  ;;  %v5311_v3 = vsub.f32 %v5235_v19, %v5310_v53  ;;  %v5330_v4 = vand.u32 4294901760, %v5329_v47 }
 0x5f7   :  { %v18068_v62 = vpack.c.bf16 %v4323_v37, %v4316_v41  ;;  %v4301_v2 = vand.u32 4294901760, %v4232_v63  ;;  %v21846_v38 = vand.u32 4294901760, %v20197_v56 }
 0x5f8   :  { %v5323_v41 = vand.u32 4294901760, %v5322_v43  ;;  %v5312_v37 = vand.u32 4294901760, %v5311_v3 }
 0x5f9   :  { %18069 = vmatpush3.bf16.msra.mxu1 %v18068_v62  ;;  %v4302_v46 = vsub.f32 %v4232_v63, %v4301_v2  ;;  %v18155_v63 = vpack.c.bf16 %v5247_v25, %v5244_v24  ;;  %v5331_v62 = vsub.f32 %v5329_v47, %v5330_v4  ;;  %v20539_v19 = vpack.c.bf16 %v21846_v38, %v21845_v26  ;;  %v67_v25 = vld [vmem:[%s21707_s4 + $0x40] sm:$0xff]  ;;  %v68_v24 = vld [vmem:[%s21707_s4 + $0x48] sm:$0xff] }
 0x5fa   :  { %18070 = vmatprep.subr.bf16.mxu1 %v21842_v28 }
 0x5fb   :  { %v4303_v54 = vand.u32 4294901760, %v4302_v46 }
 0x5fc   :  { %16282 = vmatmul.mubr.f32.vlgmr.msra.gmra.mrb[14].mxu1 %v4301_v2 }
 0x5fd   :  { %18072 = vmatpush3.bf16.msra.mxu1 %v18071_v14  ;;  %v4304_v29 = vsub.f32 %v4302_v46, %v4303_v54  ;;  %16288 = vmatprep.mubr.msk.f32.mxu1 %vm19326_vm2, %v21841_v20  ;;  %v5313_v14 = vsub.f32 %v5311_v3, %v5312_v37 }
 0x5fe   :  { %18073 = vmatprep.subr.bf16.mxu1 %v21842_v28 }
 0x5ff   :  { %v4305_v12 = vand.u32 4294901760, %v4304_v29  ;;  %v5314_v29 = vand.u32 4294901760, %v5313_v14 }
 0x601   :  { %16275 = vmatmul.mubr.f32.vlgmr.msra.gmra.mrb[22].mxu0 %v4305_v12 }
 0x602   :  { %16328 = vmatprep.mubr.msk.f32.mxu0 %vm19326_vm2, %v21841_v20 }
 0x604   :  { %16289 = vmatmul.mubr.f32.vlgmr.msra.gmra.mrb[14].mxu1 %v4302_v46  ;;  %v5324_v46 = vsub.f32 %v5322_v43, %v5323_v41 }
 0x605   :  { %18075 = vmatpush3.bf16.msra.mxu1 %v18065_v57  ;;  %16295 = vmatprep.mubr.msk.f32.mxu1 %vm19326_vm2, %v21841_v20 }
 0x606   :  { %18076 = vmatprep.subr.bf16.mxu1 %v21842_v28 }
 0x60c   :  { %16296 = vmatmul.mubr.f32.vlgmr.msra.gmra.mrb[14].mxu1 %v4303_v54  ;;  %v5325_v54 = vand.u32 4294901760, %v5324_v46 }
 0x60d   :  { %18078 = vmatpush3.bf16.msra.mxu1 %v18077_v40  ;;  %16302 = vmatprep.mubr.msk.f32.mxu1 %vm19326_vm2, %v21841_v20  ;;  %v18167_v40 = vpack.c.bf16 %v5330_v4, %v5323_v41  ;;  %v70_v4 = vld [vmem:[%s21707_s4 + $0x58] sm:$0xff]  ;;  %v71_v41 = vld [vmem:[%s21707_s4 + $0x60] sm:$0xff] }
 0x60e   :  { %18079 = vmatprep.subr.bf16.mxu1 %v21842_v28  ;;  %v4709_v46 = vand.u32 4294901760, %v71_v41 }
 0x614   :  { %16303 = vmatmul.mubr.f32.vlgmr.msra.gmra.mrb[14].mxu1 %v4301_v2 }
 0x615   :  { %18081 = vmatpush3.bf16.msra.mxu1 %v18065_v57  ;;  %16309 = vmatprep.mubr.msk.f32.mxu1 %vm19326_vm2, %v21841_v20  ;;  %v5332_v57 = vand.u32 4294901760, %v5331_v62  ;;  %v72_v62 = vld [vmem:[%s21707_s4 + $0x68] sm:$0xff] }
 0x616   :  { %18154 = vmatprep.subr.bf16.mxu1 %v21842_v28  ;;  %v4712_v14 = vand.u32 4294901760, %v72_v62 }
 0x617   :  { %v18158_v12 = vpack.c.bf16 %v5332_v57, %v5325_v54  ;;  %v73_v57 = vld [vmem:[%s21707_s4 + $0x70] sm:$0xff]  ;;  %v74_v54 = vld [vmem:[%s21707_s4 + $0x78] sm:$0xff] }
 0x61c   :  { %16310 = vmatmul.mubr.f32.vlgmr.msra.gmra.mrb[14].mxu1 %v4301_v2  ;;  %v18161_v2 = vpack.c.bf16 %v5329_v47, %v5322_v43  ;;  %v4697_v47 = vand.u32 4294901760, %v67_v25  ;;  %v4700_v43 = vand.u32 4294901760, %v68_v24 }
 0x61d   :  { %16430 = vmatprep.mubr.msk.f32.mxu1 %vm19326_vm2, %v21841_v20 }
 0x61e   :  { %18156 = vmatpush3.bf16.xpose.msra.mxu1 %v18155_v63  ;;  %v4781_v26 = vsub.f32 %v67_v25, %v4697_v47  ;;  %v4788_v38 = vsub.f32 %v68_v24, %v4700_v43  ;;  %v4809_v25 = vsub.f32 %v71_v41, %v4709_v46  ;;  %v4816_v24 = vsub.f32 %v72_v62, %v4712_v14 }
 0x61f   :  { %18157 = vmatprep.subr.bf16.mxu1 %v21842_v28 }
 0x620   :  { %v4782_v39 = vand.u32 4294901760, %v4781_v26  ;;  %v4789_v9 = vand.u32 4294901760, %v4788_v38 }
 0x622   :  { %v4783_v18 = vsub.f32 %v4781_v26, %v4782_v39  ;;  %v4790_v48 = vsub.f32 %v4788_v38, %v4789_v9 }
 0x624   :  { %v4784_v7 = vand.u32 4294901760, %v4783_v18  ;;  %v4791_v45 = vand.u32 4294901760, %v4790_v48 }
 0x625   :  { %16431 = vmatmul.mubr.f32.vlgmr.msra.gmra.mrb[16].mxu1 %v5314_v29 }
 0x626   :  { %18159 = vmatpush3.bf16.xpose.msra.mxu1 %v18158_v12  ;;  %16437 = vmatprep.mubr.msk.f32.mxu1 %vm19326_vm2, %v21841_v20  ;;  %v20576_v12 = vpack.c.bf16 %v4712_v14, %v4709_v46 }
 0x627   :  { %18160 = vmatprep.subr.bf16.mxu1 %v21842_v28 }
 0x62d   :  { %16438 = vmatmul.mubr.f32.vlgmr.msra.gmra.mrb[16].mxu1 %v5310_v53 }
 0x62e   :  { %18162 = vmatpush3.bf16.xpose.msra.mxu1 %v18161_v2  ;;  %16444 = vmatprep.mubr.msk.f32.mxu1 %vm19326_vm2, %v21841_v20  ;;  %v4715_v2 = vand.u32 4294901760, %v73_v57 }
 0x62f   :  { %18163 = vmatprep.subr.bf16.mxu1 %v21842_v28 }
 0x630   :  { %v4823_v59 = vsub.f32 %v73_v57, %v4715_v2  ;;  %v20597_v57 = vpack.c.bf16 %v4816_v24, %v4809_v25 }
 0x632   :  { %v4824_v51 = vand.u32 4294901760, %v4823_v59 }
 0x634   :  { %v4825_v41 = vsub.f32 %v4823_v59, %v4824_v51 }
 0x635   :  { %16445 = vmatmul.mubr.f32.vlgmr.msra.gmra.mrb[16].mxu1 %v5311_v3  ;;  %v20551_v3 = vpack.c.bf16 %v4700_v43, %v4697_v47  ;;  %v20585_v47 = vpack.c.bf16 %v4791_v45, %v4784_v7 }
 0x636   :  { %18165 = vmatpush3.bf16.xpose.msra.mxu1 %v18155_v63  ;;  %16451 = vmatprep.mubr.msk.f32.mxu1 %vm19326_vm2, %v21841_v20  ;;  %v4826_v7 = vand.u32 4294901760, %v4825_v41 }
 0x637   :  { %18166 = vmatprep.subr.bf16.mxu1 %v21842_v28  ;;  %18084 = vmatpush3.bf16.msra.mxu0 %v20551_v3 }
 0x638   :  { %18085 = vmatprep.subr.bf16.mxu0 %v21842_v28 }
 0x63d   :  { %16452 = vmatmul.mubr.f32.vlgmr.msra.gmra.mrb[16].mxu1 %v5312_v37 }
 0x63e   :  { %18168 = vmatpush3.bf16.xpose.msra.mxu1 %v18167_v40  ;;  %16458 = vmatprep.mubr.msk.f32.mxu1 %vm19326_vm2, %v21841_v20  ;;  %v4718_v40 = vand.u32 4294901760, %v74_v54 }
 0x63f   :  { %18169 = vmatprep.subr.bf16.mxu1 %v21842_v28 }
 0x640   :  { %v20580_v16 = vpack.c.bf16 %v4718_v40, %v4715_v2  ;;  %v4830_v10 = vsub.f32 %v74_v54, %v4718_v40  ;;  %v20601_v2 = vpack.c.bf16 %v4789_v9, %v4782_v39 }
 0x642   :  { %v4831_v31 = vand.u32 4294901760, %v4830_v10  ;;  %v20599_v54 = vpack.c.bf16 %v4830_v10, %v4823_v59 }
 0x644   :  { %v4832_v62 = vsub.f32 %v4830_v10, %v4831_v31 }
 0x645   :  { %16459 = vmatmul.mubr.f32.vlgmr.msra.gmra.mrb[16].mxu1 %v5310_v53 }
 0x646   :  { %18171 = vmatpush3.bf16.xpose.msra.mxu1 %v18155_v63  ;;  %16465 = vmatprep.mubr.msk.f32.mxu1 %vm19326_vm2, %v21841_v20  ;;  %v4706_v63 = vand.u32 4294901760, %v70_v4  ;;  %v4833_v45 = vand.u32 4294901760, %v4832_v62 }
 0x647   :  { %18172 = vmatprep.subr.bf16.mxu1 %v21842_v28 }
 0x648   :  { %v4802_v35 = vsub.f32 %v70_v4, %v4706_v63  ;;  %v4810_v4 = vand.u32 4294901760, %v4809_v25 }
 0x64a   :  { %v4803_v30 = vand.u32 4294901760, %v4802_v35  ;;  %v4811_v18 = vsub.f32 %v4809_v25, %v4810_v4 }
 0x64c   :  { %v4804_v17 = vsub.f32 %v4802_v35, %v4803_v30  ;;  %v4812_v49 = vand.u32 4294901760, %v4811_v18 }
 0x64d   :  { %16466 = vmatmul.mubr.f32.vlgmr.msra.gmra.mrb[16].mxu1 %v5310_v53  ;;  %v69_v53 = vld [vmem:[%s21707_s4 + $0x50] sm:$0xff] }
 0x64e   :  { %18174 = vmatpush3.bf16.msra.mxu1 %v20539_v19  ;;  %16472 = vmatprep.mubr.msk.f32.mxu1 %vm19326_vm2, %v21841_v20  ;;  %v4703_v37 = vand.u32 4294901760, %v69_v53 }
 0x64f   :  { %18175 = vmatprep.subr.bf16.mxu1 %v21842_v28 }
 0x650   :  { %v20573_v29 = vpack.c.bf16 %v4706_v63, %v4703_v37  ;;  %v4795_v60 = vsub.f32 %v69_v53, %v4703_v37  ;;  %v4805_v53 = vand.u32 4294901760, %v4804_v17  ;;  %v4817_v37 = vand.u32 4294901760, %v4816_v24 }
 0x651   :  { %v20593_v17 = vpack.c.bf16 %v4833_v45, %v4826_v7 }
 0x652   :  { %18087 = vmatpush3.bf16.msra.mxu0 %v20573_v29  ;;  %v4796_v42 = vand.u32 4294901760, %v4795_v60  ;;  %v4818_v48 = vsub.f32 %v4816_v24, %v4817_v37  ;;  %v20595_v14 = vpack.c.bf16 %v4802_v35, %v4795_v60 }
 0x653   :  { %18088 = vmatprep.subr.bf16.mxu0 %v21842_v28 }
 0x654   :  { %v4797_v36 = vsub.f32 %v4795_v60, %v4796_v42  ;;  %v4819_v21 = vand.u32 4294901760, %v4818_v48  ;;  %v20603_v40 = vpack.c.bf16 %v4803_v30, %v4796_v42 }
 0x656   :  { %18090 = vmatpush3.bf16.msra.mxu0 %v20576_v12  ;;  %v4798_v43 = vand.u32 4294901760, %v4797_v36  ;;  %v20589_v46 = vpack.c.bf16 %v4819_v21, %v4812_v49  ;;  %v20591_v36 = vpack.c.bf16 %v4788_v38, %v4781_v26  ;;  %21847 = vst [vmem:[#allocation27_spill] sm:$0xff] %v20603_v40  ;;  %v20607_v21 = vpack.c.bf16 %v4831_v31, %v4824_v51 }
 0x657   :  { %18091 = vmatprep.subr.bf16.mxu0 %v21842_v28 }
 0x658   :  { %v20587_v63 = vpack.c.bf16 %v4805_v53, %v4798_v43  ;;  %v20605_v43 = vpack.c.bf16 %v4817_v37, %v4810_v4  ;;  %21849 = vst [vmem:[#allocation29_spill] sm:$0xff] %v20607_v21  ;;  %v20673_v4 = vld [vmem:[%s21707_s4 + $0x80] sm:$0xff]  ;;  %v20678_v37 = vld [vmem:[%s21707_s4 + $0x88] sm:$0xff] }
 0x659   :  { %v21765_v48 = vand.u32 4294901760, %v20673_v4  ;;  %v21764_v41 = vand.u32 4294901760, %v20678_v37 }
 0x65a   :  { %18093 = vmatpush3.bf16.msra.mxu0 %v20580_v16  ;;  %21848 = vst [vmem:[#allocation28_spill] sm:$0xff] %v20605_v43 }
 0x65b   :  { %18094 = vmatprep.subr.bf16.mxu0 %v21842_v28  ;;  %v20686_v62 = vpack.c.bf16 %v21764_v41, %v21765_v48 }
 0x6d4   :  { %v4307_v49 = vpop.f32.mrb[22].mxu0 }
 0x6d5   :  { %v16276_v53 = vpop.f32.mrb[23].mxu0 }
 0x6ef   :  { %v4689_v26 = vpop.f32.mrb[14].mxu1 }
 0x6f0   :  { %v18903_v38 = vadd.f32 %v4689_v26, %v4307_v49  ;;  %v16311_v18 = vpop.f32.mrb[15].mxu1 }
 0x6f2   :  { %v4694_v60 = vsel %vm2257_vm3, %v18903_v38, 0 }
 0x6f3   :  { %v4769_v35 = vand.u32 4294901760, %v4694_v60 }
 0x6f5   :  { %v4770_v25 = vsub.f32 %v4694_v60, %v4769_v35 }
 0x6f7   :  { %v4771_v24 = vand.u32 4294901760, %v4770_v25 }
 0x6f9   :  { %v4772_v10 = vsub.f32 %v4770_v25, %v4771_v24 }
 0x6fb   :  { %v4773_v59 = vand.u32 4294901760, %v4772_v10 }
 0x6fd   :  { %16329 = vmatmul.mubr.f32.vlgmr.msra.gmra.mrb[20].mxu0 %v4773_v59 }
 0x6fe   :  { %18096 = vmatpush3.bf16.msra.mxu0 %v20585_v47  ;;  %16347 = vmatprep.mubr.msk.f32.mxu0 %vm19326_vm2, %v21841_v20 }
 0x6ff   :  { %18097 = vmatprep.subr.bf16.mxu0 %v21842_v28 }
 0x702   :  { %18099 = vmatpush3.bf16.msra.mxu0 %v20587_v63 }
 0x703   :  { %18100 = vmatprep.subr.bf16.mxu0 %v21842_v28 }
 0x706   :  { %18102 = vmatpush3.bf16.msra.mxu0 %v20589_v46 }
 0x707   :  { %18103 = vmatprep.subr.bf16.mxu0 %v21842_v28 }
 0x70a   :  { %18105 = vmatpush3.bf16.msra.mxu0 %v20593_v17 }
 0x70b   :  { %18106 = vmatprep.subr.bf16.mxu0 %v21842_v28 }
 0x70d   :  { %16348 = vmatmul.mubr.f32.vlgmr.msra.gmra.mrb[20].mxu0 %v4769_v35 }
 0x70e   :  { %18108 = vmatpush3.bf16.msra.mxu0 %v20591_v36  ;;  %16366 = vmatprep.mubr.msk.f32.mxu0 %vm19326_vm2, %v21841_v20 }
 0x70f   :  { %18109 = vmatprep.subr.bf16.mxu0 %v21842_v28 }
 0x712   :  { %18111 = vmatpush3.bf16.msra.mxu0 %v20595_v14 }
 0x713   :  { %18112 = vmatprep.subr.bf16.mxu0 %v21842_v28 }
 0x716   :  { %18114 = vmatpush3.bf16.msra.mxu0 %v20597_v57 }
 0x717   :  { %18115 = vmatprep.subr.bf16.mxu0 %v21842_v28 }
 0x71a   :  { %18117 = vmatpush3.bf16.msra.mxu0 %v20599_v54 }
 0x71b   :  { %18118 = vmatprep.subr.bf16.mxu0 %v21842_v28 }
 0x71d   :  { %16367 = vmatmul.mubr.f32.vlgmr.msra.gmra.mrb[20].mxu0 %v4770_v25 }
 0x71e   :  { %18120 = vmatpush3.bf16.msra.mxu0 %v20551_v3  ;;  %16385 = vmatprep.mubr.msk.f32.mxu0 %vm19326_vm2, %v21841_v20 }
 0x71f   :  { %18121 = vmatprep.subr.bf16.mxu0 %v21842_v28 }
 0x720   :  { %v5698_v31 = vpop.f32.mrb[16].mxu1 }
 0x721   :  { %v16467_v51 = vpop.f32.mrb[17].mxu1  ;;  %v5702_v30 = vsel %vm2726_vm4, %v5698_v31, -inf }
 0x722   :  { %18123 = vmatpush3.bf16.msra.mxu0 %v20573_v29  ;;  %5703 = vmax.xlane.f32.xlu1 %v5702_v30 }
 0x723   :  { %18124 = vmatprep.subr.bf16.mxu0 %v21842_v28 }
 0x726   :  { %18126 = vmatpush3.bf16.msra.mxu0 %v20576_v12 }
 0x727   :  { %18127 = vmatprep.subr.bf16.mxu0 %v21842_v28 }
 0x72a   :  { %18129 = vmatpush3.bf16.msra.mxu0 %v20580_v16 }
 0x72b   :  { %18130 = vmatprep.subr.bf16.mxu0 %v21842_v28 }
 0x72d   :  { %16386 = vmatmul.mubr.f32.vlgmr.msra.gmra.mrb[20].mxu0 %v4771_v24 }
 0x72e   :  { %18132 = vmatpush3.bf16.msra.mxu0 %v20601_v2  ;;  %16404 = vmatprep.mubr.msk.f32.mxu0 %vm19326_vm2, %v21841_v20 }
 0x72f   :  { %18133 = vmatprep.subr.bf16.mxu0 %v21842_v28 }
 0x732   :  { %18135 = vmatpush3.bf16.msra.mxu0 %v20603_v40 }
 0x733   :  { %6718 = vrot.lane.b32.xlu1 %v19838_v50, %s19327_s23  ;;  %18136 = vmatprep.subr.bf16.mxu0 %v21842_v28 }
 0x736   :  { %18138 = vmatpush3.bf16.msra.mxu0 %v20605_v43 }
 0x737   :  { %6716 = vrot.lane.b32.xlu1 %v20503_v23, %s19327_s23  ;;  %18139 = vmatprep.subr.bf16.mxu0 %v21842_v28 }
 0x73a   :  { %18141 = vmatpush3.bf16.msra.mxu0 %v20607_v21 }
 0x73b   :  { %18142 = vmatprep.subr.bf16.mxu0 %v21842_v28 }
 0x73d   :  { %16405 = vmatmul.mubr.f32.vlgmr.msra.gmra.mrb[20].mxu0 %v4769_v35 }
 0x73e   :  { %18144 = vmatpush3.bf16.msra.mxu0 %v20551_v3  ;;  %16423 = vmatprep.mubr.msk.f32.mxu0 %vm19326_vm2, %v21841_v20 }
 0x73f   :  { %18145 = vmatprep.subr.bf16.mxu0 %v21842_v28 }
 0x742   :  { %18147 = vmatpush3.bf16.msra.mxu0 %v20573_v29 }
 0x743   :  { %18148 = vmatprep.subr.bf16.mxu0 %v21842_v28 }
 0x746   :  { %18150 = vmatpush3.bf16.msra.mxu0 %v20576_v12 }
 0x747   :  { %18151 = vmatprep.subr.bf16.mxu0 %v21842_v28 }
 0x74a   :  { %18153 = vmatpush3.bf16.msra.mxu0 %v20580_v16 }
 0x74b   :  { %18190 = vmatprep.subr.bf16.mxu0 %v21842_v28 }
 0x74d   :  { %16424 = vmatmul.mubr.f32.vlgmr.msra.gmra.mrb[20].mxu0 %v4769_v35  ;;  %v21850_v35 = vpack.c.bf16 %v20239_v5, %v20234_v58 }
 0x74e   :  { %16526 = vmatprep.mubr.msk.f32.mxu0 %vm19326_vm2, %v21841_v20  ;;  %18192 = vmatpush3.bf16.msra.mxu0 %v20686_v62 }
 0x74f   :  { %18193 = vmatprep.subr.bf16.mxu0 %v21842_v28 }
 0x7af   :  { %v5704_v50 = vpop.xlane.xlu1 %5703 }
 0x7b0   :  { %v5705_v9 = vsub.f32 %v5698_v31, %v5704_v50 }
 0x7b2   :  { %v5706_v39 = vmul.f32 1.442695, %v5705_v9 }
 0x7b4   :  { %19262 = vpow2.f32 %v5706_v39 }
 0x7be   :  { %v19263_v42 = vpop.eup %19262 }
 0x7bf   :  { %v5708_v23 = vsel %vm2726_vm4, %v19263_v42, 0.0 }
 0x7c0   :  { %5709 = vadd.xlane.f32.xlu0 %v5708_v23 }
 0x7d6   :  { %6720 = vrot.lane.b32.xlu0 %v19859_v0, %s19327_s23 }
 0x84d   :  { %v5710_v0 = vpop.xlane.xlu0 %5709 }
 0x84e   :  { %19264 = vrcp.f32 %v5710_v0 }
 0x851   :  { %v6721_v25 = vpop.permute.xlu0 %6720 }
 0x852   :  { %v6726_v58 = vsel %vm2257_vm3, %v6721_v25, 0 }
 0x853   :  { %v6732_v59 = vand.u32 4294901760, %v6726_v58 }
 0x855   :  { %v6814_v30 = vsub.f32 %v6726_v58, %v6732_v59  ;;  %v80_v58 = vld [vmem:[%s21707_s4 + $0xa8] sm:$0xff] }
 0x857   :  { %v6815_v9 = vand.u32 4294901760, %v6814_v30 }
 0x858   :  { %v19265_v7 = vpop.eup %19264 }
 0x859   :  { %v5712_v45 = vmul.f32 %v19265_v7, %v19263_v42  ;;  %v6816_v0 = vsub.f32 %v6814_v30, %v6815_v9 }
 0x85b   :  { %v5714_v49 = vsel %vm2726_vm4, %v5712_v45, 0 }
 0x85c   :  { %v5783_v53 = vand.u32 4294901760, %v5714_v49 }
 0x85e   :  { %v5784_v26 = vsub.f32 %v5714_v49, %v5783_v53 }
 0x860   :  { %v5785_v38 = vand.u32 4294901760, %v5784_v26 }
 0x862   :  { %v5786_v18 = vsub.f32 %v5784_v26, %v5785_v38 }
 0x864   :  { %v5787_v60 = vand.u32 4294901760, %v5786_v18 }
 0x866   :  { %16473 = vmatmul.mubr.f32.vlgmr.msra.gmra.mrb[18].mxu1 %v5787_v60  ;;  %v77_v60 = vld [vmem:[%s21707_s4 + $0x90] sm:$0xff] }
 0x867   :  { %18177 = vmatpush3.bf16.msra.mxu1 %v20278_v6  ;;  %16479 = vmatprep.mubr.msk.f32.mxu1 %vm19326_vm2, %v21841_v20  ;;  %v6719_v6 = vpop.permute.xlu1 %6718  ;;  %v6185_v25 = vand.u32 4294901760, %v77_v60 }
 0x868   :  { %18178 = vmatprep.subr.bf16.mxu1 %v21842_v28  ;;  %v6724_v5 = vsel %vm2257_vm3, %v6719_v6, 0  ;;  %v79_v6 = vld [vmem:[%s21707_s4 + $0xa0] sm:$0xff] }
 0x869   :  { %v6729_v31 = vand.u32 4294901760, %v6724_v5 }
 0x86b   :  { %v6717_v24 = vpop.permute.xlu1 %6716  ;;  %v18263_v23 = vpack.c.bf16 %v6732_v59, %v6729_v31  ;;  %v81_v59 = vld [vmem:[%s21707_s4 + $0xb0] sm:$0xff] }
 0x86c   :  { %v6722_v10 = vsel %vm2257_vm3, %v6717_v24, 0 }
 0x86d   :  { %v6795_v51 = vand.u32 4294901760, %v6722_v10 }
 0x86e   :  { %16480 = vmatmul.mubr.f32.vlgmr.msra.gmra.mrb[18].mxu1 %v5783_v53 }
 0x86f   :  { %18180 = vmatpush3.bf16.msra.mxu1 %v21850_v35  ;;  %16486 = vmatprep.mubr.msk.f32.mxu1 %vm19326_vm2, %v21841_v20  ;;  %v6796_v50 = vsub.f32 %v6722_v10, %v6795_v51  ;;  %v78_v35 = vld [vmem:[%s21707_s4 + $0x98] sm:$0xff]  ;;  %v6194_v10 = vand.u32 4294901760, %v80_v58 }
 0x870   :  { %18181 = vmatprep.subr.bf16.mxu1 %v21842_v28  ;;  %v6188_v24 = vand.u32 4294901760, %v78_v35 }
 0x871   :  { %v6797_v42 = vand.u32 4294901760, %v6796_v50 }
 0x873   :  { %v6798_v45 = vsub.f32 %v6796_v50, %v6797_v42 }
 0x876   :  { %16487 = vmatmul.mubr.f32.vlgmr.msra.gmra.mrb[18].mxu1 %v5784_v26  ;;  %v6799_v26 = vand.u32 4294901760, %v6798_v45  ;;  %v6298_v45 = vsub.f32 %v80_v58, %v6194_v10 }
 0x877   :  { %18183 = vmatpush3.bf16.msra.mxu1 %v20539_v19  ;;  %16493 = vmatprep.mubr.msk.f32.mxu1 %vm19326_vm2, %v21841_v20 }
 0x878   :  { %18184 = vmatprep.subr.bf16.mxu1 %v21842_v28 }
 0x87e   :  { %16494 = vmatmul.mubr.f32.vlgmr.msra.gmra.mrb[18].mxu1 %v5785_v38 }
 0x87f   :  { %18186 = vmatpush3.bf16.msra.mxu1 %v20274_v55  ;;  %16500 = vmatprep.mubr.msk.f32.mxu1 %vm19326_vm2, %v21841_v20  ;;  %v6807_v55 = vsub.f32 %v6724_v5, %v6729_v31  ;;  %v6191_v5 = vand.u32 4294901760, %v79_v6  ;;  %v82_v31 = vld [vmem:[%s21707_s4 + $0xb8] sm:$0xff] }
 0x880   :  { %18187 = vmatprep.subr.bf16.mxu1 %v21842_v28 }
 0x881   :  { %v6808_v39 = vand.u32 4294901760, %v6807_v55 }
 0x883   :  { %v6809_v7 = vsub.f32 %v6807_v55, %v6808_v39  ;;  %v18275_v18 = vpack.c.bf16 %v6815_v9, %v6808_v39  ;;  %v6200_v9 = vand.u32 4294901760, %v82_v31  ;;  %v6284_v39 = vsub.f32 %v78_v35, %v6188_v24 }
 0x885   :  { %v6810_v49 = vand.u32 4294901760, %v6809_v7  ;;  %v6291_v7 = vsub.f32 %v79_v6, %v6191_v5 }
 0x886   :  { %16501 = vmatmul.mubr.f32.vlgmr.msra.gmra.mrb[18].mxu1 %v5783_v53 }
 0x887   :  { %18189 = vmatpush3.bf16.msra.mxu1 %v20539_v19  ;;  %16507 = vmatprep.mubr.msk.f32.mxu1 %vm19326_vm2, %v21841_v20  ;;  %v6817_v19 = vand.u32 4294901760, %v6816_v0 }
 0x888   :  { %18262 = vmatprep.subr.bf16.mxu1 %v21842_v28 }
 0x889   :  { %v18266_v38 = vpack.c.bf16 %v6817_v19, %v6810_v49 }
 0x88e   :  { %16508 = vmatmul.mubr.f32.vlgmr.msra.gmra.mrb[18].mxu1 %v5783_v53  ;;  %v18269_v53 = vpack.c.bf16 %v6814_v30, %v6807_v55  ;;  %v6277_v30 = vsub.f32 %v77_v60, %v6185_v25  ;;  %v20757_v55 = vpack.c.bf16 %v6194_v10, %v6191_v5 }
 0x88f   :  { %16628 = vmatprep.mubr.msk.f32.mxu1 %vm19326_vm2, %v21841_v20 }
 0x890   :  { %18264 = vmatpush3.bf16.xpose.msra.mxu1 %v18263_v23  ;;  %21851 = vst [vmem:[#allocation30_spill] sm:$0xff] %v20757_v55 }
 0x891   :  { %18265 = vmatprep.subr.bf16.mxu1 %v21842_v28 }
 0x897   :  { %16629 = vmatmul.mubr.f32.vlgmr.msra.gmra.mrb[20].mxu1 %v6799_v26 }
 0x898   :  { %18267 = vmatpush3.bf16.xpose.msra.mxu1 %v18266_v38  ;;  %16635 = vmatprep.mubr.msk.f32.mxu1 %vm19326_vm2, %v21841_v20  ;;  %v6292_v38 = vand.u32 4294901760, %v6291_v7 }
 0x899   :  { %18268 = vmatprep.subr.bf16.mxu1 %v21842_v28 }
 0x89a   :  { %v6293_v60 = vsub.f32 %v6291_v7, %v6292_v38 }
 0x89c   :  { %v6294_v6 = vand.u32 4294901760, %v6293_v60  ;;  %v21862_v60 = vand.u32 4294901760, %v20673_v4 }
 0x89f   :  { %16636 = vmatmul.mubr.f32.vlgmr.msra.gmra.mrb[20].mxu1 %v6795_v51 }
 0x8a0   :  { %18270 = vmatpush3.bf16.xpose.msra.mxu1 %v18269_v53  ;;  %16642 = vmatprep.mubr.msk.f32.mxu1 %vm19326_vm2, %v21841_v20  ;;  %v6299_v53 = vand.u32 4294901760, %v6298_v45 }
 0x8a1   :  { %18271 = vmatprep.subr.bf16.mxu1 %v21842_v28 }
 0x8a2   :  { %v6300_v35 = vsub.f32 %v6298_v45, %v6299_v53 }
 0x8a4   :  { %v6301_v58 = vand.u32 4294901760, %v6300_v35  ;;  %v6263_v35 = vsub.f32 %v20673_v4, %v21862_v60 }
 0x8a6   :  { %v20768_v48 = vpack.c.bf16 %v6301_v58, %v6294_v6 }
 0x8a7   :  { %16643 = vmatmul.mubr.f32.vlgmr.msra.gmra.mrb[20].mxu1 %v6796_v50  ;;  %v6197_v50 = vand.u32 4294901760, %v81_v59 }
 0x8a8   :  { %18273 = vmatpush3.bf16.xpose.msra.mxu1 %v18263_v23  ;;  %16649 = vmatprep.mubr.msk.f32.mxu1 %vm19326_vm2, %v21841_v20  ;;  %21854 = vst [vmem:[#allocation33_spill] sm:$0xff] %v20768_v48 }
 0x8a9   :  { %18274 = vmatprep.subr.bf16.mxu1 %v21842_v28  ;;  %v20761_v19 = vpack.c.bf16 %v6200_v9, %v6197_v50 }
 0x8ab   :  { %21852 = vst [vmem:[#allocation31_spill] sm:$0xff] %v20761_v19 }
 0x8af   :  { %16650 = vmatmul.mubr.f32.vlgmr.msra.gmra.mrb[20].mxu1 %v6797_v42  ;;  %v6278_v42 = vand.u32 4294901760, %v6277_v30 }
 0x8b0   :  { %18276 = vmatpush3.bf16.xpose.msra.mxu1 %v18275_v18  ;;  %16656 = vmatprep.mubr.msk.f32.mxu1 %vm19326_vm2, %v21841_v20 }
 0x8b1   :  { %18277 = vmatprep.subr.bf16.mxu1 %v21842_v28  ;;  %v6279_v0 = vsub.f32 %v6277_v30, %v6278_v42 }
 0x8b3   :  { %v6280_v26 = vand.u32 4294901760, %v6279_v0 }
 0x8b7   :  { %16657 = vmatmul.mubr.f32.vlgmr.msra.gmra.mrb[20].mxu1 %v6795_v51 }
 0x8b8   :  { %18279 = vmatpush3.bf16.xpose.msra.mxu1 %v18263_v23  ;;  %16663 = vmatprep.mubr.msk.f32.mxu1 %vm19326_vm2, %v21841_v20  ;;  %v6285_v23 = vand.u32 4294901760, %v6284_v39 }
 0x8b9   :  { %18280 = vmatprep.subr.bf16.mxu1 %v21842_v28 }
 0x8ba   :  { %v6286_v49 = vsub.f32 %v6284_v39, %v6285_v23 }
 0x8bc   :  { %v6287_v18 = vand.u32 4294901760, %v6286_v49 }
 0x8be   :  { %v20765_v41 = vpack.c.bf16 %v6287_v18, %v6280_v26  ;;  %v20780_v26 = vpack.c.bf16 %v6299_v53, %v6292_v38 }
 0x8bf   :  { %16664 = vmatmul.mubr.f32.vlgmr.msra.gmra.mrb[20].mxu1 %v6795_v51  ;;  %v20754_v51 = vpack.c.bf16 %v6188_v24, %v6185_v25  ;;  %v6305_v25 = vsub.f32 %v81_v59, %v6197_v50  ;;  %v6312_v24 = vsub.f32 %v82_v31, %v6200_v9  ;;  %v20772_v59 = vpack.c.bf16 %v6284_v39, %v6277_v30 }
 0x8c0   :  { %16670 = vmatprep.mubr.msk.f32.mxu1 %vm19326_vm2, %v21841_v20  ;;  %21853 = vst [vmem:[#allocation32_spill] sm:$0xff] %v20765_v41  ;;  %v20774_v31 = vpack.c.bf16 %v6298_v45, %v6291_v7  ;;  %v20778_v9 = vpack.c.bf16 %v6285_v23, %v6278_v42  ;;  %21860 = vst [vmem:[#allocation39_spill] sm:$0xff] %v20780_v26  ;;  %v6264_v30 = vand.u32 4294901760, %v6263_v35 }
 0x8c1   :  { %18195 = vmatpush3.bf16.msra.mxu0 %v20754_v51  ;;  %v6306_v5 = vand.u32 4294901760, %v6305_v25  ;;  %v6313_v10 = vand.u32 4294901760, %v6312_v24  ;;  %21856 = vst [vmem:[#allocation35_spill] sm:$0xff] %v20772_v59  ;;  %v20776_v50 = vpack.c.bf16 %v6312_v24, %v6305_v25 }
 0x8c2   :  { %18196 = vmatprep.subr.bf16.mxu0 %v21842_v28  ;;  %21857 = vst [vmem:[#allocation36_spill] sm:$0xff] %v20774_v31  ;;  %21859 = vst [vmem:[#allocation38_spill] sm:$0xff] %v20778_v9  ;;  %v6265_v42 = vsub.f32 %v6263_v35, %v6264_v30 }
 0x8c3   :  { %v6307_v0 = vsub.f32 %v6305_v25, %v6306_v5  ;;  %v6314_v21 = vsub.f32 %v6312_v24, %v6313_v10  ;;  %21858 = vst [vmem:[#allocation37_spill] sm:$0xff] %v20776_v50  ;;  %v20782_v18 = vpack.c.bf16 %v6313_v10, %v6306_v5 }
 0x8c4   :  { %v6266_v24 = vand.u32 4294901760, %v6265_v42 }
 0x8c5   :  { %18198 = vmatpush3.bf16.msra.mxu0 %v20757_v55  ;;  %v6308_v43 = vand.u32 4294901760, %v6307_v0  ;;  %v6315_v49 = vand.u32 4294901760, %v6314_v21  ;;  %21861 = vst [vmem:[#allocation40_spill] sm:$0xff] %v20782_v18  ;;  %v21863_v21 = vand.u32 4294901760, %v20678_v37 }
 0x8c6   :  { %18199 = vmatprep.subr.bf16.mxu0 %v21842_v28 }
 0x8c7   :  { %v20770_v40 = vpack.c.bf16 %v6315_v49, %v6308_v43  ;;  %v6270_v43 = vsub.f32 %v20678_v37, %v21863_v21 }
 0x8c9   :  { %18201 = vmatpush3.bf16.msra.mxu0 %v20761_v19  ;;  %21855 = vst [vmem:[#allocation34_spill] sm:$0xff] %v20770_v40  ;;  %v6271_v39 = vand.u32 4294901760, %v6270_v43  ;;  %v20805_v37 = vpack.c.bf16 %v6270_v43, %v6263_v35 }
 0x8ca   :  { %18202 = vmatprep.subr.bf16.mxu0 %v21842_v28 }
 0x8cb   :  { %v6272_v23 = vsub.f32 %v6270_v43, %v6271_v39  ;;  %21865 = vst [vmem:[#allocation42_spill] sm:$0xff] %v20805_v37  ;;  %v20829_v35 = vpack.c.bf16 %v6271_v39, %v6264_v30 }
 0x8cd   :  { %v6273_v6 = vand.u32 4294901760, %v6272_v23  ;;  %21866 = vst [vmem:[#allocation43_spill] sm:$0xff] %v20829_v35 }
 0x8cf   :  { %v20794_v5 = vpack.c.bf16 %v6273_v6, %v6266_v24 }
 0x8d1   :  { %21864 = vst [vmem:[#allocation41_spill] sm:$0xff] %v20794_v5 }
 0x961   :  { %v6171_v7 = vpop.f32.mrb[18].mxu1 }
 0x962   :  { %v6176_v45 = vsel %vm2257_vm3, %v6171_v7, 0  ;;  %v16509_v25 = vpop.f32.mrb[19].mxu1  ;;  %v20870_v7 = vld [vmem:[%s21707_s4 + $0xc0] sm:$0xff] }
 0x963   :  { %v20791_v38 = vand.u32 4294901760, %v6176_v45  ;;  %v21770_v25 = vand.u32 4294901760, %v20870_v7 }
 0x965   :  { %v6252_v53 = vsub.f32 %v6176_v45, %v20791_v38  ;;  %v20875_v45 = vld [vmem:[%s21707_s4 + $0xc8] sm:$0xff] }
 0x966   :  { %v21769_v42 = vand.u32 4294901760, %v20875_v45 }
 0x967   :  { %v6253_v58 = vand.u32 4294901760, %v6252_v53 }
 0x968   :  { %v20883_v23 = vpack.c.bf16 %v21769_v42, %v21770_v25 }
 0x969   :  { %v6254_v4 = vsub.f32 %v6252_v53, %v6253_v58 }
 0x96b   :  { %v6255_v10 = vand.u32 4294901760, %v6254_v4 }
 0x96d   :  { %16527 = vmatmul.mubr.f32.vlgmr.msra.gmra.mrb[20].mxu0 %v6255_v10 }
 0x96e   :  { %18204 = vmatpush3.bf16.msra.mxu0 %v20794_v5  ;;  %16545 = vmatprep.mubr.msk.f32.mxu0 %vm19326_vm2, %v21841_v20 }
 0x96f   :  { %18205 = vmatprep.subr.bf16.mxu0 %v21842_v28 }
 0x972   :  { %18207 = vmatpush3.bf16.msra.mxu0 %v20765_v41 }
 0x973   :  { %18208 = vmatprep.subr.bf16.mxu0 %v21842_v28 }
 0x976   :  { %18210 = vmatpush3.bf16.msra.mxu0 %v20768_v48 }
 0x977   :  { %18211 = vmatprep.subr.bf16.mxu0 %v21842_v28 }
 0x97a   :  { %18213 = vmatpush3.bf16.msra.mxu0 %v20770_v40 }
 0x97b   :  { %18214 = vmatprep.subr.bf16.mxu0 %v21842_v28 }
 0x97d   :  { %16546 = vmatmul.mubr.f32.vlgmr.msra.gmra.mrb[20].mxu0 %v20791_v38 }
 0x97e   :  { %18216 = vmatpush3.bf16.msra.mxu0 %v20805_v37  ;;  %16564 = vmatprep.mubr.msk.f32.mxu0 %vm19326_vm2, %v21841_v20 }
 0x97f   :  { %18217 = vmatprep.subr.bf16.mxu0 %v21842_v28 }
 0x982   :  { %18219 = vmatpush3.bf16.msra.mxu0 %v20772_v59 }
 0x983   :  { %18220 = vmatprep.subr.bf16.mxu0 %v21842_v28 }
 0x986   :  { %18222 = vmatpush3.bf16.msra.mxu0 %v20774_v31 }
 0x987   :  { %18223 = vmatprep.subr.bf16.mxu0 %v21842_v28 }
 0x98a   :  { %18225 = vmatpush3.bf16.msra.mxu0 %v20776_v50 }
 0x98b   :  { %18226 = vmatprep.subr.bf16.mxu0 %v21842_v28 }
 0x98d   :  { %16565 = vmatmul.mubr.f32.vlgmr.msra.gmra.mrb[20].mxu0 %v6252_v53 }
 0x98e   :  { %18228 = vmatpush3.bf16.msra.mxu0 %v20686_v62  ;;  %16583 = vmatprep.mubr.msk.f32.mxu0 %vm19326_vm2, %v21841_v20 }
 0x98f   :  { %18229 = vmatprep.subr.bf16.mxu0 %v21842_v28 }
 0x992   :  { %18231 = vmatpush3.bf16.msra.mxu0 %v20754_v51  ;;  %v7183_v0 = vpop.f32.mrb[20].mxu1 }
 0x993   :  { %v16665_v49 = vpop.f32.mrb[21].mxu1  ;;  %v7187_v60 = vsel %vm2726_vm4, %v7183_v0, -inf  ;;  %18232 = vmatprep.subr.bf16.mxu0 %v21842_v28 }
 0x994   :  { %7188 = vmax.xlane.f32.xlu1 %v7187_v60 }
 0x996   :  { %18234 = vmatpush3.bf16.msra.mxu0 %v20757_v55 }
 0x997   :  { %18235 = vmatprep.subr.bf16.mxu0 %v21842_v28 }
 0x99a   :  { %18237 = vmatpush3.bf16.msra.mxu0 %v20761_v19 }
 0x99b   :  { %18238 = vmatprep.subr.bf16.mxu0 %v21842_v28 }
 0x99d   :  { %16584 = vmatmul.mubr.f32.vlgmr.msra.gmra.mrb[20].mxu0 %v6253_v58 }
 0x99e   :  { %18240 = vmatpush3.bf16.msra.mxu0 %v20829_v35  ;;  %16602 = vmatprep.mubr.msk.f32.mxu0 %vm19326_vm2, %v21841_v20 }
 0x99f   :  { %18241 = vmatprep.subr.bf16.mxu0 %v21842_v28 }
 0x9a2   :  { %18243 = vmatpush3.bf16.msra.mxu0 %v20778_v9 }
 0x9a3   :  { %18244 = vmatprep.subr.bf16.mxu0 %v21842_v28 }
 0x9a5   :  { %7200 = vrot.lane.b32.xlu1 %v20193_v44, %s19327_s23 }
 0x9a6   :  { %18246 = vmatpush3.bf16.msra.mxu0 %v20780_v26 }
 0x9a7   :  { %18247 = vmatprep.subr.bf16.mxu0 %v21842_v28 }
 0x9a9   :  { %10237 = vrot.lane.b32.xlu1 %v19867_v1, %s19327_s23 }
 0x9aa   :  { %18249 = vmatpush3.bf16.msra.mxu0 %v20782_v18 }
 0x9ab   :  { %18250 = vmatprep.subr.bf16.mxu0 %v21842_v28 }
 0x9ad   :  { %16603 = vmatmul.mubr.f32.vlgmr.msra.gmra.mrb[20].mxu0 %v20791_v38  ;;  %10239 = vrot.lane.b32.xlu1 %v19884_v33, %s19327_s23 }
 0x9ae   :  { %18252 = vmatpush3.bf16.msra.mxu0 %v20686_v62  ;;  %16621 = vmatprep.mubr.msk.f32.mxu0 %vm19326_vm2, %v21841_v20 }
 0x9af   :  { %18253 = vmatprep.subr.bf16.mxu0 %v21842_v28 }
 0x9b1   :  { %10235 = vrot.lane.b32.xlu1 %v19822_v8, %s19327_s23 }
 0x9b2   :  { %18255 = vmatpush3.bf16.msra.mxu0 %v20754_v51 }
 0x9b3   :  { %18256 = vmatprep.subr.bf16.mxu0 %v21842_v28 }
 0x9b6   :  { %18258 = vmatpush3.bf16.msra.mxu0 %v20757_v55 }
 0x9b7   :  { %18259 = vmatprep.subr.bf16.mxu0 %v21842_v28 }
 0x9ba   :  { %18261 = vmatpush3.bf16.msra.mxu0 %v20761_v19 }
 0x9bb   :  { %18298 = vmatprep.subr.bf16.mxu0 %v21842_v28 }
 0x9bd   :  { %16622 = vmatmul.mubr.f32.vlgmr.msra.gmra.mrb[20].mxu0 %v20791_v38 }
 0x9be   :  { %16724 = vmatprep.mubr.msk.f32.mxu0 %vm19326_vm2, %v21841_v20  ;;  %18300 = vmatpush3.bf16.msra.mxu0 %v20883_v23 }
 0x9bf   :  { %18301 = vmatprep.subr.bf16.mxu0 %v21842_v28 }
 0xa21   :  { %v7189_v44 = vpop.xlane.xlu1 %7188 }
 0xa22   :  { %v7190_v21 = vsub.f32 %v7183_v0, %v7189_v44 }
 0xa24   :  { %v7191_v43 = vmul.f32 1.442695, %v7190_v21 }
 0xa25   :  { %v7201_v38 = vpop.permute.xlu1 %7200 }
 0xa26   :  { %19266 = vpow2.f32 %v7191_v43  ;;  %v7210_v24 = vand.u32 4294901760, %v7201_v38 }
 0xa28   :  { %v7288_v10 = vsub.f32 %v7201_v38, %v7210_v24  ;;  %v88_v38 = vld [vmem:[%s21707_s4 + $0xe8] sm:$0xff] }
 0xa2a   :  { %v7289_v44 = vand.u32 4294901760, %v7288_v10 }
 0xa30   :  { %v19267_v30 = vpop.eup %19266 }
 0xa31   :  { %v7193_v39 = vsel %vm2726_vm4, %v19267_v30, 0.0 }
 0xa32   :  { %7194 = vadd.xlane.f32.xlu0 %v7193_v39 }
 0xa48   :  { %7202 = vrot.lane.b32.xlu0 %v20197_v56, %s19327_s23 }
 0xabf   :  { %v7195_v56 = vpop.xlane.xlu0 %7194 }
 0xac0   :  { %19268 = vrcp.f32 %v7195_v56  ;;  %v7290_v56 = vsub.f32 %v7288_v10, %v7289_v44 }
 0xac2   :  { %v7291_v9 = vand.u32 4294901760, %v7290_v56 }
 0xac3   :  { %v7203_v53 = vpop.permute.xlu0 %7202 }
 0xac4   :  { %v7213_v6 = vand.u32 4294901760, %v7203_v53 }
 0xac6   :  { %v18281_v58 = vpack.c.bf16 %v7213_v6, %v7210_v24  ;;  %v7295_v4 = vsub.f32 %v7203_v53, %v7213_v6  ;;  %v7687_v6 = vand.u32 4294901760, %v88_v38 }
 0xac8   :  { %18282 = vmatpush3.bf16.msra.mxu1 %v18281_v58  ;;  %v7296_v60 = vand.u32 4294901760, %v7295_v4 }
 0xac9   :  { %18283 = vmatprep.subr.bf16.mxu1 %v21842_v28 }
 0xaca   :  { %v19269_v0 = vpop.eup %19268  ;;  %v7297_v39 = vsub.f32 %v7295_v4, %v7296_v60 }
 0xacb   :  { %v7197_v49 = vmul.f32 %v19269_v0, %v19267_v30  ;;  %v18287_v30 = vpack.c.bf16 %v7295_v4, %v7288_v10  ;;  %v90_v4 = vld [vmem:[%s21707_s4 + $0xf8] sm:$0xff] }
 0xacc   :  { %v7298_v18 = vand.u32 4294901760, %v7297_v39 }
 0xacd   :  { %v7207_v21 = vsel %vm2726_vm4, %v7197_v49, 0 }
 0xace   :  { %v7276_v43 = vand.u32 4294901760, %v7207_v21  ;;  %v18284_v53 = vpack.c.bf16 %v7298_v18, %v7291_v9  ;;  %v18293_v9 = vpack.c.bf16 %v7296_v60, %v7289_v44  ;;  %v86_v18 = vld [vmem:[%s21707_s4 + $0xd8] sm:$0xff]  ;;  %v7693_v44 = vand.u32 4294901760, %v90_v4 }
 0xad0   :  { %v7277_v42 = vsub.f32 %v7207_v21, %v7276_v43  ;;  %v7805_v40 = vsub.f32 %v90_v4, %v7693_v44 }
 0xad2   :  { %v7278_v25 = vand.u32 4294901760, %v7277_v42 }
 0xad4   :  { %v7279_v26 = vsub.f32 %v7277_v42, %v7278_v25 }
 0xad6   :  { %v7280_v35 = vand.u32 4294901760, %v7279_v26  ;;  %v85_v26 = vld [vmem:[%s21707_s4 + $0xd0] sm:$0xff] }
 0xad8   :  { %16671 = vmatmul.mubr.f32.vlgmr.msra.gmra.mrb[22].mxu1 %v7280_v35  ;;  %v87_v35 = vld [vmem:[%s21707_s4 + $0xe0] sm:$0xff] }
 0xad9   :  { %18285 = vmatpush3.bf16.msra.mxu1 %v18284_v53  ;;  %16677 = vmatprep.mubr.msk.f32.mxu1 %vm19326_vm2, %v21841_v20  ;;  %v7684_v24 = vand.u32 4294901760, %v87_v35 }
 0xada   :  { %18286 = vmatprep.subr.bf16.mxu1 %v21842_v28 }
 0xadb   :  { %v20927_v49 = vpack.c.bf16 %v7687_v6, %v7684_v24  ;;  %v7784_v53 = vsub.f32 %v87_v35, %v7684_v24 }
 0xae0   :  { %16678 = vmatmul.mubr.f32.vlgmr.msra.gmra.mrb[22].mxu1 %v7276_v43 }
 0xae1   :  { %18288 = vmatpush3.bf16.msra.mxu1 %v18287_v30  ;;  %16684 = vmatprep.mubr.msk.f32.mxu1 %vm19326_vm2, %v21841_v20  ;;  %v7791_v30 = vsub.f32 %v88_v38, %v7687_v6  ;;  %v7806_v6 = vand.u32 4294901760, %v7805_v40 }
 0xae2   :  { %18289 = vmatprep.subr.bf16.mxu1 %v21842_v28 }
 0xae3   :  { %v7792_v31 = vand.u32 4294901760, %v7791_v30  ;;  %v7807_v5 = vsub.f32 %v7805_v40, %v7806_v6  ;;  %v20944_v4 = vpack.c.bf16 %v7791_v30, %v7784_v53 }
 0xae5   :  { %21871 = vst [vmem:[#allocation48_spill] sm:$0xff] %v20944_v4 }
 0xae8   :  { %16685 = vmatmul.mubr.f32.vlgmr.msra.gmra.mrb[22].mxu1 %v7277_v42  ;;  %v7681_v42 = vand.u32 4294901760, %v86_v18 }
 0xae9   :  { %18291 = vmatpush3.bf16.msra.mxu1 %v18281_v58  ;;  %16691 = vmatprep.mubr.msk.f32.mxu1 %vm19326_vm2, %v21841_v20 }
 0xaea   :  { %18292 = vmatprep.subr.bf16.mxu1 %v21842_v28  ;;  %v7777_v21 = vsub.f32 %v86_v18, %v7681_v42  ;;  %v7793_v18 = vsub.f32 %v7791_v30, %v7792_v31 }
 0xaec   :  { %v7778_v39 = vand.u32 4294901760, %v7777_v21  ;;  %v7794_v38 = vand.u32 4294901760, %v7793_v18 }
 0xaee   :  { %v7779_v50 = vsub.f32 %v7777_v21, %v7778_v39 }
 0xaf0   :  { %16692 = vmatmul.mubr.f32.vlgmr.msra.gmra.mrb[22].mxu1 %v7278_v25  ;;  %v7678_v25 = vand.u32 4294901760, %v85_v26  ;;  %v7780_v59 = vand.u32 4294901760, %v7779_v50  ;;  %v7808_v50 = vand.u32 4294901760, %v7807_v5  ;;  %v21877_v5 = vand.u32 4294901760, %v20875_v45 }
 0xaf1   :  { %18294 = vmatpush3.bf16.msra.mxu1 %v18293_v9  ;;  %16698 = vmatprep.mubr.msk.f32.mxu1 %vm19326_vm2, %v21841_v20 }
 0xaf2   :  { %18295 = vmatprep.subr.bf16.mxu1 %v21842_v28  ;;  %v20924_v10 = vpack.c.bf16 %v7681_v42, %v7678_v25  ;;  %v7770_v0 = vsub.f32 %v85_v26, %v7678_v25  ;;  %v7785_v25 = vand.u32 4294901760, %v7784_v53 }
 0xaf4   :  { %18303 = vmatpush3.bf16.msra.mxu0 %v20924_v10  ;;  %v7786_v37 = vsub.f32 %v7784_v53, %v7785_v25 }
 0xaf5   :  { %18304 = vmatprep.subr.bf16.mxu0 %v21842_v28 }
 0xaf6   :  { %v7787_v35 = vand.u32 4294901760, %v7786_v37  ;;  %v20950_v37 = vpack.c.bf16 %v7792_v31, %v7785_v25 }
 0xaf8   :  { %16699 = vmatmul.mubr.f32.vlgmr.msra.gmra.mrb[22].mxu1 %v7276_v43  ;;  %18306 = vmatpush3.bf16.msra.mxu0 %v20927_v49  ;;  %v20938_v41 = vpack.c.bf16 %v7794_v38, %v7787_v35  ;;  %21874 = vst [vmem:[#allocation51_spill] sm:$0xff] %v20950_v37 }
 0xaf9   :  { %18297 = vmatpush3.bf16.msra.mxu1 %v18281_v58  ;;  %16705 = vmatprep.mubr.msk.f32.mxu1 %vm19326_vm2, %v21841_v20  ;;  %v89_v58 = vld [vmem:[%s21707_s4 + $0xf0] sm:$0xff] }
 0xafa   :  { %18370 = vmatprep.subr.bf16.mxu1 %v21842_v28  ;;  %v7690_v60 = vand.u32 4294901760, %v89_v58  ;;  %18307 = vmatprep.subr.bf16.mxu0 %v21842_v28  ;;  %21868 = vst [vmem:[#allocation45_spill] sm:$0xff] %v20938_v41 }
 0xafc   :  { %v20931_v9 = vpack.c.bf16 %v7693_v44, %v7690_v60  ;;  %v7798_v42 = vsub.f32 %v89_v58, %v7690_v60  ;;  %v20942_v58 = vpack.c.bf16 %v7777_v21, %v7770_v0 }
 0xafe   :  { %18309 = vmatpush3.bf16.msra.mxu0 %v20931_v9  ;;  %v7799_v24 = vand.u32 4294901760, %v7798_v42  ;;  %21870 = vst [vmem:[#allocation47_spill] sm:$0xff] %v20942_v58 }
 0xaff   :  { %18310 = vmatprep.subr.bf16.mxu0 %v21842_v28 }
 0xb00   :  { %16706 = vmatmul.mubr.f32.vlgmr.msra.gmra.mrb[22].mxu1 %v7276_v43  ;;  %v7771_v43 = vand.u32 4294901760, %v7770_v0  ;;  %v20952_v44 = vpack.c.bf16 %v7806_v6, %v7799_v24 }
 0xb01   :  { %16830 = vmatprep.mubr.msk.f32.mxu1 %vm19326_vm2, %v21841_v20 }
 0xb02   :  { %v7772_v56 = vsub.f32 %v7770_v0, %v7771_v43  ;;  %v20948_v60 = vpack.c.bf16 %v7778_v39, %v7771_v43  ;;  %21875 = vst [vmem:[#allocation52_spill] sm:$0xff] %v20952_v44 }
 0xb04   :  { %v7773_v26 = vand.u32 4294901760, %v7772_v56  ;;  %v7800_v56 = vsub.f32 %v7798_v42, %v7799_v24  ;;  %21873 = vst [vmem:[#allocation50_spill] sm:$0xff] %v20948_v60 }
 0xb06   :  { %v20935_v48 = vpack.c.bf16 %v7780_v59, %v7773_v26  ;;  %v7801_v19 = vand.u32 4294901760, %v7800_v56  ;;  %v20946_v59 = vpack.c.bf16 %v7805_v40, %v7798_v42  ;;  %v21876_v26 = vand.u32 4294901760, %v20870_v7 }
 0xb08   :  { %21867 = vst [vmem:[#allocation44_spill] sm:$0xff] %v20935_v48  ;;  %v20940_v55 = vpack.c.bf16 %v7808_v50, %v7801_v19  ;;  %21872 = vst [vmem:[#allocation49_spill] sm:$0xff] %v20946_v59  ;;  %v7756_v18 = vsub.f32 %v20870_v7, %v21876_v26  ;;  %v7763_v19 = vsub.f32 %v20875_v45, %v21877_v5  ;;  %v10238_v50 = vpop.permute.xlu1 %10237 }
 0xb0a   :  { %21869 = vst [vmem:[#allocation46_spill] sm:$0xff] %v20940_v55  ;;  %v7757_v0 = vand.u32 4294901760, %v7756_v18  ;;  %v7764_v21 = vand.u32 4294901760, %v7763_v19  ;;  %v20975_v45 = vpack.c.bf16 %v7763_v19, %v7756_v18 }
 0xb0c   :  { %v7758_v43 = vsub.f32 %v7756_v18, %v7757_v0  ;;  %v7765_v39 = vsub.f32 %v7763_v19, %v7764_v21  ;;  %21879 = vst [vmem:[#allocation54_spill] sm:$0xff] %v20975_v45  ;;  %v20998_v56 = vpack.c.bf16 %v7764_v21, %v7757_v0  ;;  %v10240_v26 = vpop.permute.xlu1 %10239  ;;  %v10243_v19 = vsel %vm2257_vm3, %v10238_v50, 0 }
 0xb0d   :  { %v10245_v18 = vsel %vm2257_vm3, %v10240_v26, 0 }
 0xb0e   :  { %v7759_v42 = vand.u32 4294901760, %v7758_v43  ;;  %v7766_v35 = vand.u32 4294901760, %v7765_v39  ;;  %21880 = vst [vmem:[#allocation55_spill] sm:$0xff] %v20998_v56  ;;  %v10251_v0 = vand.u32 4294901760, %v10245_v18 }
 0xb10   :  { %v20964_v24 = vpack.c.bf16 %v7766_v35, %v7759_v42  ;;  %v10236_v5 = vpop.permute.xlu1 %10235 }
 0xb11   :  { %v10241_v21 = vsel %vm2257_vm3, %v10236_v5, 0 }
 0xb12   :  { %21878 = vst [vmem:[#allocation53_spill] sm:$0xff] %v20964_v24 }
 0xbd3   :  { %v7664_v53 = vpop.f32.mrb[22].mxu1 }
 0xbd4   :  { %v7669_v40 = vsel %vm2257_vm3, %v7664_v53, 0  ;;  %v16707_v30 = vpop.f32.mrb[23].mxu1  ;;  %v10248_v53 = vand.u32 4294901760, %v10243_v19 }
 0xbd5   :  { %v20961_v31 = vand.u32 4294901760, %v7669_v40  ;;  %v10333_v30 = vsub.f32 %v10245_v18, %v10251_v0 }
 0xbd6   :  { %v10326_v43 = vsub.f32 %v10243_v19, %v10248_v53 }
 0xbd7   :  { %v7745_v25 = vsub.f32 %v7669_v40, %v20961_v31  ;;  %v10314_v40 = vand.u32 4294901760, %v10241_v21 }
 0xbd8   :  { %v10327_v42 = vand.u32 4294901760, %v10326_v43 }
 0xbd9   :  { %v7746_v38 = vand.u32 4294901760, %v7745_v25  ;;  %v10315_v39 = vsub.f32 %v10241_v21, %v10314_v40 }
 0xbdb   :  { %v7747_v7 = vsub.f32 %v7745_v25, %v7746_v38  ;;  %v10316_v35 = vand.u32 4294901760, %v10315_v39 }
 0xbdd   :  { %v7748_v6 = vand.u32 4294901760, %v7747_v7  ;;  %v10317_v50 = vsub.f32 %v10315_v39, %v10316_v35 }
 0xbdf   :  { %16725 = vmatmul.mubr.f32.vlgmr.msra.gmra.mrb[20].mxu0 %v7748_v6  ;;  %v10328_v6 = vsub.f32 %v10326_v43, %v10327_v42  ;;  %v10318_v5 = vand.u32 4294901760, %v10317_v50 }
 0xbe0   :  { %18312 = vmatpush3.bf16.msra.mxu0 %v20964_v24  ;;  %16743 = vmatprep.mubr.msk.f32.mxu0 %vm19326_vm2, %v21841_v20 }
 0xbe1   :  { %18313 = vmatprep.subr.bf16.mxu0 %v21842_v28  ;;  %v10329_v18 = vand.u32 4294901760, %v10328_v6 }
 0xbe4   :  { %18315 = vmatpush3.bf16.msra.mxu0 %v20935_v48 }
 0xbe5   :  { %18316 = vmatprep.subr.bf16.mxu0 %v21842_v28 }
 0xbe8   :  { %18318 = vmatpush3.bf16.msra.mxu0 %v20938_v41 }
 0xbe9   :  { %18319 = vmatprep.subr.bf16.mxu0 %v21842_v28 }
 0xbec   :  { %18321 = vmatpush3.bf16.msra.mxu0 %v20940_v55 }
 0xbed   :  { %18322 = vmatprep.subr.bf16.mxu0 %v21842_v28 }
 0xbef   :  { %16744 = vmatmul.mubr.f32.vlgmr.msra.gmra.mrb[20].mxu0 %v20961_v31 }
 0xbf0   :  { %18324 = vmatpush3.bf16.msra.mxu0 %v20975_v45  ;;  %16762 = vmatprep.mubr.msk.f32.mxu0 %vm19326_vm2, %v21841_v20 }
 0xbf1   :  { %18325 = vmatprep.subr.bf16.mxu0 %v21842_v28 }
 0xbf4   :  { %18327 = vmatpush3.bf16.msra.mxu0 %v20942_v58 }
 0xbf5   :  { %18328 = vmatprep.subr.bf16.mxu0 %v21842_v28 }
 0xbf8   :  { %18330 = vmatpush3.bf16.msra.mxu0 %v20944_v4 }
 0xbf9   :  { %18331 = vmatprep.subr.bf16.mxu0 %v21842_v28 }
 0xbfc   :  { %18333 = vmatpush3.bf16.msra.mxu0 %v20946_v59 }
 0xbfd   :  { %18334 = vmatprep.subr.bf16.mxu0 %v21842_v28 }
 0xbff   :  { %16763 = vmatmul.mubr.f32.vlgmr.msra.gmra.mrb[20].mxu0 %v7745_v25  ;;  %v10334_v25 = vand.u32 4294901760, %v10333_v30 }
 0xc00   :  { %18336 = vmatpush3.bf16.msra.mxu0 %v20883_v23  ;;  %16781 = vmatprep.mubr.msk.f32.mxu0 %vm19326_vm2, %v21841_v20 }
 0xc01   :  { %18337 = vmatprep.subr.bf16.mxu0 %v21842_v28  ;;  %v10335_v7 = vsub.f32 %v10333_v30, %v10334_v25 }
 0xc03   :  { %v10336_v26 = vand.u32 4294901760, %v10335_v7 }
 0xc04   :  { %18339 = vmatpush3.bf16.msra.mxu0 %v20924_v10 }
 0xc05   :  { %18340 = vmatprep.subr.bf16.mxu0 %v21842_v28  ;;  %v18518_v19 = vpack.c.bf16 %v10336_v26, %v10329_v18 }
 0xc08   :  { %18342 = vmatpush3.bf16.msra.mxu0 %v20927_v49 }
 0xc09   :  { %18343 = vmatprep.subr.bf16.mxu0 %v21842_v28 }
 0xc0c   :  { %18345 = vmatpush3.bf16.msra.mxu0 %v20931_v9 }
 0xc0d   :  { %18346 = vmatprep.subr.bf16.mxu0 %v21842_v28 }
 0xc0f   :  { %16782 = vmatmul.mubr.f32.vlgmr.msra.gmra.mrb[20].mxu0 %v7746_v38  ;;  %v18515_v38 = vpack.c.bf16 %v10251_v0, %v10248_v53  ;;  %v18527_v0 = vpack.c.bf16 %v10334_v25, %v10327_v42  ;;  %v15244_v25 = vld [vmem:[%s21707_s4 + $0x120] ss:$0 sm:$0xff] }
 0xc10   :  { %18348 = vmatpush3.bf16.msra.mxu0 %v20998_v56  ;;  %16800 = vmatprep.mubr.msk.f32.mxu0 %vm19326_vm2, %v21841_v20 }
 0xc11   :  { %18349 = vmatprep.subr.bf16.mxu0 %v21842_v28 }
 0xc14   :  { %18351 = vmatpush3.bf16.msra.mxu0 %v20948_v60 }
 0xc15   :  { %18352 = vmatprep.subr.bf16.mxu0 %v21842_v28 }
 0xc18   :  { %18354 = vmatpush3.bf16.msra.mxu0 %v20950_v37 }
 0xc19   :  { %18355 = vmatprep.subr.bf16.mxu0 %v21842_v28 }
 0xc1c   :  { %18357 = vmatpush3.bf16.msra.mxu0 %v20952_v44 }
 0xc1d   :  { %18358 = vmatprep.subr.bf16.mxu0 %v21842_v28 }
 0xc1f   :  { %16801 = vmatmul.mubr.f32.vlgmr.msra.gmra.mrb[20].mxu0 %v20961_v31 }
 0xc20   :  { %18360 = vmatpush3.bf16.msra.mxu0 %v20883_v23  ;;  %16819 = vmatprep.mubr.msk.f32.mxu0 %vm19326_vm2, %v21841_v20 }
 0xc21   :  { %18361 = vmatprep.subr.bf16.mxu0 %v21842_v28 }
 0xc24   :  { %18363 = vmatpush3.bf16.msra.mxu0 %v20924_v10 }
 0xc25   :  { %18364 = vmatprep.subr.bf16.mxu0 %v21842_v28 }
 0xc28   :  { %18366 = vmatpush3.bf16.msra.mxu0 %v20927_v49 }
 0xc29   :  { %18367 = vmatprep.subr.bf16.mxu0 %v21842_v28 }
 0xc2c   :  { %18369 = vmatpush3.bf16.msra.mxu0 %v20931_v9 }
 0xc2d   :  { %18514 = vmatprep.subr.bf16.mxu0 %v21842_v28 }
 0xc2f   :  { %16820 = vmatmul.mubr.f32.vlgmr.msra.gmra.mrb[20].mxu0 %v20961_v31  ;;  %v18521_v31 = vpack.c.bf16 %v10333_v30, %v10326_v43 }
 0xc30   :  { %17090 = vmatprep.mubr.msk.f32.mxu0 %vm19326_vm2, %v21841_v20 }
 0xc35   :  { %18516 = vmatpush3.bf16.xpose.msra.mxu0 %v18515_v38 }
 0xc36   :  { %18517 = vmatprep.subr.bf16.mxu0 %v21842_v28 }
 0xc3c   :  { %17091 = vmatmul.mubr.f32.vlgmr.msra.gmra.mrb[24].mxu0 %v10318_v5 }
 0xc3d   :  { %18519 = vmatpush3.bf16.xpose.msra.mxu0 %v18518_v19  ;;  %17097 = vmatprep.mubr.msk.f32.mxu0 %vm19326_vm2, %v21841_v20 }
 0xc3e   :  { %18520 = vmatprep.subr.bf16.mxu0 %v21842_v28 }
 0xc44   :  { %17098 = vmatmul.mubr.f32.vlgmr.msra.gmra.mrb[24].mxu0 %v10314_v40 }
 0xc45   :  { %18522 = vmatpush3.bf16.xpose.msra.mxu0 %v18521_v31  ;;  %17104 = vmatprep.mubr.msk.f32.mxu0 %vm19326_vm2, %v21841_v20 }
 0xc46   :  { %18523 = vmatprep.subr.bf16.mxu0 %v21842_v28 }
 0xc4c   :  { %17105 = vmatmul.mubr.f32.vlgmr.msra.gmra.mrb[24].mxu0 %v10315_v39 }
 0xc4d   :  { %18525 = vmatpush3.bf16.xpose.msra.mxu0 %v18515_v38  ;;  %17111 = vmatprep.mubr.msk.f32.mxu0 %vm19326_vm2, %v21841_v20 }
 0xc4e   :  { %18526 = vmatprep.subr.bf16.mxu0 %v21842_v28 }
 0xc54   :  { %17112 = vmatmul.mubr.f32.vlgmr.msra.gmra.mrb[24].mxu0 %v10316_v35 }
 0xc55   :  { %18528 = vmatpush3.bf16.xpose.msra.mxu0 %v18527_v0  ;;  %17118 = vmatprep.mubr.msk.f32.mxu0 %vm19326_vm2, %v21841_v20 }
 0xc56   :  { %18529 = vmatprep.subr.bf16.mxu0 %v21842_v28 }
 0xc5c   :  { %17119 = vmatmul.mubr.f32.vlgmr.msra.gmra.mrb[24].mxu0 %v10314_v40 }
 0xc5d   :  { %18531 = vmatpush3.bf16.xpose.msra.mxu0 %v18515_v38  ;;  %17125 = vmatprep.mubr.msk.f32.mxu0 %vm19326_vm2, %v21841_v20 }
 0xc5e   :  { %18532 = vmatprep.subr.bf16.mxu0 %v21842_v28 }
 0xc64   :  { %17126 = vmatmul.mubr.f32.vlgmr.msra.gmra.mrb[24].mxu0 %v10314_v40  ;;  %v19294_v40 = vld [vmem:[%s21703_s0] sm:$0xff] }
 0xc65   :  { %17132 = vmatprep.mubr.msk.f32.mxu0 %vm19326_vm2, %v21841_v20  ;;  %v2256_v42 = vadd.f32 %v19294_v40, %v15244_v25 }
 0xd02   :  { %v8204_v21 = vpop.f32.mrb[20].mxu0 }
 0xd03   :  { %v16821_v53 = vpop.f32.mrb[21].mxu0  ;;  %v18902_v35 = vadd.f32 %v8204_v21, %v2256_v42 }
 0xd05   :  { %v8209_v38 = vmax.f32 %v18902_v35, 0.0  ;;  %v93_v35 = vld [vmem:[%s21707_s4 + $0x110] sm:$0xff] }
 0xd07   :  { %v8210_v7 = vsel %vm114_vm0, %v8209_v38, 0.0 }
 0xd37   :  { %v10702_v30 = vpop.f32.mrb[24].mxu0 }
 0xd38   :  { %v17127_v43 = vpop.f32.mrb[25].mxu0  ;;  %v10706_v39 = vsel %vm2726_vm4, %v10702_v30, -inf }
 0xd39   :  { %10707 = vmax.xlane.f32.xlu1 %v10706_v39  ;;  %v92_v39 = vld [vmem:[%s21707_s4 + $0x108] sm:$0xff] }
 0xd3a   :  { %v8245_v40 = vand.u32 4294901760, %v92_v39 }
 0xd4a   :  { %10719 = vrot.lane.b32.xlu1 %v20203_v52, %s19327_s23 }
 0xd6e   :  { %8211 = vadd.xlane.f32.xlu1 %v8210_v7  ;;  %v8248_v7 = vand.u32 4294901760, %v93_v35 }
 0xd70   :  { %v8336_v44 = vsub.f32 %v93_v35, %v8248_v7 }
 0xd72   :  { %v8337_v59 = vand.u32 4294901760, %v8336_v44 }
 0xd74   :  { %v8338_v45 = vsub.f32 %v8336_v44, %v8337_v59 }
 0xdc6   :  { %v10708_v6 = vpop.xlane.xlu1 %10707 }
 0xdc7   :  { %v10709_v50 = vsub.f32 %v10702_v30, %v10708_v6  ;;  %v91_v30 = vld [vmem:[%s21707_s4 + $0x100] sm:$0xff] }
 0xdc8   :  { %v8242_v25 = vand.u32 4294901760, %v91_v30 }
 0xdc9   :  { %v10710_v26 = vmul.f32 1.442695, %v10709_v50 }
 0xdca   :  { %v10720_v19 = vpop.permute.xlu1 %10719  ;;  %v21070_v42 = vpack.c.bf16 %v8245_v40, %v8242_v25 }
 0xdcb   :  { %19270 = vpow2.f32 %v10710_v26  ;;  %v8322_v26 = vsub.f32 %v91_v30, %v8242_v25 }
 0xdcc   :  { %18372 = vmatpush3.bf16.msra.mxu1 %v21070_v42 }
 0xdcd   :  { %18373 = vmatprep.subr.bf16.mxu1 %v21842_v28 }
 0xdd5   :  { %v19271_v18 = vpop.eup %19270 }
 0xdd6   :  { %v10712_v5 = vsel %vm2726_vm4, %v19271_v18, 0.0 }
 0xdd7   :  { %10713 = vadd.xlane.f32.xlu0 %v10712_v5  ;;  %v8329_v5 = vsub.f32 %v92_v39, %v8245_v40  ;;  %v8339_v39 = vand.u32 4294901760, %v8338_v45 }
 0xdd9   :  { %v21086_v30 = vpack.c.bf16 %v8329_v5, %v8322_v26 }
 0xded   :  { %10721 = vrot.lane.b32.xlu0 %v20209_v15, %s19327_s23 }
 0xdfb   :  { %v8212_v31 = vpop.xlane.xlu1 %8211 }
 0xdfc   :  { %v8214_v0 = vmul.f32 0.03125, %v8212_v31  ;;  %v8323_v31 = vand.u32 4294901760, %v8322_v26 }
 0xdfe   :  { %v21059_v53 = vsub.f32 %v8209_v38, %v8214_v0  ;;  %v94_v38 = vld [vmem:[%s21707_s4 + $0x118] sm:$0xff]  ;;  %v8330_v0 = vand.u32 4294901760, %v8329_v5 }
 0xdff   :  { %v8251_v6 = vand.u32 4294901760, %v94_v38 }
 0xe00   :  { %v8216_v21 = vmul.f32 %v21059_v53, %v21059_v53  ;;  %v21092_v48 = vpack.c.bf16 %v8330_v0, %v8323_v31 }
 0xe01   :  { %v21080_v50 = vpack.c.bf16 %v8251_v6, %v8248_v7  ;;  %v8343_v37 = vsub.f32 %v94_v38, %v8251_v6  ;;  %v10729_v6 = vand.u32 4294901760, %v10720_v19 }
 0xe02   :  { %v8217_v43 = vsel %vm114_vm0, %v8216_v21, 0.0  ;;  %v8324_v21 = vsub.f32 %v8322_v26, %v8323_v31 }
 0xe03   :  { %18375 = vmatpush3.bf16.msra.mxu1 %v21080_v50  ;;  %v8344_v4 = vand.u32 4294901760, %v8343_v37  ;;  %v21090_v41 = vpack.c.bf16 %v8343_v37, %v8336_v44  ;;  %v10807_v26 = vsub.f32 %v10720_v19, %v10729_v6  ;;  %v11735_v19 = vsel %vm2257_vm3, %v19888_v34, 0 }
 0xe04   :  { %18376 = vmatprep.subr.bf16.mxu1 %v21842_v28  ;;  %v8325_v60 = vand.u32 4294901760, %v8324_v21 }
 0xe05   :  { %v8345_v55 = vsub.f32 %v8343_v37, %v8344_v4  ;;  %v21094_v35 = vpack.c.bf16 %v8344_v4, %v8337_v59  ;;  %v10808_v37 = vand.u32 4294901760, %v10807_v26 }
 0xe07   :  { %v8346_v25 = vand.u32 4294901760, %v8345_v55 }
 0xe09   :  { %v21088_v40 = vpack.c.bf16 %v8346_v25, %v8339_v39 }
 0xe0c   :  { %8218 = vadd.xlane.f32.xlu0 %v8217_v43  ;;  %v8331_v43 = vsub.f32 %v8329_v5, %v8330_v0  ;;  %v10809_v0 = vsub.f32 %v10807_v26, %v10808_v37 }
 0xe0e   :  { %v8332_v56 = vand.u32 4294901760, %v8331_v43 }
 0xe10   :  { %v21084_v58 = vpack.c.bf16 %v8332_v56, %v8325_v60 }
 0xe64   :  { %v10714_v38 = vpop.xlane.xlu0 %10713 }
 0xe65   :  { %19272 = vrcp.f32 %v10714_v38  ;;  %v10810_v38 = vand.u32 4294901760, %v10809_v0 }
 0xe68   :  { %v10722_v7 = vpop.permute.xlu0 %10721 }
 0xe69   :  { %v10732_v60 = vand.u32 4294901760, %v10722_v7 }
 0xe6b   :  { %v18533_v56 = vpack.c.bf16 %v10732_v60, %v10729_v6  ;;  %v10814_v21 = vsub.f32 %v10722_v7, %v10732_v60  ;;  %v11732_v6 = vsel %vm2257_vm3, %v19874_v11, 0  ;;  %v11729_v60 = vsel %vm2257_vm3, %v19825_v61, 0 }
 0xe6d   :  { %18534 = vmatpush3.bf16.msra.mxu0 %v18533_v56  ;;  %v10815_v5 = vand.u32 4294901760, %v10814_v21 }
 0xe6e   :  { %18535 = vmatprep.subr.bf16.mxu0 %v21842_v28 }
 0xe6f   :  { %v19273_v55 = vpop.eup %19272  ;;  %v10816_v4 = vsub.f32 %v10814_v21, %v10815_v5 }
 0xe70   :  { %v10716_v45 = vmul.f32 %v19273_v55, %v19271_v18  ;;  %v18539_v18 = vpack.c.bf16 %v10814_v21, %v10807_v26  ;;  %v11741_v21 = vand.u32 4294901760, %v11735_v19 }
 0xe71   :  { %v10817_v39 = vand.u32 4294901760, %v10816_v4 }
 0xe72   :  { %v10726_v44 = vsel %vm2726_vm4, %v10716_v45, 0  ;;  %v11738_v45 = vand.u32 4294901760, %v11732_v6 }
 0xe73   :  { %v10795_v31 = vand.u32 4294901760, %v10726_v44  ;;  %v18536_v7 = vpack.c.bf16 %v10817_v39, %v10810_v38 }
 0xe74   :  { %v11816_v4 = vsub.f32 %v11732_v6, %v11738_v45 }
 0xe75   :  { %v10796_v59 = vsub.f32 %v10726_v44, %v10795_v31  ;;  %v11823_v44 = vsub.f32 %v11735_v19, %v11741_v21 }
 0xe77   :  { %v10797_v43 = vand.u32 4294901760, %v10796_v59  ;;  %v11824_v0 = vand.u32 4294901760, %v11823_v44 }
 0xe79   :  { %v10798_v25 = vsub.f32 %v10796_v59, %v10797_v43  ;;  %v11825_v38 = vsub.f32 %v11823_v44, %v11824_v0 }
 0xe7b   :  { %v10799_v24 = vand.u32 4294901760, %v10798_v25  ;;  %v18623_v25 = vpack.c.bf16 %v11741_v21, %v11738_v45  ;;  %v11826_v6 = vand.u32 4294901760, %v11825_v38 }
 0xe7d   :  { %17133 = vmatmul.mubr.f32.vlgmr.msra.gmra.mrb[26].mxu0 %v10799_v24  ;;  %v18545_v24 = vpack.c.bf16 %v10815_v5, %v10808_v37  ;;  %v21116_v5 = vand.u32 4294901760, %v11729_v60 }
 0xe7e   :  { %18537 = vmatpush3.bf16.msra.mxu0 %v18536_v7  ;;  %17139 = vmatprep.mubr.msk.f32.mxu0 %vm19326_vm2, %v21841_v20 }
 0xe7f   :  { %18538 = vmatprep.subr.bf16.mxu0 %v21842_v28 }
 0xe85   :  { %17140 = vmatmul.mubr.f32.vlgmr.msra.gmra.mrb[26].mxu0 %v10795_v31 }
 0xe86   :  { %18540 = vmatpush3.bf16.msra.mxu0 %v18539_v18  ;;  %17146 = vmatprep.mubr.msk.f32.mxu0 %vm19326_vm2, %v21841_v20  ;;  %v15245_v18 = vld [vmem:[%s21707_s4 + $0x122] ss:$0 sm:$0xff] }
 0xe87   :  { %18541 = vmatprep.subr.bf16.mxu0 %v21842_v28 }
 0xe8d   :  { %17147 = vmatmul.mubr.f32.vlgmr.msra.gmra.mrb[26].mxu0 %v10796_v59  ;;  %v11805_v59 = vsub.f32 %v11729_v60, %v21116_v5 }
 0xe8e   :  { %18543 = vmatpush3.bf16.msra.mxu0 %v18533_v56  ;;  %17153 = vmatprep.mubr.msk.f32.mxu0 %vm19326_vm2, %v21841_v20 }
 0xe8f   :  { %18544 = vmatprep.subr.bf16.mxu0 %v21842_v28  ;;  %v11806_v39 = vand.u32 4294901760, %v11805_v59 }
 0xe95   :  { %17154 = vmatmul.mubr.f32.vlgmr.msra.gmra.mrb[26].mxu0 %v10797_v43  ;;  %v11817_v43 = vand.u32 4294901760, %v11816_v4 }
 0xe96   :  { %18546 = vmatpush3.bf16.msra.mxu0 %v18545_v24  ;;  %17160 = vmatprep.mubr.msk.f32.mxu0 %vm19326_vm2, %v21841_v20  ;;  %v11807_v24 = vsub.f32 %v11805_v59, %v11806_v39 }
 0xe97   :  { %18547 = vmatprep.subr.bf16.mxu0 %v21842_v28  ;;  %v11818_v7 = vsub.f32 %v11816_v4, %v11817_v43 }
 0xe99   :  { %v8219_v26 = vpop.xlane.xlu0 %8218  ;;  %v11819_v21 = vand.u32 4294901760, %v11818_v7  ;;  %v18629_v7 = vpack.c.bf16 %v11823_v44, %v11816_v4  ;;  %v18635_v44 = vpack.c.bf16 %v11824_v0, %v11817_v43  ;;  %v21881_v4 = vand.u32 4294901760, %v20205_v27 }
 0xe9a   :  { %v8220_v55 = vmul.f32 0.03125, %v8219_v26  ;;  %v11808_v26 = vand.u32 4294901760, %v11807_v24  ;;  %v8760_v43 = vsel %vm2257_vm3, %v19884_v33, 0 }
 0xe9c   :  { %v8221_v37 = vadd.f32 1e-06, %v8220_v55  ;;  %v18626_v55 = vpack.c.bf16 %v11826_v6, %v11819_v21 }
 0xe9d   :  { %17161 = vmatmul.mubr.f32.vlgmr.msra.gmra.mrb[26].mxu0 %v10795_v31 }
 0xe9e   :  { %19274 = vrsqrt.f32 %v8221_v37  ;;  %18549 = vmatpush3.bf16.msra.mxu0 %v18533_v56  ;;  %17167 = vmatprep.mubr.msk.f32.mxu0 %vm19326_vm2, %v21841_v20 }
 0xe9f   :  { %18622 = vmatprep.subr.bf16.mxu0 %v21842_v28 }
 0xea5   :  { %17168 = vmatmul.mubr.f32.vlgmr.msra.gmra.mrb[26].mxu0 %v10795_v31  ;;  %v15246_v31 = vld [vmem:[%s21707_s4 + $0x123] ss:$0 sm:$0xff] }
 0xea6   :  { %17288 = vmatprep.mubr.msk.f32.mxu0 %vm19326_vm2, %v21841_v20 }
 0xea7   :  { %18624 = vmatpush3.bf16.xpose.msra.mxu0 %v18623_v25 }
 0xea8   :  { %v19275_v56 = vpop.eup %19274  ;;  %18625 = vmatprep.subr.bf16.mxu0 %v21842_v28 }
 0xea9   :  { %v8223_v19 = vmul.f32 %v19275_v56, %v21059_v53 }
 0xeab   :  { %v8228_v60 = vmul.f32 %v15245_v18, %v8223_v19 }
 0xead   :  { %v21132_v45 = vadd.f32 %v15246_v31, %v8228_v60 }
 0xeae   :  { %17289 = vmatmul.mubr.f32.vlgmr.msra.gmra.mrb[28].mxu0 %v11808_v26 }
 0xeaf   :  { %18627 = vmatpush3.bf16.xpose.msra.mxu0 %v18626_v55  ;;  %17295 = vmatprep.mubr.msk.f32.mxu0 %vm19326_vm2, %v21841_v20  ;;  %v8239_v37 = vsel %vm114_vm0, %v21132_v45, 0 }
 0xeb0   :  { %18628 = vmatprep.subr.bf16.mxu0 %v21842_v28  ;;  %v21139_v53 = vand.u32 4294901760, %v8239_v37 }
 0xeb2   :  { %v8311_v38 = vsub.f32 %v8239_v37, %v21139_v53 }
 0xeb4   :  { %v8312_v56 = vand.u32 4294901760, %v8311_v38 }
 0xeb6   :  { %17296 = vmatmul.mubr.f32.vlgmr.msra.gmra.mrb[28].mxu0 %v21116_v5  ;;  %v8313_v18 = vsub.f32 %v8311_v38, %v8312_v56 }
 0xeb7   :  { %18630 = vmatpush3.bf16.xpose.msra.mxu0 %v18629_v7  ;;  %17302 = vmatprep.mubr.msk.f32.mxu0 %vm19326_vm2, %v21841_v20 }
 0xeb8   :  { %v8314_v24 = vand.u32 4294901760, %v8313_v18  ;;  %18631 = vmatprep.subr.bf16.mxu0 %v21842_v28 }
 0xeba   :  { %16831 = vmatmul.mubr.f32.vlgmr.msra.gmra.mrb[24].mxu1 %v8314_v24 }
 0xebb   :  { %18378 = vmatpush3.bf16.msra.mxu1 %v21084_v58  ;;  %16841 = vmatprep.mubr.msk.f32.mxu1 %vm19326_vm2, %v21841_v20 }
 0xebc   :  { %18379 = vmatprep.subr.bf16.mxu1 %v21842_v28 }
 0xebe   :  { %17303 = vmatmul.mubr.f32.vlgmr.msra.gmra.mrb[28].mxu0 %v11805_v59  ;;  %v21882_v59 = vand.u32 4294901760, %v20211_v32 }
 0xebf   :  { %18381 = vmatpush3.bf16.msra.mxu1 %v21088_v40  ;;  %18633 = vmatpush3.bf16.xpose.msra.mxu0 %v18623_v25 }
 0xec0   :  { %18382 = vmatprep.subr.bf16.mxu1 %v21842_v28  ;;  %17309 = vmatprep.mubr.msk.f32.mxu0 %vm19326_vm2, %v21841_v20  ;;  %v21183_v0 = vpack.c.bf16 %v21882_v59, %v21881_v4  ;;  %v21883_v4 = vand.u32 4294901760, %v20203_v52  ;;  %v21884_v59 = vand.u32 4294901760, %v20209_v15  ;;  %v15247_v52 = vld [vmem:[%s21707_s4 + $0x121] ss:$0 sm:$0xff] }
 0xec1   :  { %18634 = vmatprep.subr.bf16.mxu0 %v21842_v28 }
 0xec2   :  { %16842 = vmatmul.mubr.f32.vlgmr.msra.gmra.mrb[26].mxu1 %v21139_v53 }
 0xec3   :  { %18384 = vmatpush3.bf16.msra.mxu1 %v21086_v30  ;;  %16852 = vmatprep.mubr.msk.f32.mxu1 %vm19326_vm2, %v21841_v20 }
 0xec4   :  { %18385 = vmatprep.subr.bf16.mxu1 %v21842_v28 }
 0xec6   :  { %17310 = vmatmul.mubr.f32.vlgmr.msra.gmra.mrb[28].mxu0 %v11806_v39  ;;  %v8757_v39 = vsel %vm2257_vm3, %v19867_v1, 0 }
 0xec7   :  { %18387 = vmatpush3.bf16.msra.mxu1 %v21090_v41  ;;  %18636 = vmatpush3.bf16.xpose.msra.mxu0 %v18635_v44  ;;  %v8763_v33 = vand.u32 4294901760, %v8757_v39 }
 0xec8   :  { %18388 = vmatprep.subr.bf16.mxu1 %v21842_v28  ;;  %17316 = vmatprep.mubr.msk.f32.mxu0 %vm19326_vm2, %v21841_v20 }
 0xec9   :  { %18637 = vmatprep.subr.bf16.mxu0 %v21842_v28  ;;  %v8841_v1 = vsub.f32 %v8757_v39, %v8763_v33 }
 0xeca   :  { %16853 = vmatmul.mubr.f32.vlgmr.msra.gmra.mrb[28].mxu1 %v8311_v38 }
 0xecb   :  { %18390 = vmatpush3.bf16.msra.mxu1 %v21070_v42  ;;  %16863 = vmatprep.mubr.msk.f32.mxu1 %vm19326_vm2, %v21841_v20  ;;  %v8842_v60 = vand.u32 4294901760, %v8841_v1 }
 0xecc   :  { %18391 = vmatprep.subr.bf16.mxu1 %v21842_v28 }
 0xecd   :  { %v8843_v37 = vsub.f32 %v8841_v1, %v8842_v60 }
 0xece   :  { %17317 = vmatmul.mubr.f32.vlgmr.msra.gmra.mrb[28].mxu0 %v21116_v5 }
 0xecf   :  { %18393 = vmatpush3.bf16.msra.mxu1 %v21080_v50  ;;  %18639 = vmatpush3.bf16.xpose.msra.mxu0 %v18623_v25  ;;  %v8766_v25 = vand.u32 4294901760, %v8760_v43  ;;  %v8844_v7 = vand.u32 4294901760, %v8843_v37 }
 0xed0   :  { %18394 = vmatprep.subr.bf16.mxu1 %v21842_v28  ;;  %17323 = vmatprep.mubr.msk.f32.mxu0 %vm19326_vm2, %v21841_v20 }
 0xed1   :  { %18640 = vmatprep.subr.bf16.mxu0 %v21842_v28  ;;  %v8848_v6 = vsub.f32 %v8760_v43, %v8766_v25  ;;  %v18407_v26 = vpack.c.bf16 %v8766_v25, %v8763_v33  ;;  %v21228_v43 = vpack.c.bf16 %v21884_v59, %v21883_v4 }
 0xed2   :  { %16864 = vmatmul.mubr.f32.vlgmr.msra.gmra.mrb[30].mxu1 %v8312_v56 }
 0xed3   :  { %18396 = vmatpush3.bf16.msra.mxu1 %v21092_v48  ;;  %16874 = vmatprep.mubr.msk.f32.mxu1 %vm19326_vm2, %v21841_v20 }
 0xed4   :  { %18397 = vmatprep.subr.bf16.mxu1 %v21842_v28 }
 0xed6   :  { %17324 = vmatmul.mubr.f32.vlgmr.msra.gmra.mrb[28].mxu0 %v21116_v5  ;;  %v8754_v5 = vsel %vm2257_vm3, %v19822_v8, 0  ;;  %v8849_v8 = vand.u32 4294901760, %v8848_v6 }
 0xed7   :  { %18399 = vmatpush3.bf16.msra.mxu1 %v21094_v35  ;;  %18642 = vmatpush3.bf16.msra.mxu0 %v21183_v0  ;;  %v8829_v19 = vand.u32 4294901760, %v8754_v5 }
 0xed8   :  { %18400 = vmatprep.subr.bf16.mxu1 %v21842_v28  ;;  %17330 = vmatprep.mubr.msk.f32.mxu0 %vm19326_vm2, %v21841_v20  ;;  %v8850_v55 = vsub.f32 %v8848_v6, %v8849_v8  ;;  %v18419_v44 = vpack.c.bf16 %v8849_v8, %v8842_v60 }
 0xed9   :  { %18643 = vmatprep.subr.bf16.mxu0 %v21842_v28  ;;  %v8830_v31 = vsub.f32 %v8754_v5, %v8829_v19 }
 0xeda   :  { %16875 = vmatmul.mubr.f32.vlgmr.msra.gmra.mrb[32].mxu1 %v21139_v53  ;;  %v8851_v56 = vand.u32 4294901760, %v8850_v55 }
 0xedb   :  { %18402 = vmatpush3.bf16.msra.mxu1 %v21070_v42  ;;  %16885 = vmatprep.mubr.msk.f32.mxu1 %vm19326_vm2, %v21841_v20  ;;  %v8831_v21 = vand.u32 4294901760, %v8830_v31 }
 0xedc   :  { %18403 = vmatprep.subr.bf16.mxu1 %v21842_v28  ;;  %v18410_v24 = vpack.c.bf16 %v8851_v56, %v8844_v7 }
 0xedd   :  { %v8832_v38 = vsub.f32 %v8830_v31, %v8831_v21 }
 0xedf   :  { %18405 = vmatpush3.bf16.msra.mxu1 %v21080_v50  ;;  %v8833_v18 = vand.u32 4294901760, %v8832_v38 }
 0xee0   :  { %18406 = vmatprep.subr.bf16.mxu1 %v21842_v28 }
 0xee2   :  { %16886 = vmatmul.mubr.f32.vlgmr.msra.gmra.mrb[34].mxu1 %v21139_v53  ;;  %v18413_v53 = vpack.c.bf16 %v8848_v6, %v8841_v1 }
 0xee3   :  { %16892 = vmatprep.mubr.msk.f32.mxu1 %vm19326_vm2, %v21841_v20 }
 0xee8   :  { %18408 = vmatpush3.bf16.xpose.msra.mxu1 %v18407_v26 }
 0xee9   :  { %18409 = vmatprep.subr.bf16.mxu1 %v21842_v28 }
 0xeef   :  { %16893 = vmatmul.mubr.f32.vlgmr.msra.gmra.mrb[36].mxu1 %v8833_v18 }
 0xef0   :  { %18411 = vmatpush3.bf16.xpose.msra.mxu1 %v18410_v24  ;;  %16899 = vmatprep.mubr.msk.f32.mxu1 %vm19326_vm2, %v21841_v20 }
 0xef1   :  { %18412 = vmatprep.subr.bf16.mxu1 %v21842_v28 }
 0xef7   :  { %16900 = vmatmul.mubr.f32.vlgmr.msra.gmra.mrb[36].mxu1 %v8829_v19 }
 0xef8   :  { %18414 = vmatpush3.bf16.xpose.msra.mxu1 %v18413_v53  ;;  %16906 = vmatprep.mubr.msk.f32.mxu1 %vm19326_vm2, %v21841_v20 }
 0xef9   :  { %18415 = vmatprep.subr.bf16.mxu1 %v21842_v28 }
 0xeff   :  { %16907 = vmatmul.mubr.f32.vlgmr.msra.gmra.mrb[36].mxu1 %v8830_v31 }
 0xf00   :  { %18417 = vmatpush3.bf16.xpose.msra.mxu1 %v18407_v26  ;;  %16913 = vmatprep.mubr.msk.f32.mxu1 %vm19326_vm2, %v21841_v20 }
 0xf01   :  { %18418 = vmatprep.subr.bf16.mxu1 %v21842_v28 }
 0xf07   :  { %16914 = vmatmul.mubr.f32.vlgmr.msra.gmra.mrb[36].mxu1 %v8831_v21 }
 0xf08   :  { %18420 = vmatpush3.bf16.xpose.msra.mxu1 %v18419_v44  ;;  %16920 = vmatprep.mubr.msk.f32.mxu1 %vm19326_vm2, %v21841_v20 }
 0xf09   :  { %18421 = vmatprep.subr.bf16.mxu1 %v21842_v28 }
 0xf0f   :  { %16921 = vmatmul.mubr.f32.vlgmr.msra.gmra.mrb[36].mxu1 %v8829_v19 }
 0xf10   :  { %18423 = vmatpush3.bf16.xpose.msra.mxu1 %v18407_v26  ;;  %16927 = vmatprep.mubr.msk.f32.mxu1 %vm19326_vm2, %v21841_v20 }
 0xf11   :  { %18424 = vmatprep.subr.bf16.mxu1 %v21842_v28 }
 0xf17   :  { %16928 = vmatmul.mubr.f32.vlgmr.msra.gmra.mrb[36].mxu1 %v8829_v19 }
 0xf18   :  { %18426 = vmatpush3.bf16.msra.mxu1 %v21228_v43  ;;  %16934 = vmatprep.mubr.msk.f32.mxu1 %vm19326_vm2, %v21841_v20 }
 0xf19   :  { %18427 = vmatprep.subr.bf16.mxu1 %v21842_v28 }
 0xf78   :  { %v21234_v39 = vpop.f32.mrb[26].mxu0 }
 0xf79   :  { %v17169_v5 = vpop.f32.mrb[27].mxu0 }
 0xf8d   :  { %v8316_v25 = vpop.f32.mrb[24].mxu1 }
 0xf8e   :  { %v16832_v33 = vpop.f32.mrb[25].mxu1  ;;  %v8317_v15 = vadd.f32 %v15247_v52, %v8316_v25 }
 0xf95   :  { %v8407_v6 = vpop.f32.mrb[26].mxu1 }
 0xf96   :  { %v8408_v1 = vadd.f32 %v8407_v6, %v8317_v15  ;;  %v16843_v19 = vpop.f32.mrb[27].mxu1 }
 0xf9d   :  { %v8487_v31 = vpop.f32.mrb[28].mxu1 }
 0xf9e   :  { %v8488_v8 = vadd.f32 %v8487_v31, %v8408_v1  ;;  %v16854_v60 = vpop.f32.mrb[29].mxu1 }
 0xfa5   :  { %v8564_v21 = vpop.f32.mrb[30].mxu1 }
 0xfa6   :  { %v8565_v26 = vadd.f32 %v8564_v21, %v8488_v8  ;;  %v16865_v55 = vpop.f32.mrb[31].mxu1 }
 0xfa9   :  { %v12192_v37 = vpop.f32.mrb[28].mxu0 }
 0xfaa   :  { %v17325_v38 = vpop.f32.mrb[29].mxu0  ;;  %v12196_v56 = vsel %vm2726_vm4, %v12192_v37, -inf }
 0xfab   :  { %12197 = vmax.xlane.f32.xlu1 %v12196_v56 }
 0xfad   :  { %v8647_v7 = vpop.f32.mrb[32].mxu1 }
 0xfae   :  { %v8648_v18 = vadd.f32 %v8647_v7, %v8565_v26  ;;  %v16876_v24 = vpop.f32.mrb[33].mxu1 }
 0xfb5   :  { %v8722_v53 = vpop.f32.mrb[34].mxu1 }
 0xfb6   :  { %v21240_v44 = vadd.f32 %v8722_v53, %v8648_v18  ;;  %v16887_v4 = vpop.f32.mrb[35].mxu1  ;;  %v21885_v53 = vld [vmem:[#allocation6_spill] sm:$0xff] }
 0xfb7   :  { %v21886_v4 = vpack.c.bf16 %v20262_v22, %v21885_v53 }
 0xfbc   :  { %13212 = vrot.lane.b32.xlu1 %v19874_v11, %s19327_s23 }
 0xfc0   :  { %13210 = vrot.lane.b32.xlu1 %v19825_v61, %s19327_s23 }
 0xfea   :  { %v9217_v59 = vpop.f32.mrb[36].mxu1 }
 0xfeb   :  { %v16929_v5 = vpop.f32.mrb[37].mxu1  ;;  %v9221_v25 = vsel %vm2726_vm4, %v9217_v59, -inf }
 0xfec   :  { %9222 = vmax.xlane.f32.xlu1 %v9221_v25  ;;  %v21887_v5 = vld [vmem:[#allocation8_spill] sm:$0xff] }
0x1038   :  { %v12198_v33 = vpop.xlane.xlu1 %12197 }
0x1039   :  { %v12199_v52 = vsub.f32 %v12192_v37, %v12198_v33 }
0x103b   :  { %v12200_v15 = vmul.f32 1.442695, %v12199_v52 }
0x103c   :  { %v13213_v11 = vpop.permute.xlu1 %13212 }
0x103d   :  { %19276 = vpow2.f32 %v12200_v15  ;;  %v13218_v22 = vsel %vm2257_vm3, %v13213_v11, 0 }
0x103e   :  { %v13223_v52 = vand.u32 4294901760, %v13218_v22 }
0x1040   :  { %v13211_v19 = vpop.permute.xlu1 %13210 }
0x1041   :  { %v13216_v25 = vsel %vm2257_vm3, %v13211_v19, 0 }
0x1042   :  { %v21276_v15 = vand.u32 4294901760, %v13216_v25 }
0x1047   :  { %v19277_v6 = vpop.eup %19276 }
0x1048   :  { %v12202_v1 = vsel %vm2726_vm4, %v19277_v6, 0.0 }
0x1049   :  { %12203 = vadd.xlane.f32.xlu0 %v12202_v1  ;;  %v13301_v1 = vsub.f32 %v13218_v22, %v13223_v52 }
0x104b   :  { %v13302_v11 = vand.u32 4294901760, %v13301_v1 }
0x105f   :  { %13214 = vrot.lane.b32.xlu0 %v19888_v34, %s19327_s23 }
0x1079   :  { %v9223_v31 = vpop.xlane.xlu1 %9222 }
0x107a   :  { %v9224_v61 = vsub.f32 %v9217_v59, %v9223_v31  ;;  %v13290_v31 = vsub.f32 %v13216_v25, %v21276_v15  ;;  %v21888_v25 = vld [vmem:[#allocation10_spill] sm:$0xff] }
0x107c   :  { %v9225_v8 = vmul.f32 1.442695, %v9224_v61 }
0x107e   :  { %19278 = vpow2.f32 %v9225_v8  ;;  %v13291_v8 = vand.u32 4294901760, %v13290_v31 }
0x1088   :  { %v21250_v60 = vpop.eup %19278 }
0x1089   :  { %v9227_v21 = vsel %vm2726_vm4, %v21250_v60, 0.0 }
0x108a   :  { %9228 = vadd.xlane.f32.xlu0 %v9227_v21 }
0x10d6   :  { %v12204_v26 = vpop.xlane.xlu0 %12203 }
0x10d7   :  { %19280 = vrcp.f32 %v12204_v26 }
0x10e1   :  { %v19281_v55 = vpop.eup %19280 }
0x10e2   :  { %v12206_v37 = vmul.f32 %v19281_v55, %v19277_v6  ;;  %v13292_v55 = vsub.f32 %v13290_v31, %v13291_v8 }
0x10e4   :  { %v12208_v38 = vsel %vm2726_vm4, %v12206_v37, 0 }
0x10e5   :  { %v12277_v56 = vand.u32 4294901760, %v12208_v38 }
0x10e7   :  { %v12278_v34 = vsub.f32 %v12208_v38, %v12277_v56 }
0x10e9   :  { %v12279_v7 = vand.u32 4294901760, %v12278_v34 }
0x10eb   :  { %v12280_v18 = vsub.f32 %v12278_v34, %v12279_v7 }
0x10ed   :  { %v12281_v24 = vand.u32 4294901760, %v12280_v18 }
0x10ef   :  { %17331 = vmatmul.mubr.f32.vlgmr.msra.gmra.mrb[30].mxu0 %v12281_v24 }
0x10f0   :  { %18645 = vmatpush3.bf16.msra.mxu0 %v20292_v13  ;;  %17337 = vmatprep.mubr.msk.f32.mxu0 %vm19326_vm2, %v21841_v20  ;;  %v13215_v13 = vpop.permute.xlu0 %13214 }
0x10f1   :  { %18646 = vmatprep.subr.bf16.mxu0 %v21842_v28  ;;  %v13220_v59 = vsel %vm2257_vm3, %v13215_v13, 0 }
0x10f2   :  { %v13226_v33 = vand.u32 4294901760, %v13220_v59 }
0x10f4   :  { %v13308_v6 = vsub.f32 %v13220_v59, %v13226_v33  ;;  %v18731_v19 = vpack.c.bf16 %v13226_v33, %v13223_v52  ;;  %v21889_v33 = vld [vmem:[#allocation7_spill] sm:$0xff]  ;;  %v21890_v52 = vld [vmem:[#allocation5_spill] sm:$0xff] }
0x10f6   :  { %v13309_v61 = vand.u32 4294901760, %v13308_v6 }
0x10f7   :  { %17338 = vmatmul.mubr.f32.vlgmr.msra.gmra.mrb[30].mxu0 %v12277_v56 }
0x10f8   :  { %18648 = vmatpush3.bf16.msra.mxu0 %v21886_v4  ;;  %17344 = vmatprep.mubr.msk.f32.mxu0 %vm19326_vm2, %v21841_v20  ;;  %v13310_v21 = vsub.f32 %v13308_v6, %v13309_v61  ;;  %v18737_v4 = vpack.c.bf16 %v13308_v6, %v13301_v1  ;;  %v21891_v6 = vpack.c.bf16 %v21889_v33, %v21890_v52  ;;  %v21907_v33 = vld [vmem:[#allocation22_spill] sm:$0xff]  ;;  %v21908_v52 = vld [vmem:[#allocation23_spill] sm:$0xff] }
0x10f9   :  { %18649 = vmatprep.subr.bf16.mxu0 %v21842_v28 }
0x10fa   :  { %v13311_v37 = vand.u32 4294901760, %v13310_v21 }
0x10ff   :  { %17345 = vmatmul.mubr.f32.vlgmr.msra.gmra.mrb[30].mxu0 %v12278_v34  ;;  %v13293_v34 = vand.u32 4294901760, %v13292_v55 }
0x1100   :  { %18651 = vmatpush3.bf16.msra.mxu0 %v21183_v0  ;;  %17351 = vmatprep.mubr.msk.f32.mxu0 %vm19326_vm2, %v21841_v20 }
0x1101   :  { %18652 = vmatprep.subr.bf16.mxu0 %v21842_v28 }
0x1107   :  { %17352 = vmatmul.mubr.f32.vlgmr.msra.gmra.mrb[30].mxu0 %v12279_v7 }
0x1108   :  { %18654 = vmatpush3.bf16.msra.mxu0 %v21887_v5  ;;  %17358 = vmatprep.mubr.msk.f32.mxu0 %vm19326_vm2, %v21841_v20 }
0x1109   :  { %18655 = vmatprep.subr.bf16.mxu0 %v21842_v28 }
0x110f   :  { %17359 = vmatmul.mubr.f32.vlgmr.msra.gmra.mrb[30].mxu0 %v12277_v56 }
0x1110   :  { %18657 = vmatpush3.bf16.msra.mxu0 %v21183_v0  ;;  %17365 = vmatprep.mubr.msk.f32.mxu0 %vm19326_vm2, %v21841_v20  ;;  %v13303_v0 = vsub.f32 %v13301_v1, %v13302_v11  ;;  %v21892_v1 = vld [vmem:[#allocation9_spill] sm:$0xff] }
0x1111   :  { %18730 = vmatprep.subr.bf16.mxu0 %v21842_v28 }
0x1112   :  { %v13304_v38 = vand.u32 4294901760, %v13303_v0 }
0x1114   :  { %v18734_v7 = vpack.c.bf16 %v13311_v37, %v13304_v38 }
0x1117   :  { %17366 = vmatmul.mubr.f32.vlgmr.msra.gmra.mrb[30].mxu0 %v12277_v56  ;;  %v9229_v26 = vpop.xlane.xlu0 %9228 }
0x1118   :  { %19282 = vrcp.f32 %v9229_v26  ;;  %17486 = vmatprep.mubr.msk.f32.mxu0 %vm19326_vm2, %v21841_v20 }
0x1119   :  { %18732 = vmatpush3.bf16.xpose.msra.mxu0 %v18731_v19 }
0x111a   :  { %18733 = vmatprep.subr.bf16.mxu0 %v21842_v28 }
0x1120   :  { %17487 = vmatmul.mubr.f32.vlgmr.msra.gmra.mrb[32].mxu0 %v13293_v34 }
0x1121   :  { %18735 = vmatpush3.bf16.xpose.msra.mxu0 %v18734_v7  ;;  %17493 = vmatprep.mubr.msk.f32.mxu0 %vm19326_vm2, %v21841_v20 }
0x1122   :  { %v19283_v56 = vpop.eup %19282  ;;  %18736 = vmatprep.subr.bf16.mxu0 %v21842_v28 }
0x1123   :  { %v9231_v18 = vmul.f32 %v19283_v56, %v21250_v60  ;;  %v18743_v60 = vpack.c.bf16 %v13309_v61, %v13302_v11  ;;  %v21895_v61 = vld [vmem:[#allocation13_spill] sm:$0xff] }
0x1125   :  { %v9233_v24 = vsel %vm2726_vm4, %v9231_v18, 0 }
0x1126   :  { %v9302_v53 = vand.u32 4294901760, %v9233_v24 }
0x1128   :  { %17494 = vmatmul.mubr.f32.vlgmr.msra.gmra.mrb[32].mxu0 %v21276_v15  ;;  %v9303_v13 = vsub.f32 %v9233_v24, %v9302_v53  ;;  %v21897_v24 = vld [vmem:[#allocation24_spill] sm:$0xff] }
0x1129   :  { %18738 = vmatpush3.bf16.xpose.msra.mxu0 %v18737_v4  ;;  %17500 = vmatprep.mubr.msk.f32.mxu0 %vm19326_vm2, %v21841_v20  ;;  %v21899_v4 = vld [vmem:[#allocation16_spill] sm:$0xff] }
0x112a   :  { %18739 = vmatprep.subr.bf16.mxu0 %v21842_v28  ;;  %v9304_v59 = vand.u32 4294901760, %v9303_v13 }
0x112c   :  { %v9305_v5 = vsub.f32 %v9303_v13, %v9304_v59 }
0x112e   :  { %v9306_v22 = vand.u32 4294901760, %v9305_v5  ;;  %v21903_v5 = vld [vmem:[#allocation19_spill] sm:$0xff] }
0x1130   :  { %17501 = vmatmul.mubr.f32.vlgmr.msra.gmra.mrb[32].mxu0 %v13290_v31  ;;  %16935 = vmatmul.mubr.f32.vlgmr.msra.gmra.mrb[38].mxu1 %v9306_v22  ;;  %v21894_v31 = vld [vmem:[#allocation12_spill] sm:$0xff] }
0x1131   :  { %18429 = vmatpush3.bf16.msra.mxu1 %v21888_v25  ;;  %18741 = vmatpush3.bf16.xpose.msra.mxu0 %v18731_v19  ;;  %v21904_v22 = vld [vmem:[#allocation20_spill] sm:$0xff]  ;;  %v21905_v25 = vld [vmem:[#allocation26_spill] sm:$0xff] }
0x1132   :  { %17507 = vmatprep.mubr.msk.f32.mxu0 %vm19326_vm2, %v21841_v20  ;;  %16941 = vmatprep.mubr.msk.f32.mxu1 %vm19326_vm2, %v21841_v20 }
0x1133   :  { %18430 = vmatprep.subr.bf16.mxu1 %v21842_v28  ;;  %18742 = vmatprep.subr.bf16.mxu0 %v21842_v28 }
0x1138   :  { %17508 = vmatmul.mubr.f32.vlgmr.msra.gmra.mrb[32].mxu0 %v13291_v8  ;;  %16942 = vmatmul.mubr.f32.vlgmr.msra.gmra.mrb[38].mxu1 %v9302_v53 }
0x1139   :  { %18432 = vmatpush3.bf16.msra.mxu1 %v21891_v6  ;;  %18744 = vmatpush3.bf16.xpose.msra.mxu0 %v18743_v60  ;;  %v21906_v60 = vld [vmem:[#allocation21_spill] sm:$0xff]  ;;  %v11188_v6 = vsel %vm2257_vm3, %v21234_v39, 0 }
0x113a   :  { %17514 = vmatprep.mubr.msk.f32.mxu0 %vm19326_vm2, %v21841_v20  ;;  %16948 = vmatprep.mubr.msk.f32.mxu1 %vm19326_vm2, %v21841_v20 }
0x113b   :  { %18433 = vmatprep.subr.bf16.mxu1 %v21842_v28  ;;  %18745 = vmatprep.subr.bf16.mxu0 %v21842_v28 }
0x1140   :  { %17515 = vmatmul.mubr.f32.vlgmr.msra.gmra.mrb[32].mxu0 %v21276_v15  ;;  %16949 = vmatmul.mubr.f32.vlgmr.msra.gmra.mrb[38].mxu1 %v9303_v13  ;;  %v21900_v13 = vld [vmem:[#allocation17_spill] sm:$0xff] }
0x1141   :  { %18435 = vmatpush3.bf16.msra.mxu1 %v21228_v43  ;;  %18747 = vmatpush3.bf16.xpose.msra.mxu0 %v18731_v19 }
0x1142   :  { %17521 = vmatprep.mubr.msk.f32.mxu0 %vm19326_vm2, %v21841_v20  ;;  %16955 = vmatprep.mubr.msk.f32.mxu1 %vm19326_vm2, %v21841_v20 }
0x1143   :  { %18436 = vmatprep.subr.bf16.mxu1 %v21842_v28  ;;  %18748 = vmatprep.subr.bf16.mxu0 %v21842_v28 }
0x1148   :  { %17522 = vmatmul.mubr.f32.vlgmr.msra.gmra.mrb[32].mxu0 %v21276_v15  ;;  %16956 = vmatmul.mubr.f32.vlgmr.msra.gmra.mrb[38].mxu1 %v9304_v59  ;;  %v21893_v15 = vld [vmem:[#allocation11_spill] sm:$0xff]  ;;  %v21902_v59 = vld [vmem:[#allocation18_spill] sm:$0xff] }
0x1149   :  { %18438 = vmatpush3.bf16.msra.mxu1 %v21892_v1  ;;  %16962 = vmatprep.mubr.msk.f32.mxu1 %vm19326_vm2, %v21841_v20  ;;  %v21400_v1 = vand.u32 4294901760, %v11188_v6 }
0x114a   :  { %18439 = vmatprep.subr.bf16.mxu1 %v21842_v28  ;;  %17528 = vmatprep.mubr.msk.f32.mxu0 %vm19326_vm2, %v21841_v20 }
0x1150   :  { %16963 = vmatmul.mubr.f32.vlgmr.msra.gmra.mrb[38].mxu1 %v9302_v53 }
0x1151   :  { %18441 = vmatpush3.bf16.msra.mxu1 %v21228_v43  ;;  %16969 = vmatprep.mubr.msk.f32.mxu1 %vm19326_vm2, %v21841_v20  ;;  %v21896_v43 = vld [vmem:[#allocation14_spill] sm:$0xff] }
0x1152   :  { %18442 = vmatprep.subr.bf16.mxu1 %v21842_v28 }
0x1158   :  { %16970 = vmatmul.mubr.f32.vlgmr.msra.gmra.mrb[38].mxu1 %v9302_v53  ;;  %v21898_v53 = vld [vmem:[#allocation15_spill] sm:$0xff] }
0x1159   :  { %18444 = vmatpush3.bf16.msra.mxu1 %v21893_v15  ;;  %16988 = vmatprep.mubr.msk.f32.mxu1 %vm19326_vm2, %v21841_v20 }
0x115a   :  { %18445 = vmatprep.subr.bf16.mxu1 %v21842_v28 }
0x115d   :  { %18447 = vmatpush3.bf16.msra.mxu1 %v21894_v31 }
0x115e   :  { %18448 = vmatprep.subr.bf16.mxu1 %v21842_v28 }
0x1161   :  { %18450 = vmatpush3.bf16.msra.mxu1 %v21895_v61 }
0x1162   :  { %18451 = vmatprep.subr.bf16.mxu1 %v21842_v28 }
0x1165   :  { %18453 = vmatpush3.bf16.msra.mxu1 %v21896_v43 }
0x1166   :  { %18454 = vmatprep.subr.bf16.mxu1 %v21842_v28 }
0x11ea   :  { %v21340_v11 = vpop.f32.mrb[30].mxu0 }
0x11eb   :  { %v17367_v8 = vpop.f32.mrb[31].mxu0 }
0x11ec   :  { %v21914_v8 = vld [vmem:[#allocation41_spill] sm:$0xff] }
0x121b   :  { %v21342_v19 = vpop.f32.mrb[32].mxu0 }
0x121c   :  { %v17523_v21 = vpop.f32.mrb[33].mxu0  ;;  %v13681_v26 = vsel %vm2726_vm4, %v21342_v19, -inf }
0x121d   :  { %13682 = vmax.xlane.f32.xlu0 %v13681_v26  ;;  %v21916_v21 = vld [vmem:[#allocation33_spill] sm:$0xff]  ;;  %v21917_v26 = vld [vmem:[#allocation34_spill] sm:$0xff] }
0x122b   :  { %v9690_v0 = vpop.f32.mrb[38].mxu1 }
0x122c   :  { %v9695_v55 = vsel %vm2257_vm3, %v9690_v0, 0  ;;  %v16971_v37 = vpop.f32.mrb[39].mxu1  ;;  %v21918_v0 = vld [vmem:[#allocation42_spill] sm:$0xff] }
0x122d   :  { %v9770_v38 = vand.u32 4294901760, %v9695_v55  ;;  %v21920_v37 = vld [vmem:[#allocation36_spill] sm:$0xff] }
0x122f   :  { %v9771_v34 = vsub.f32 %v9695_v55, %v9770_v38  ;;  %v21919_v55 = vld [vmem:[#allocation35_spill] sm:$0xff] }
0x1231   :  { %v9772_v7 = vand.u32 4294901760, %v9771_v34 }
0x1233   :  { %v9773_v56 = vsub.f32 %v9771_v34, %v9772_v7  ;;  %13694 = vrot.lane.b32.xlu0 %v20205_v27, %s19327_s23  ;;  %v21901_v27 = vld [vmem:[#allocation25_spill] sm:$0xff] }
0x1235   :  { %v9774_v18 = vand.u32 4294901760, %v9773_v56  ;;  %v21924_v56 = vld [vmem:[#allocation39_spill] sm:$0xff] }
0x1237   :  { %16989 = vmatmul.mubr.f32.vlgmr.msra.gmra.mrb[40].mxu1 %v9774_v18  ;;  %v21925_v18 = vld [vmem:[#allocation40_spill] sm:$0xff] }
0x1238   :  { %18456 = vmatpush3.bf16.msra.mxu1 %v21897_v24  ;;  %17007 = vmatprep.mubr.msk.f32.mxu1 %vm19326_vm2, %v21841_v20 }
0x1239   :  { %18457 = vmatprep.subr.bf16.mxu1 %v21842_v28 }
0x123c   :  { %18459 = vmatpush3.bf16.msra.mxu1 %v21898_v53 }
0x123d   :  { %18460 = vmatprep.subr.bf16.mxu1 %v21842_v28 }
0x1240   :  { %18462 = vmatpush3.bf16.msra.mxu1 %v21899_v4 }
0x1241   :  { %18463 = vmatprep.subr.bf16.mxu1 %v21842_v28 }
0x1244   :  { %18465 = vmatpush3.bf16.msra.mxu1 %v21900_v13 }
0x1245   :  { %18466 = vmatprep.subr.bf16.mxu1 %v21842_v28 }
0x1247   :  { %17008 = vmatmul.mubr.f32.vlgmr.msra.gmra.mrb[40].mxu1 %v9770_v38 }
0x1248   :  { %18468 = vmatpush3.bf16.msra.mxu1 %v21901_v27  ;;  %17026 = vmatprep.mubr.msk.f32.mxu1 %vm19326_vm2, %v21841_v20 }
0x1249   :  { %18469 = vmatprep.subr.bf16.mxu1 %v21842_v28 }
0x124c   :  { %18471 = vmatpush3.bf16.msra.mxu1 %v21902_v59 }
0x124d   :  { %18472 = vmatprep.subr.bf16.mxu1 %v21842_v28 }
0x1250   :  { %18474 = vmatpush3.bf16.msra.mxu1 %v21903_v5 }
0x1251   :  { %18475 = vmatprep.subr.bf16.mxu1 %v21842_v28 }
0x1254   :  { %18477 = vmatpush3.bf16.msra.mxu1 %v21904_v22 }
0x1255   :  { %18478 = vmatprep.subr.bf16.mxu1 %v21842_v28 }
0x1257   :  { %17027 = vmatmul.mubr.f32.vlgmr.msra.gmra.mrb[40].mxu1 %v9771_v34  ;;  %v21922_v34 = vld [vmem:[#allocation43_spill] sm:$0xff] }
0x1258   :  { %18480 = vmatpush3.bf16.msra.mxu1 %v21893_v15  ;;  %17045 = vmatprep.mubr.msk.f32.mxu1 %vm19326_vm2, %v21841_v20 }
0x1259   :  { %18481 = vmatprep.subr.bf16.mxu1 %v21842_v28 }
0x125c   :  { %18483 = vmatpush3.bf16.msra.mxu1 %v21894_v31 }
0x125d   :  { %18484 = vmatprep.subr.bf16.mxu1 %v21842_v28 }
0x1260   :  { %18486 = vmatpush3.bf16.msra.mxu1 %v21895_v61 }
0x1261   :  { %18487 = vmatprep.subr.bf16.mxu1 %v21842_v28 }
0x1264   :  { %18489 = vmatpush3.bf16.msra.mxu1 %v21896_v43 }
0x1265   :  { %18490 = vmatprep.subr.bf16.mxu1 %v21842_v28 }
0x1267   :  { %17046 = vmatmul.mubr.f32.vlgmr.msra.gmra.mrb[40].mxu1 %v9772_v7  ;;  %v21923_v7 = vld [vmem:[#allocation38_spill] sm:$0xff] }
0x1268   :  { %18492 = vmatpush3.bf16.msra.mxu1 %v21905_v25  ;;  %17064 = vmatprep.mubr.msk.f32.mxu1 %vm19326_vm2, %v21841_v20 }
0x1269   :  { %18493 = vmatprep.subr.bf16.mxu1 %v21842_v28 }
0x126c   :  { %18495 = vmatpush3.bf16.msra.mxu1 %v21906_v60 }
0x126d   :  { %18496 = vmatprep.subr.bf16.mxu1 %v21842_v28 }
0x1270   :  { %18498 = vmatpush3.bf16.msra.mxu1 %v21907_v33 }
0x1271   :  { %18499 = vmatprep.subr.bf16.mxu1 %v21842_v28 }
0x1274   :  { %18501 = vmatpush3.bf16.msra.mxu1 %v21908_v52 }
0x1275   :  { %18502 = vmatprep.subr.bf16.mxu1 %v21842_v28 }
0x1277   :  { %17065 = vmatmul.mubr.f32.vlgmr.msra.gmra.mrb[40].mxu1 %v9770_v38 }
0x1278   :  { %18504 = vmatpush3.bf16.msra.mxu1 %v21893_v15  ;;  %17083 = vmatprep.mubr.msk.f32.mxu1 %vm19326_vm2, %v21841_v20  ;;  %v11264_v15 = vsub.f32 %v11188_v6, %v21400_v1 }
0x1279   :  { %18505 = vmatprep.subr.bf16.mxu1 %v21842_v28 }
0x127c   :  { %18507 = vmatpush3.bf16.msra.mxu1 %v21894_v31  ;;  %v11265_v31 = vand.u32 4294901760, %v11264_v15 }
0x127d   :  { %18508 = vmatprep.subr.bf16.mxu1 %v21842_v28 }
0x127e   :  { %v11266_v39 = vsub.f32 %v11264_v15, %v11265_v31 }
0x1280   :  { %18510 = vmatpush3.bf16.msra.mxu1 %v21895_v61  ;;  %v11267_v61 = vand.u32 4294901760, %v11266_v39 }
0x1281   :  { %18511 = vmatprep.subr.bf16.mxu1 %v21842_v28 }
0x1284   :  { %18513 = vmatpush3.bf16.msra.mxu1 %v21896_v43  ;;  %v21913_v43 = vld [vmem:[#allocation31_spill] sm:$0xff] }
0x1285   :  { %18550 = vmatprep.subr.bf16.mxu1 %v21842_v28 }
0x1287   :  { %17084 = vmatmul.mubr.f32.vlgmr.msra.gmra.mrb[40].mxu1 %v9770_v38  ;;  %v21921_v38 = vld [vmem:[#allocation37_spill] sm:$0xff] }
0x1288   :  { %18552 = vmatpush3.bf16.msra.mxu1 %v20551_v3  ;;  %17186 = vmatprep.mubr.msk.f32.mxu1 %vm19326_vm2, %v21841_v20 }
0x1289   :  { %18553 = vmatprep.subr.bf16.mxu1 %v21842_v28 }
0x128c   :  { %18555 = vmatpush3.bf16.msra.mxu1 %v20573_v29 }
0x128d   :  { %18556 = vmatprep.subr.bf16.mxu1 %v21842_v28 }
0x1290   :  { %18558 = vmatpush3.bf16.msra.mxu1 %v20576_v12 }
0x1291   :  { %18559 = vmatprep.subr.bf16.mxu1 %v21842_v28 }
0x1294   :  { %18561 = vmatpush3.bf16.msra.mxu1 %v20580_v16 }
0x1295   :  { %18562 = vmatprep.subr.bf16.mxu1 %v21842_v28 }
0x1297   :  { %17187 = vmatmul.mubr.f32.vlgmr.msra.gmra.mrb[40].mxu1 %v11267_v61 }
0x1298   :  { %18564 = vmatpush3.bf16.msra.mxu1 %v20585_v47  ;;  %17205 = vmatprep.mubr.msk.f32.mxu1 %vm19326_vm2, %v21841_v20 }
0x1299   :  { %18565 = vmatprep.subr.bf16.mxu1 %v21842_v28 }
0x129c   :  { %18567 = vmatpush3.bf16.msra.mxu1 %v20587_v63 }
0x129d   :  { %18568 = vmatprep.subr.bf16.mxu1 %v21842_v28 }
0x12a0   :  { %18570 = vmatpush3.bf16.msra.mxu1 %v20589_v46 }
0x12a1   :  { %18571 = vmatprep.subr.bf16.mxu1 %v21842_v28 }
0x12a4   :  { %18573 = vmatpush3.bf16.msra.mxu1 %v20593_v17 }
0x12a5   :  { %18574 = vmatprep.subr.bf16.mxu1 %v21842_v28 }
0x12a7   :  { %17206 = vmatmul.mubr.f32.vlgmr.msra.gmra.mrb[40].mxu1 %v21400_v1 }
0x12a8   :  { %18576 = vmatpush3.bf16.msra.mxu1 %v20591_v36  ;;  %17224 = vmatprep.mubr.msk.f32.mxu1 %vm19326_vm2, %v21841_v20 }
0x12a9   :  { %18577 = vmatprep.subr.bf16.mxu1 %v21842_v28 }
0x12aa   :  { %v13683_v47 = vpop.xlane.xlu0 %13682 }
0x12ab   :  { %v13684_v63 = vsub.f32 %v21342_v19, %v13683_v47  ;;  %v21915_v19 = vld [vmem:[#allocation32_spill] sm:$0xff] }
0x12ac   :  { %18579 = vmatpush3.bf16.msra.mxu1 %v20595_v14  ;;  %v21909_v14 = vld [vmem:[#allocation27_spill] sm:$0xff] }
0x12ad   :  { %v13685_v46 = vmul.f32 1.442695, %v13684_v63  ;;  %18580 = vmatprep.subr.bf16.mxu1 %v21842_v28 }
0x12af   :  { %19284 = vpow2.f32 %v13685_v46 }
0x12b0   :  { %18582 = vmatpush3.bf16.msra.mxu1 %v20597_v57  ;;  %v21910_v57 = vld [vmem:[#allocation28_spill] sm:$0xff] }
0x12b1   :  { %18583 = vmatprep.subr.bf16.mxu1 %v21842_v28 }
0x12b4   :  { %18585 = vmatpush3.bf16.msra.mxu1 %v20599_v54  ;;  %v21911_v54 = vld [vmem:[#allocation29_spill] sm:$0xff] }
0x12b5   :  { %18586 = vmatprep.subr.bf16.mxu1 %v21842_v28 }
0x12b7   :  { %17225 = vmatmul.mubr.f32.vlgmr.msra.gmra.mrb[40].mxu1 %v11264_v15 }
0x12b8   :  { %18588 = vmatpush3.bf16.msra.mxu1 %v20551_v3  ;;  %17243 = vmatprep.mubr.msk.f32.mxu1 %vm19326_vm2, %v21841_v20 }
0x12b9   :  { %v21439_v36 = vpop.eup %19284  ;;  %18589 = vmatprep.subr.bf16.mxu1 %v21842_v28 }
0x12ba   :  { %v13687_v17 = vsel %vm2726_vm4, %v21439_v36, 0.0 }
0x12bb   :  { %13688 = vadd.xlane.f32.xlu1 %v13687_v17 }
0x12bc   :  { %18591 = vmatpush3.bf16.msra.mxu1 %v20573_v29 }
0x12bd   :  { %18592 = vmatprep.subr.bf16.mxu1 %v21842_v28 }
0x12c0   :  { %18594 = vmatpush3.bf16.msra.mxu1 %v20576_v12 }
0x12c1   :  { %18595 = vmatprep.subr.bf16.mxu1 %v21842_v28 }
0x12c4   :  { %18597 = vmatpush3.bf16.msra.mxu1 %v20580_v16 }
0x12c5   :  { %18598 = vmatprep.subr.bf16.mxu1 %v21842_v28 }
0x12c7   :  { %17244 = vmatmul.mubr.f32.vlgmr.msra.gmra.mrb[40].mxu1 %v11265_v31 }
0x12c8   :  { %18600 = vmatpush3.bf16.msra.mxu1 %v20601_v2  ;;  %17262 = vmatprep.mubr.msk.f32.mxu1 %vm19326_vm2, %v21841_v20 }
0x12c9   :  { %18601 = vmatprep.subr.bf16.mxu1 %v21842_v28 }
0x12cc   :  { %13696 = vrot.lane.b32.xlu1 %v20211_v32, %s19327_s23  ;;  %18603 = vmatpush3.bf16.msra.mxu1 %v21909_v14  ;;  %v12670_v32 = vsel %vm2257_vm3, %v21340_v11, 0 }
0x12cd   :  { %18604 = vmatprep.subr.bf16.mxu1 %v21842_v28  ;;  %v21474_v2 = vand.u32 4294901760, %v12670_v32 }
0x12d0   :  { %18606 = vmatpush3.bf16.msra.mxu1 %v21910_v57 }
0x12d1   :  { %18607 = vmatprep.subr.bf16.mxu1 %v21842_v28 }
0x12d4   :  { %18609 = vmatpush3.bf16.msra.mxu1 %v21911_v54 }
0x12d5   :  { %18610 = vmatprep.subr.bf16.mxu1 %v21842_v28 }
0x12d7   :  { %17263 = vmatmul.mubr.f32.vlgmr.msra.gmra.mrb[40].mxu1 %v21400_v1 }
0x12d8   :  { %18612 = vmatpush3.bf16.msra.mxu1 %v20551_v3  ;;  %17281 = vmatprep.mubr.msk.f32.mxu1 %vm19326_vm2, %v21841_v20  ;;  %v12746_v3 = vsub.f32 %v12670_v32, %v21474_v2 }
0x12d9   :  { %18613 = vmatprep.subr.bf16.mxu1 %v21842_v28 }
0x12dc   :  { %18615 = vmatpush3.bf16.msra.mxu1 %v20573_v29  ;;  %v12747_v29 = vand.u32 4294901760, %v12746_v3 }
0x12dd   :  { %18616 = vmatprep.subr.bf16.mxu1 %v21842_v28 }
0x12e0   :  { %18618 = vmatpush3.bf16.msra.mxu1 %v20576_v12  ;;  %v12748_v12 = vsub.f32 %v12746_v3, %v12747_v29 }
0x12e1   :  { %18619 = vmatprep.subr.bf16.mxu1 %v21842_v28 }
0x12e2   :  { %v12749_v11 = vand.u32 4294901760, %v12748_v12  ;;  %v21926_v12 = vld [vmem:[#allocation53_spill] sm:$0xff] }
0x12e4   :  { %18621 = vmatpush3.bf16.msra.mxu1 %v20580_v16  ;;  %v21912_v16 = vld [vmem:[#allocation30_spill] sm:$0xff] }
0x12e5   :  { %18658 = vmatprep.subr.bf16.mxu1 %v21842_v28 }
0x12e7   :  { %17282 = vmatmul.mubr.f32.vlgmr.msra.gmra.mrb[40].mxu1 %v21400_v1 }
0x12e8   :  { %18660 = vmatpush3.bf16.msra.mxu1 %v20686_v62  ;;  %17384 = vmatprep.mubr.msk.f32.mxu1 %vm19326_vm2, %v21841_v20 }
0x12e9   :  { %18661 = vmatprep.subr.bf16.mxu1 %v21842_v28 }
0x12ec   :  { %18663 = vmatpush3.bf16.msra.mxu1 %v20754_v51 }
0x12ed   :  { %18664 = vmatprep.subr.bf16.mxu1 %v21842_v28 }
0x12f0   :  { %18666 = vmatpush3.bf16.msra.mxu1 %v21912_v16 }
0x12f1   :  { %18667 = vmatprep.subr.bf16.mxu1 %v21842_v28 }
0x12f4   :  { %18669 = vmatpush3.bf16.msra.mxu1 %v21913_v43 }
0x12f5   :  { %18670 = vmatprep.subr.bf16.mxu1 %v21842_v28 }
0x12f7   :  { %17385 = vmatmul.mubr.f32.vlgmr.msra.gmra.mrb[40].mxu1 %v12749_v11  ;;  %v21928_v11 = vld [vmem:[#allocation45_spill] sm:$0xff] }
0x12f8   :  { %18672 = vmatpush3.bf16.msra.mxu1 %v21914_v8  ;;  %17403 = vmatprep.mubr.msk.f32.mxu1 %vm19326_vm2, %v21841_v20  ;;  %v21929_v8 = vld [vmem:[#allocation46_spill] sm:$0xff] }
0x12f9   :  { %18673 = vmatprep.subr.bf16.mxu1 %v21842_v28 }
0x12fc   :  { %18675 = vmatpush3.bf16.msra.mxu1 %v21915_v19  ;;  %v21930_v19 = vld [vmem:[#allocation54_spill] sm:$0xff] }
0x12fd   :  { %18676 = vmatprep.subr.bf16.mxu1 %v21842_v28 }
0x1300   :  { %18678 = vmatpush3.bf16.msra.mxu1 %v21916_v21  ;;  %v21931_v21 = vld [vmem:[#allocation47_spill] sm:$0xff] }
0x1301   :  { %18679 = vmatprep.subr.bf16.mxu1 %v21842_v28 }
0x1304   :  { %18681 = vmatpush3.bf16.msra.mxu1 %v21917_v26  ;;  %v21932_v26 = vld [vmem:[#allocation48_spill] sm:$0xff] }
0x1305   :  { %18682 = vmatprep.subr.bf16.mxu1 %v21842_v28 }
0x1307   :  { %17404 = vmatmul.mubr.f32.vlgmr.msra.gmra.mrb[40].mxu1 %v21474_v2 }
0x1308   :  { %18684 = vmatpush3.bf16.msra.mxu1 %v21918_v0  ;;  %17422 = vmatprep.mubr.msk.f32.mxu1 %vm19326_vm2, %v21841_v20  ;;  %v21933_v0 = vld [vmem:[#allocation49_spill] sm:$0xff] }
0x1309   :  { %18685 = vmatprep.subr.bf16.mxu1 %v21842_v28 }
0x130c   :  { %18687 = vmatpush3.bf16.msra.mxu1 %v21919_v55  ;;  %v21934_v55 = vld [vmem:[#allocation55_spill] sm:$0xff] }
0x130d   :  { %18688 = vmatprep.subr.bf16.mxu1 %v21842_v28 }
0x1310   :  { %18690 = vmatpush3.bf16.msra.mxu1 %v21920_v37  ;;  %v21935_v37 = vld [vmem:[#allocation50_spill] sm:$0xff] }
0x1311   :  { %18691 = vmatprep.subr.bf16.mxu1 %v21842_v28 }
0x1314   :  { %18693 = vmatpush3.bf16.msra.mxu1 %v21921_v38  ;;  %v21936_v38 = vld [vmem:[#allocation51_spill] sm:$0xff] }
0x1315   :  { %18694 = vmatprep.subr.bf16.mxu1 %v21842_v28 }
0x1317   :  { %17423 = vmatmul.mubr.f32.vlgmr.msra.gmra.mrb[40].mxu1 %v12746_v3 }
0x1318   :  { %18696 = vmatpush3.bf16.msra.mxu1 %v20686_v62  ;;  %17441 = vmatprep.mubr.msk.f32.mxu1 %vm19326_vm2, %v21841_v20 }
0x1319   :  { %18697 = vmatprep.subr.bf16.mxu1 %v21842_v28 }
0x131c   :  { %18699 = vmatpush3.bf16.msra.mxu1 %v20754_v51 }
0x131d   :  { %18700 = vmatprep.subr.bf16.mxu1 %v21842_v28 }
0x1320   :  { %18702 = vmatpush3.bf16.msra.mxu1 %v21912_v16 }
0x1321   :  { %18703 = vmatprep.subr.bf16.mxu1 %v21842_v28 }
0x1324   :  { %18705 = vmatpush3.bf16.msra.mxu1 %v21913_v43 }
0x1325   :  { %18706 = vmatprep.subr.bf16.mxu1 %v21842_v28 }
0x1327   :  { %17442 = vmatmul.mubr.f32.vlgmr.msra.gmra.mrb[40].mxu1 %v12747_v29 }
0x1328   :  { %18708 = vmatpush3.bf16.msra.mxu1 %v21922_v34  ;;  %17460 = vmatprep.mubr.msk.f32.mxu1 %vm19326_vm2, %v21841_v20  ;;  %v21937_v34 = vld [vmem:[#allocation52_spill] sm:$0xff] }
0x1329   :  { %18709 = vmatprep.subr.bf16.mxu1 %v21842_v28 }
0x132c   :  { %18711 = vmatpush3.bf16.msra.mxu1 %v21923_v7  ;;  %v19296_v7 = vld [vmem:[%s21707_s4 + $0x120] ss:$0 sm:$0xff] }
0x132d   :  { %18712 = vmatprep.subr.bf16.mxu1 %v21842_v28 }
0x1330   :  { %18714 = vmatpush3.bf16.msra.mxu1 %v21924_v56 }
0x1331   :  { %18715 = vmatprep.subr.bf16.mxu1 %v21842_v28 }
0x1334   :  { %18717 = vmatpush3.bf16.msra.mxu1 %v21925_v18 }
0x1335   :  { %18718 = vmatprep.subr.bf16.mxu1 %v21842_v28 }
0x1337   :  { %17461 = vmatmul.mubr.f32.vlgmr.msra.gmra.mrb[40].mxu1 %v21474_v2 }
0x1338   :  { %18720 = vmatpush3.bf16.msra.mxu1 %v20686_v62  ;;  %17479 = vmatprep.mubr.msk.f32.mxu1 %vm19326_vm2, %v21841_v20 }
0x1339   :  { %18721 = vmatprep.subr.bf16.mxu1 %v21842_v28 }
0x133c   :  { %18723 = vmatpush3.bf16.msra.mxu1 %v20754_v51  ;;  %v13695_v51 = vpop.permute.xlu0 %13694 }
0x133d   :  { %18724 = vmatprep.subr.bf16.mxu1 %v21842_v28  ;;  %v13704_v53 = vand.u32 4294901760, %v13695_v51 }
0x133f   :  { %v13782_v59 = vsub.f32 %v13695_v51, %v13704_v53 }
0x1340   :  { %18726 = vmatpush3.bf16.msra.mxu1 %v21912_v16 }
0x1341   :  { %18727 = vmatprep.subr.bf16.mxu1 %v21842_v28  ;;  %v13783_v60 = vand.u32 4294901760, %v13782_v59 }
0x1343   :  { %v13784_v15 = vsub.f32 %v13782_v59, %v13783_v60 }
0x1344   :  { %18729 = vmatpush3.bf16.msra.mxu1 %v21913_v43  ;;  %v21927_v43 = vld [vmem:[#allocation44_spill] sm:$0xff] }
0x1345   :  { %18766 = vmatprep.subr.bf16.mxu1 %v21842_v28  ;;  %v13785_v47 = vand.u32 4294901760, %v13784_v15 }
0x1347   :  { %17480 = vmatmul.mubr.f32.vlgmr.msra.gmra.mrb[40].mxu1 %v21474_v2 }
0x1348   :  { %v13689_v62 = vpop.xlane.xlu1 %13688  ;;  %18768 = vmatpush3.bf16.msra.mxu1 %v20883_v23  ;;  %17582 = vmatprep.mubr.msk.f32.mxu1 %vm19326_vm2, %v21841_v20 }
0x1349   :  { %19286 = vrcp.f32 %v13689_v62  ;;  %18769 = vmatprep.subr.bf16.mxu1 %v21842_v28 }
0x134c   :  { %v13697_v24 = vpop.permute.xlu1 %13696  ;;  %18771 = vmatpush3.bf16.msra.mxu1 %v20924_v10 }
0x134d   :  { %v13707_v4 = vand.u32 4294901760, %v13697_v24  ;;  %18772 = vmatprep.subr.bf16.mxu1 %v21842_v28 }
0x134f   :  { %v18749_v13 = vpack.c.bf16 %v13707_v4, %v13704_v53  ;;  %v13789_v27 = vsub.f32 %v13697_v24, %v13707_v4 }
0x1350   :  { %18774 = vmatpush3.bf16.msra.mxu1 %v20927_v49 }
0x1351   :  { %18750 = vmatpush3.bf16.msra.mxu0 %v18749_v13  ;;  %18775 = vmatprep.subr.bf16.mxu1 %v21842_v28  ;;  %v13790_v25 = vand.u32 4294901760, %v13789_v27 }
0x1352   :  { %18751 = vmatprep.subr.bf16.mxu0 %v21842_v28 }
0x1353   :  { %v19287_v5 = vpop.eup %19286  ;;  %v13791_v6 = vsub.f32 %v13789_v27, %v13790_v25  ;;  %v18761_v17 = vpack.c.bf16 %v13790_v25, %v13783_v60 }
0x1354   :  { %v13691_v22 = vmul.f32 %v19287_v5, %v21439_v36  ;;  %18777 = vmatpush3.bf16.msra.mxu1 %v20931_v9  ;;  %v18755_v36 = vpack.c.bf16 %v13789_v27, %v13782_v59 }
0x1355   :  { %18778 = vmatprep.subr.bf16.mxu1 %v21842_v28  ;;  %v13792_v39 = vand.u32 4294901760, %v13791_v6 }
0x1356   :  { %v13701_v33 = vsel %vm2726_vm4, %v13691_v22, 0 }
0x1357   :  { %v13770_v52 = vand.u32 4294901760, %v13701_v33  ;;  %v18752_v46 = vpack.c.bf16 %v13792_v39, %v13785_v47 }
0x1359   :  { %v13771_v1 = vsub.f32 %v13701_v33, %v13770_v52 }
0x135b   :  { %v13772_v31 = vand.u32 4294901760, %v13771_v1 }
0x135d   :  { %v13773_v61 = vsub.f32 %v13771_v1, %v13772_v31 }
0x135f   :  { %v13774_v63 = vand.u32 4294901760, %v13773_v61  ;;  %v19298_v61 = vld [vmem:[%s21707_s4 + $0x123] ss:$0 sm:$0xff] }
0x1361   :  { %17529 = vmatmul.mubr.f32.vlgmr.msra.gmra.mrb[34].mxu0 %v13774_v63 }
0x1362   :  { %18753 = vmatpush3.bf16.msra.mxu0 %v18752_v46  ;;  %17535 = vmatprep.mubr.msk.f32.mxu0 %vm19326_vm2, %v21841_v20 }
0x1363   :  { %18754 = vmatprep.subr.bf16.mxu0 %v21842_v28 }
0x1369   :  { %17536 = vmatmul.mubr.f32.vlgmr.msra.gmra.mrb[34].mxu0 %v13770_v52 }
0x136a   :  { %18756 = vmatpush3.bf16.msra.mxu0 %v18755_v36  ;;  %17542 = vmatprep.mubr.msk.f32.mxu0 %vm19326_vm2, %v21841_v20 }
0x136b   :  { %18757 = vmatprep.subr.bf16.mxu0 %v21842_v28 }
0x1371   :  { %17543 = vmatmul.mubr.f32.vlgmr.msra.gmra.mrb[34].mxu0 %v13771_v1 }
0x1372   :  { %18759 = vmatpush3.bf16.msra.mxu0 %v18749_v13  ;;  %17549 = vmatprep.mubr.msk.f32.mxu0 %vm19326_vm2, %v21841_v20 }
0x1373   :  { %18760 = vmatprep.subr.bf16.mxu0 %v21842_v28 }
0x1379   :  { %17550 = vmatmul.mubr.f32.vlgmr.msra.gmra.mrb[34].mxu0 %v13772_v31  ;;  %v19297_v31 = vld [vmem:[%s21707_s4 + $0x122] ss:$0 sm:$0xff] }
0x137a   :  { %18762 = vmatpush3.bf16.msra.mxu0 %v18761_v17  ;;  %17556 = vmatprep.mubr.msk.f32.mxu0 %vm19326_vm2, %v21841_v20 }
0x137b   :  { %18763 = vmatprep.subr.bf16.mxu0 %v21842_v28 }
0x1381   :  { %17557 = vmatmul.mubr.f32.vlgmr.msra.gmra.mrb[34].mxu0 %v13770_v52 }
0x1382   :  { %18765 = vmatpush3.bf16.msra.mxu0 %v18749_v13  ;;  %17563 = vmatprep.mubr.msk.f32.mxu0 %vm19326_vm2, %v21841_v20 }
0x1383   :  { %18838 = vmatprep.subr.bf16.mxu0 %v21842_v28 }
0x1389   :  { %17564 = vmatmul.mubr.f32.vlgmr.msra.gmra.mrb[34].mxu0 %v13770_v52 }
0x138a   :  { %18840 = vmatpush3.bf16.msra.mxu0 %v21070_v42  ;;  %17688 = vmatprep.mubr.msk.f32.mxu0 %vm19326_vm2, %v21841_v20 }
0x138b   :  { %18841 = vmatprep.subr.bf16.mxu0 %v21842_v28 }
0x138e   :  { %18843 = vmatpush3.bf16.msra.mxu0 %v21080_v50 }
0x138f   :  { %18844 = vmatprep.subr.bf16.mxu0 %v21842_v28 }
0x145c   :  { %v14158_v14 = vpop.f32.mrb[34].mxu0 }
0x145d   :  { %v14163_v57 = vsel %vm2257_vm3, %v14158_v14, 0  ;;  %v17565_v54 = vpop.f32.mrb[35].mxu0 }
0x145e   :  { %v14238_v32 = vand.u32 4294901760, %v14163_v57 }
0x1460   :  { %v14239_v2 = vsub.f32 %v14163_v57, %v14238_v32 }
0x1462   :  { %v14240_v3 = vand.u32 4294901760, %v14239_v2 }
0x1464   :  { %v14241_v29 = vsub.f32 %v14239_v2, %v14240_v3 }
0x1466   :  { %v14242_v16 = vand.u32 4294901760, %v14241_v29 }
0x1468   :  { %17583 = vmatmul.mubr.f32.vlgmr.msra.gmra.mrb[40].mxu1 %v14242_v16 }
0x1469   :  { %18780 = vmatpush3.bf16.msra.mxu1 %v21926_v12  ;;  %17601 = vmatprep.mubr.msk.f32.mxu1 %vm19326_vm2, %v21841_v20 }
0x146a   :  { %18781 = vmatprep.subr.bf16.mxu1 %v21842_v28 }
0x146d   :  { %18783 = vmatpush3.bf16.msra.mxu1 %v21927_v43 }
0x146e   :  { %18784 = vmatprep.subr.bf16.mxu1 %v21842_v28 }
0x1471   :  { %18786 = vmatpush3.bf16.msra.mxu1 %v21928_v11 }
0x1472   :  { %18787 = vmatprep.subr.bf16.mxu1 %v21842_v28 }
0x1475   :  { %18789 = vmatpush3.bf16.msra.mxu1 %v21929_v8 }
0x1476   :  { %18790 = vmatprep.subr.bf16.mxu1 %v21842_v28 }
0x1478   :  { %17602 = vmatmul.mubr.f32.vlgmr.msra.gmra.mrb[40].mxu1 %v14238_v32 }
0x1479   :  { %18792 = vmatpush3.bf16.msra.mxu1 %v21930_v19  ;;  %17620 = vmatprep.mubr.msk.f32.mxu1 %vm19326_vm2, %v21841_v20 }
0x147a   :  { %18793 = vmatprep.subr.bf16.mxu1 %v21842_v28 }
0x147d   :  { %18795 = vmatpush3.bf16.msra.mxu1 %v21931_v21 }
0x147e   :  { %18796 = vmatprep.subr.bf16.mxu1 %v21842_v28 }
0x1481   :  { %18798 = vmatpush3.bf16.msra.mxu1 %v21932_v26 }
0x1482   :  { %18799 = vmatprep.subr.bf16.mxu1 %v21842_v28 }
0x1485   :  { %18801 = vmatpush3.bf16.msra.mxu1 %v21933_v0 }
0x1486   :  { %18802 = vmatprep.subr.bf16.mxu1 %v21842_v28 }
0x1488   :  { %17621 = vmatmul.mubr.f32.vlgmr.msra.gmra.mrb[40].mxu1 %v14239_v2 }
0x1489   :  { %18804 = vmatpush3.bf16.msra.mxu1 %v20883_v23  ;;  %17639 = vmatprep.mubr.msk.f32.mxu1 %vm19326_vm2, %v21841_v20 }
0x148a   :  { %18805 = vmatprep.subr.bf16.mxu1 %v21842_v28 }
0x148d   :  { %18807 = vmatpush3.bf16.msra.mxu1 %v20924_v10 }
0x148e   :  { %18808 = vmatprep.subr.bf16.mxu1 %v21842_v28 }
0x1491   :  { %18810 = vmatpush3.bf16.msra.mxu1 %v20927_v49 }
0x1492   :  { %18811 = vmatprep.subr.bf16.mxu1 %v21842_v28 }
0x1495   :  { %18813 = vmatpush3.bf16.msra.mxu1 %v20931_v9 }
0x1496   :  { %18814 = vmatprep.subr.bf16.mxu1 %v21842_v28 }
0x1498   :  { %17640 = vmatmul.mubr.f32.vlgmr.msra.gmra.mrb[40].mxu1 %v14240_v3 }
0x1499   :  { %18816 = vmatpush3.bf16.msra.mxu1 %v21934_v55  ;;  %17658 = vmatprep.mubr.msk.f32.mxu1 %vm19326_vm2, %v21841_v20 }
0x149a   :  { %18817 = vmatprep.subr.bf16.mxu1 %v21842_v28 }
0x149d   :  { %18819 = vmatpush3.bf16.msra.mxu1 %v21935_v37 }
0x149e   :  { %18820 = vmatprep.subr.bf16.mxu1 %v21842_v28 }
0x14a1   :  { %18822 = vmatpush3.bf16.msra.mxu1 %v21936_v38 }
0x14a2   :  { %18823 = vmatprep.subr.bf16.mxu1 %v21842_v28 }
0x14a5   :  { %18825 = vmatpush3.bf16.msra.mxu1 %v21937_v34 }
0x14a6   :  { %18826 = vmatprep.subr.bf16.mxu1 %v21842_v28 }
0x14a8   :  { %17659 = vmatmul.mubr.f32.vlgmr.msra.gmra.mrb[40].mxu1 %v14238_v32 }
0x14a9   :  { %18828 = vmatpush3.bf16.msra.mxu1 %v20883_v23  ;;  %17677 = vmatprep.mubr.msk.f32.mxu1 %vm19326_vm2, %v21841_v20  ;;  %v19295_v23 = vld [vmem:[%s21703_s0 + $0x8] sm:$0xff] }
0x14aa   :  { %18829 = vmatprep.subr.bf16.mxu1 %v21842_v28  ;;  %v8752_v56 = vadd.f32 %v19296_v7, %v19295_v23 }
0x14ad   :  { %18831 = vmatpush3.bf16.msra.mxu1 %v20924_v10 }
0x14ae   :  { %18832 = vmatprep.subr.bf16.mxu1 %v21842_v28 }
0x14b1   :  { %18834 = vmatpush3.bf16.msra.mxu1 %v20927_v49 }
0x14b2   :  { %18835 = vmatprep.subr.bf16.mxu1 %v21842_v28 }
0x14b5   :  { %18837 = vmatpush3.bf16.msra.mxu1 %v20931_v9  ;;  %v8726_v9 = vadd.f32 %v21240_v44, %v21132_v45 }
0x14b7   :  { %v8727_v59 = vmax.f32 %v8726_v9, 0.0 }
0x14b8   :  { %17678 = vmatmul.mubr.f32.vlgmr.msra.gmra.mrb[40].mxu1 %v14238_v32  ;;  %v19299_v32 = vld [vmem:[%s21707_s4 + $0x121] ss:$0 sm:$0xff] }
0x14b9   :  { %v8728_v5 = vsel %vm114_vm0, %v8727_v59, 0.0 }
0x158b   :  { %v14698_v18 = vpop.f32.mrb[40].mxu1 }
0x158c   :  { %v18904_v10 = vadd.f32 %v14698_v18, %v8752_v56  ;;  %v17679_v62 = vpop.f32.mrb[41].mxu1 }
0x158e   :  { %v14703_v51 = vmax.f32 %v18904_v10, 0.0 }
0x1590   :  { %v14704_v49 = vsel %vm114_vm0, %v14703_v51, 0.0 }
0x1591   :  { %14705 = vadd.xlane.f32.xlu1 %v14704_v49 }
0x161e   :  { %v14706_v24 = vpop.xlane.xlu1 %14705 }
0x161f   :  { %v14707_v53 = vmul.f32 0.03125, %v14706_v24 }
0x1621   :  { %v14708_v4 = vsub.f32 %v14703_v51, %v14707_v53 }
0x1623   :  { %v14709_v13 = vmul.f32 %v14708_v4, %v14708_v4 }
0x1625   :  { %v14710_v27 = vsel %vm114_vm0, %v14709_v13, 0.0 }
0x1626   :  { %14711 = vadd.xlane.f32.xlu0 %v14710_v27 }
0x162a   :  { %8729 = vadd.xlane.f32.xlu0 %v8728_v5 }
0x16b3   :  { %v14712_v22 = vpop.xlane.xlu0 %14711 }
0x16b4   :  { %v14713_v25 = vmul.f32 0.03125, %v14712_v22 }
0x16b6   :  { %v14714_v60 = vadd.f32 1e-06, %v14713_v25 }
0x16b7   :  { %v8730_v33 = vpop.xlane.xlu0 %8729 }
0x16b8   :  { %19288 = vrsqrt.f32 %v14714_v60  ;;  %v8731_v52 = vmul.f32 0.03125, %v8730_v33 }
0x16ba   :  { %v8732_v6 = vsub.f32 %v8727_v59, %v8731_v52 }
0x16bc   :  { %v8733_v1 = vmul.f32 %v8732_v6, %v8732_v6 }
0x16be   :  { %v8734_v15 = vsel %vm114_vm0, %v8733_v1, 0.0 }
0x16bf   :  { %8735 = vadd.xlane.f32.xlu0 %v8734_v15 }
0x16c2   :  { %v19289_v45 = vpop.eup %19288 }
0x16c3   :  { %v14716_v44 = vmul.f32 %v19289_v45, %v14708_v4 }
0x16c5   :  { %v14717_v39 = vmul.f32 %v19297_v31, %v14716_v44 }
0x16c7   :  { %v21644_v47 = vadd.f32 %v19298_v61, %v14717_v39 }
0x16c9   :  { %v14720_v63 = vsel %vm114_vm0, %v21644_v47, 0 }
0x16ca   :  { %v14791_v46 = vand.u32 4294901760, %v14720_v63 }
0x16cc   :  { %v14792_v36 = vsub.f32 %v14720_v63, %v14791_v46 }
0x16ce   :  { %v14793_v17 = vand.u32 4294901760, %v14792_v36 }
0x16d0   :  { %v14794_v14 = vsub.f32 %v14792_v36, %v14793_v17 }
0x16d2   :  { %v14795_v57 = vand.u32 4294901760, %v14794_v14 }
0x16d4   :  { %17689 = vmatmul.mubr.f32.vlgmr.msra.gmra.mrb[36].mxu0 %v14795_v57 }
0x16d5   :  { %18846 = vmatpush3.bf16.msra.mxu0 %v21084_v58  ;;  %17699 = vmatprep.mubr.msk.f32.mxu0 %vm19326_vm2, %v21841_v20 }
0x16d6   :  { %18847 = vmatprep.subr.bf16.mxu0 %v21842_v28 }
0x16d9   :  { %18849 = vmatpush3.bf16.msra.mxu0 %v21088_v40  ;;  %v15248_v40 = vld [vmem:[%s21707_s4 + $0x124] ss:$0 sm:$0xff] }
0x16da   :  { %18850 = vmatprep.subr.bf16.mxu0 %v21842_v28 }
0x16dc   :  { %17700 = vmatmul.mubr.f32.vlgmr.msra.gmra.mrb[38].mxu0 %v14791_v46 }
0x16dd   :  { %18852 = vmatpush3.bf16.msra.mxu0 %v21086_v30  ;;  %17710 = vmatprep.mubr.msk.f32.mxu0 %vm19326_vm2, %v21841_v20 }
0x16de   :  { %18853 = vmatprep.subr.bf16.mxu0 %v21842_v28 }
0x16e1   :  { %18855 = vmatpush3.bf16.msra.mxu0 %v21090_v41 }
0x16e2   :  { %18856 = vmatprep.subr.bf16.mxu0 %v21842_v28 }
0x16e4   :  { %17711 = vmatmul.mubr.f32.vlgmr.msra.gmra.mrb[40].mxu0 %v14792_v36 }
0x16e5   :  { %18858 = vmatpush3.bf16.msra.mxu0 %v21070_v42  ;;  %17721 = vmatprep.mubr.msk.f32.mxu0 %vm19326_vm2, %v21841_v20 }
0x16e6   :  { %18859 = vmatprep.subr.bf16.mxu0 %v21842_v28 }
0x16e9   :  { %18861 = vmatpush3.bf16.msra.mxu0 %v21080_v50 }
0x16ea   :  { %18862 = vmatprep.subr.bf16.mxu0 %v21842_v28 }
0x16ec   :  { %17722 = vmatmul.mubr.f32.vlgmr.msra.gmra.mrb[42].mxu0 %v14793_v17 }
0x16ed   :  { %18864 = vmatpush3.bf16.msra.mxu0 %v21092_v48  ;;  %17732 = vmatprep.mubr.msk.f32.mxu0 %vm19326_vm2, %v21841_v20 }
0x16ee   :  { %18865 = vmatprep.subr.bf16.mxu0 %v21842_v28 }
0x16f1   :  { %18867 = vmatpush3.bf16.msra.mxu0 %v21094_v35 }
0x16f2   :  { %18868 = vmatprep.subr.bf16.mxu0 %v21842_v28 }
0x16f4   :  { %17733 = vmatmul.mubr.f32.vlgmr.msra.gmra.mrb[44].mxu0 %v14791_v46 }
0x16f5   :  { %18870 = vmatpush3.bf16.msra.mxu0 %v21070_v42  ;;  %17743 = vmatprep.mubr.msk.f32.mxu0 %vm19326_vm2, %v21841_v20  ;;  %v15249_v42 = vld [vmem:[%s21707_s4 + $0x125] ss:$0 sm:$0xff]  ;;  %s19328_s4 = smov [#allocation2]  }
0x16f6   :  { %18871 = vmatprep.subr.bf16.mxu0 %v21842_v28  ;;  %s15230_s19 = sshll.u32 %s19328_s4, 4  ;;  %s15231_s19 = int_to_ptr.vmem [resolvable:$true] %s15230_s19 }
0x16f7   :  { %s19300_s1 = scalar_lea.vmem %s15231_s19, 256  ;;  %p19305_p1 = scmp.lt.s32.totalorder %s15231_s19, %s15231_s19 }
0x16f8   :  { %p19301_p0 = scmp.ne.s32.totalorder %s15231_s19, %s19300_s1  ;;  %p19306_p2 = scmp.lt.s32.totalorder %s19300_s1, %s19300_s1 }
0x16f9   :  { %18873 = vmatpush3.bf16.msra.mxu0 %v21080_v50 }
0x16fa   :  { %p19307_p3 = por %p19306_p2, %p19305_p1 }
0x16fc   :  { %17744 = vmatmul.mubr.f32.vlgmr.msra.gmra.mrb[46].mxu0 %v14791_v46  ;;  %p19308_p4 = pnand %p19307_p3, %p19301_p0 }
0x174c   :  { %v8736_v48 = vpop.xlane.xlu0 %8735 }
0x174d   :  { %v8737_v41 = vmul.f32 0.03125, %v8736_v48 }
0x174f   :  { %v8738_v58 = vadd.f32 1e-06, %v8737_v41 }
0x1751   :  { %19290 = vrsqrt.f32 %v8738_v58 }
0x175b   :  { %v19291_v30 = vpop.eup %19290 }
0x175c   :  { %v8740_v35 = vmul.f32 %v19291_v30, %v8732_v6 }
0x175e   :  { %v8745_v20 = vmul.f32 %v15248_v40, %v8740_v35 }
0x1760   :  { %v8750_v54 = vadd.f32 %v15249_v42, %v8745_v20 }
0x1762   :  { %8751 = vst.msk [vmem:[#allocation2] sm:$0xff] %vm114_vm0, %v8750_v54 }
0x17a7   :  { %v14797_v28 = vpop.f32.mrb[36].mxu0 }
0x17a8   :  { %v17690_v50 = vpop.f32.mrb[37].mxu0  ;;  %v14798_v2 = vadd.f32 %v19299_v32, %v14797_v28 }
0x17af   :  { %v14888_v3 = vpop.f32.mrb[38].mxu0 }
0x17b0   :  { %v14889_v29 = vadd.f32 %v14888_v3, %v14798_v2  ;;  %v17701_v16 = vpop.f32.mrb[39].mxu0 }
0x17b7   :  { %v14968_v12 = vpop.f32.mrb[40].mxu0 }
0x17b8   :  { %v14969_v43 = vadd.f32 %v14968_v12, %v14889_v29  ;;  %v17712_v11 = vpop.f32.mrb[41].mxu0 }
0x17bf   :  { %v15045_v8 = vpop.f32.mrb[42].mxu0 }
0x17c0   :  { %v15046_v19 = vadd.f32 %v15045_v8, %v14969_v43  ;;  %v17723_v21 = vpop.f32.mrb[43].mxu0 }
0x17c7   :  { %v15128_v26 = vpop.f32.mrb[44].mxu0 }
0x17c8   :  { %v15129_v0 = vadd.f32 %v15128_v26, %v15046_v19  ;;  %v17734_v55 = vpop.f32.mrb[45].mxu0 }
0x17cf   :  { %v15203_v37 = vpop.f32.mrb[46].mxu0 }
0x17d0   :  { %v15204_v38 = vadd.f32 %v15203_v37, %v15129_v0  ;;  %v17745_v34 = vpop.f32.mrb[47].mxu0 }
0x17d2   :  { %v15207_v23 = vadd.f32 %v15204_v38, %v21644_v47 }
0x17d4   :  { %v15208_v7 = vmax.f32 %v15207_v23, 0.0 }
0x17d6   :  { %v15209_v56 = vsel %vm114_vm0, %v15208_v7, 0.0 }
0x17d7   :  { %15210 = vadd.xlane.f32.xlu1 %v15209_v56 }
0x1864   :  { %v15211_v18 = vpop.xlane.xlu1 %15210 }
0x1865   :  { %v15212_v10 = vmul.f32 0.03125, %v15211_v18 }
0x1867   :  { %v15213_v62 = vsub.f32 %v15208_v7, %v15212_v10 }
0x1869   :  { %v15214_v51 = vmul.f32 %v15213_v62, %v15213_v62 }
0x186b   :  { %v15215_v49 = vsel %vm114_vm0, %v15214_v51, 0.0 }
0x186c   :  { %15216 = vadd.xlane.f32.xlu1 %v15215_v49 }
0x18f9   :  { %v15217_v24 = vpop.xlane.xlu1 %15216 }
0x18fa   :  { %v15218_v53 = vmul.f32 0.03125, %v15217_v24 }
0x18fc   :  { %v15219_v9 = vadd.f32 1e-06, %v15218_v53 }
0x18fe   :  { %19292 = vrsqrt.f32 %v15219_v9 }
0x1908   :  { %v19293_v4 = vpop.eup %19292 }
0x1909   :  { %v15221_v13 = vmul.f32 %v19293_v4, %v15213_v62 }
0x190b   :  { %v15222_v27 = vmul.f32 %v15248_v40, %v15221_v13 }
0x190d   :  { %v15223_v59 = vadd.f32 %v15249_v42, %v15222_v27 }
0x190f   :  { %15224 = vst.msk [vmem:[#allocation2 + $0x8] sm:$0xff] %vm114_vm0, %v15223_v59 }
0x1910   :  { %19311 = shalt.err (!%p19308_p4)
}
0x1911   :  { %s19312_s22 = scalar_lea.hbm %s21708_s5, 256 }
0x1912   :  { %p19313_p5 = scmp.ne.s32.totalorder %s21708_s5, %s19312_s22  ;;  %p19316_p6 = scmp.lt.u32.totalorder %s19312_s22, %s21708_s5 }
0x1914   :  { %p19318_p7 = pnand %p19316_p6, %p19313_p5 }
0x1916   :  { %19321 = shalt.err (!%p19318_p7)
}
0x1917   :  { %s19329_s28 = smov 128   ;;  %s19330_s29 = smov 8  }
0x1918   :  { %15236 = dma.vmem_to_hbm [thread:$0]  %s15231_s19, 256, %s21708_s5, [#allocation3], %s19329_s28, %s19329_s28, %s19330_s29  }
0x1919   :  { %19322 = dma.done.wait [#allocation3], 256  }
0x191a   :  { %19323 = vsyncadd [#allocation3], 4294967040 }
0x191b   :  { %15240 = vsyncpa [#allocation3], 1 }

</bundles_post_ra>
